<compile_context>
chip_gen: v7x
topology: tpu7x:2x2x1
jax: 0.10.0
libtpu: 0.0.40
codegen_flags: <defaults>
</compile_context>

<pallas_src>
import functools

import jax
import jax.numpy as jnp
from jax import lax
from jax.experimental import pallas as pl
from jax.experimental.pallas import tpu as pltpu


def _cdiv(a, b):
    return (a + b - 1) // b


def _round_up(a, b):
    return _cdiv(a, b) * b


def _device_kind():
    try:
        return jax.devices()[0].device_kind.lower()
    except Exception:
        return ""


def _vmem_limit_bytes():
    cap = 64 * 1024 * 1024
    try:
        cap = int(getattr(pltpu.get_tpu_info(), "vmem_capacity_bytes", cap))
    except Exception:
        pass
    # Leave ~12.5% headroom for compiler-internal scratch.
    return (cap * 7) // 8


# --------------------------------------------------------------------------
# Fused kernel: projection heads + contrastive KD loss (pixel + region banks).
# --------------------------------------------------------------------------
def _fused_kd_kernel(flags_ref,
                     s_ref, t_ref, mask_ref,
                     w1s_ref, w2s_ref, w1t_ref, w2t_ref,
                     xp_ref, xr_ref, pmask_ref, rmask_ref,
                     pix_ref, reg_ref,
                     pix_acc, reg_acc,
                     *, inv_t, pix_chunk, reg_chunk, pix_masked, reg_masked):
    i = pl.program_id(1)                      # row-tile axis within this chunk
    n_i = pl.num_programs(1)

    @pl.when(i == 0)
    def _init():
        pix_acc[...] = jnp.zeros_like(pix_acc)
        reg_acc[...] = jnp.zeros_like(reg_acc)

    # Scalar-prefetched per-tile flag: skip all compute for all-ignore tiles.
    tile_valid = flags_ref[pl.program_id(0) * n_i + i] > 0

    @pl.when(tile_valid)
    def _compute():
        def project(x_bf16, w1_ref, w2_ref):
            # 1x1 conv over channels == row-tile matmul (bf16 MXU, f32 acc).
            # BN eval-mode scale is pre-folded into w1; shift is zero.
            h = jnp.dot(x_bf16, w1_ref[...], preferred_element_type=jnp.float32)
            h = jnp.maximum(h, 0.0)                           # ReLU
            y = jnp.dot(h.astype(jnp.bfloat16), w2_ref[...],
                        preferred_element_type=jnp.float32)
            # F.normalize(p=2) via rsqrt (EUP slot); fold 1/(contrast_T*kd_T)
            # into the per-row normalizer ((tile,1) mul instead of (tile,D)).
            inv_nrm = lax.rsqrt(jnp.sum(y * y, axis=-1, keepdims=True) + 1e-24)
            return y * (inv_nrm * inv_t)

        s_emb = project(s_ref[...], w1s_ref, w2s_ref)
        t_emb = project(t_ref[...], w1t_ref, w2t_ref)
        rows = s_emb.shape[0]
        # Stack student + teacher so every bank chunk needs one MXU pass.
        st = jnp.concatenate([s_emb, t_emb], axis=0).astype(jnp.bfloat16)
        rmask = mask_ref[...]                                  # (rows, 1) {0,1}

        def masked_kl_sum(x_ref, cmask_ref, chunk, col_masked):
            # Online-softmax KL over M chunks:
            #   KL_row = V/Z_t - (m_t + log Z_t) + (m_s + log Z_s)
            #   V = sum_j exp(t_j - m_t) * (t_j - s_j)
            # Only (rows,1) running state is carried; no (rows, M) log-probs.
            n_chunks = x_ref.shape[1] // chunk
            neg = jnp.full((rows, 1), -1e30, jnp.float32)
            zero = jnp.zeros((rows, 1), jnp.float32)

            def body(ci, carry):
                m_t, z_t, v_t, m_s, z_s = carry
                off = pl.multiple_of(ci * chunk, chunk)
                xb = x_ref[:, pl.ds(off, chunk)]               # (D, chunk) bf16
                logits = jnp.dot(st, xb, preferred_element_type=jnp.float32)
                sl = logits[:rows]
                tl = logits[rows:]
                m_t_new = jnp.maximum(m_t, jnp.max(tl, axis=-1, keepdims=True))
                m_s_new = jnp.maximum(m_s, jnp.max(sl, axis=-1, keepdims=True))
                e_t = jnp.exp(tl - m_t_new)
                e_s = jnp.exp(sl - m_s_new)
                if col_masked:                                 # static: padded cols
                    cm = cmask_ref[:, pl.ds(off, chunk)]       # (1, chunk) {0,1}
                    e_t = e_t * cm
                    e_s = e_s * cm
                a_t = jnp.exp(m_t - m_t_new)
                a_s = jnp.exp(m_s - m_s_new)
                z_t = a_t * z_t + jnp.sum(e_t, axis=-1, keepdims=True)
                z_s = a_s * z_s + jnp.sum(e_s, axis=-1, keepdims=True)
                v_t = a_t * v_t + jnp.sum(e_t * (tl - sl), axis=-1, keepdims=True)
                return (m_t_new, z_t, v_t, m_s_new, z_s)

            m_t, z_t, v_t, m_s, z_s = lax.fori_loop(
                0, n_chunks, body, (neg, zero, zero, neg, zero),
                unroll=n_chunks <= 4)
            per_row = (v_t * pl.reciprocal(z_t, approx=True)
                       - (m_t + jnp.log(z_t)) + (m_s + jnp.log(z_s)))
            return jnp.sum(per_row * rmask)                    # masked scalar sum

        pix_acc[...] = pix_acc[...] + masked_kl_sum(xp_ref, pmask_ref,
                                                    pix_chunk, pix_masked)
        reg_acc[...] = reg_acc[...] + masked_kl_sum(xr_ref, rmask_ref,
                                                    reg_chunk, reg_masked)

    @pl.when(i == n_i - 1)
    def _finalize():
        pix_ref[...] = pix_acc[...].reshape(1, 1, 1)
        reg_ref[...] = reg_acc[...].reshape(1, 1, 1)


def fused_contrast_kd(s_rows, t_rows, mask,
                      w1s, bns_scale, w2s,
                      w1t, bnt_scale, w2t,
                      x_pixel, x_region, *,
                      contrast_temperature, contrast_kd_temperature,
                      tile_rows=None, num_parallel=None, bank_chunk=2048):
    """Returns (sum of masked KL vs pixel bank, sum of masked KL vs region bank)."""
    n, cs = s_rows.shape
    ct = t_rows.shape[1]
    d = w2s.shape[1]

    kind = _device_kind()
    is_v7 = "v7" in kind
    if num_parallel is None:
        num_parallel = 2 if is_v7 else 1      # TensorCores per chip
    if tile_rows is None:
        tile_rows = 256 if is_v7 else 512     # v7x: 64 MiB VMEM; v5e/v6e: 128 MiB

    # Pick a row tile (>=8 sublanes) and pad rows so the grid divides evenly;
    # padded rows carry mask = 0 so they contribute nothing to the loss.
    per_core = _round_up(_cdiv(n, num_parallel), 8)
    tile = min(tile_rows, per_core)
    tiles_per_chunk = _cdiv(per_core, tile)
    num_tiles = num_parallel * tiles_per_chunk
    padded_n = num_tiles * tile
    pad = padded_n - n

    s_pad = jnp.pad(s_rows, ((0, pad), (0, 0))).astype(jnp.bfloat16)
    t_pad = jnp.pad(t_rows, ((0, pad), (0, 0))).astype(jnp.bfloat16)
    mask_pad = jnp.pad(mask, ((0, pad), (0, 0))).astype(jnp.float32)

    # Per-tile "has any valid row" flags (SMEM scalar prefetch).
    tile_flags = (jnp.sum(mask_pad.reshape(num_tiles, tile), axis=1) > 0
                  ).astype(jnp.int32)

    # Fold the eval-mode BN scale into the first 1x1-conv weights (per output
    # channel).  BN shift is zero (gamma=1, beta=0, mean=0, var=1, eps=1e-5).
    # TODO(synk): non-identity SyncBN running stats would need a bias re-added
    # before the ReLU.
    w1s_eff = (w1s * bns_scale).astype(jnp.bfloat16)
    w1t_eff = (w1t * bnt_scale).astype(jnp.bfloat16)
    w2s_b = w2s.astype(jnp.bfloat16)
    w2t_b = w2t.astype(jnp.bfloat16)

    def prep_bank(x):
        # Transpose to (D, M), pad M to a lane-friendly multiple of the chunk
        # size, and build a {0,1} column-validity mask for the softmax sums.
        m = x.shape[0]
        chunk = min(bank_chunk, _round_up(m, 128))      # multiple of 128 lanes
        m_pad = _round_up(m, chunk)
        xT = jnp.pad(jnp.transpose(x), ((0, 0), (0, m_pad - m))).astype(jnp.bfloat16)
        cmask = (jnp.arange(m_pad) < m).astype(jnp.float32).reshape(1, m_pad)
        return xT, cmask, chunk, (m_pad != m)

    xpT, pmask, pix_chunk, pix_masked = prep_bank(x_pixel)
    xrT, rmask, reg_chunk, reg_masked = prep_bank(x_region)
    mp_pad = xpT.shape[1]
    mr_pad = xrT.shape[1]

    inv_t = 1.0 / (contrast_temperature * contrast_kd_temperature)
    kernel = functools.partial(_fused_kd_kernel, inv_t=inv_t,
                               pix_chunk=pix_chunk, reg_chunk=reg_chunk,
                               pix_masked=pix_masked, reg_masked=reg_masked)

    # index_maps receive the scalar-prefetch ref as a trailing positional arg.
    def row_map(c, i, flags):
        return (c * tiles_per_chunk + i, 0)

    def const_map(c, i, flags):
        return (0, 0)

    def out_map(c, i, flags):
        return (c, 0, 0)

    def const_spec(shape):
        # Constant-index operands are fetched once; double-buffering them only
        # doubles VMEM with no overlap benefit -> single buffer.
        return pl.BlockSpec(shape, const_map, pipeline_mode=pl.Buffered(1))

    flops = int(2 * padded_n * (cs * d + d * d) + 2 * padded_n * (ct * d + d * d)
                + 2 * (2 * padded_n) * d * (mp_pad + mr_pad))
    transcendentals = int(2 * padded_n * (mp_pad + mr_pad) + 4 * padded_n)
    bytes_accessed = int(2 * (s_pad.size + t_pad.size) + 4 * mask_pad.size
                         + 2 * (w1s_eff.size + w2s_b.size + w1t_eff.size + w2t_b.size)
                         + 2 * (xpT.size + xrT.size)
                         + 4 * (pmask.size + rmask.size)
                         + 4 * tile_flags.size + 8 * num_parallel)

    pix, reg = pl.pallas_call(
        kernel,
        out_shape=(jax.ShapeDtypeStruct((num_parallel, 1, 1), jnp.float32),
                   jax.ShapeDtypeStruct((num_parallel, 1, 1), jnp.float32)),
        grid_spec=pltpu.PrefetchScalarGridSpec(
            num_scalar_prefetch=1,
            grid=(num_parallel, tiles_per_chunk),
            in_specs=[
                pl.BlockSpec((tile, cs), row_map),     # student rows
                pl.BlockSpec((tile, ct), row_map),     # teacher rows
                pl.BlockSpec((tile, 1), row_map),      # valid-row mask
                const_spec((cs, d)),                   # student W1 * bn_scale
                const_spec((d, d)),                    # student W2
                const_spec((ct, d)),                   # teacher W1 * bn_scale
                const_spec((d, d)),                    # teacher W2
                const_spec((d, mp_pad)),               # pixel bank (D, Mp)
                const_spec((d, mr_pad)),               # region bank (D, Mr)
                const_spec((1, mp_pad)),               # pixel column mask
                const_spec((1, mr_pad)),               # region column mask
            ],
            out_specs=[pl.BlockSpec((1, 1, 1), out_map),
                       pl.BlockSpec((1, 1, 1), out_map)],
            scratch_shapes=[pltpu.VMEM((1, 1), jnp.float32),
                            pltpu.VMEM((1, 1), jnp.float32)],
        ),
        compiler_params=pltpu.CompilerParams(
            dimension_semantics=("parallel", "arbitrary"),
            vmem_limit_bytes=_vmem_limit_bytes()),
        cost_estimate=pl.CostEstimate(flops=flops,
                                      transcendentals=transcendentals,
                                      bytes_accessed=bytes_accessed),
    )(tile_flags, s_pad, t_pad, mask_pad,
      w1s_eff, w2s_b, w1t_eff, w2t_b, xpT, xrT, pmask, rmask)
    return jnp.sum(pix), jnp.sum(reg)


# --------------------------------------------------------------------------
# Module
# --------------------------------------------------------------------------
class StudentSegContrastPallas:
    def __init__(self, num_classes, pixel_memory_size, region_memory_size,
                 region_contrast_size, pixel_contrast_size,
                 contrast_kd_temperature, contrast_temperature, ignore_label,
                 key):
        self.base_temperature = 0.1
        self.contrast_kd_temperature = contrast_kd_temperature
        self.contrast_temperature = contrast_temperature
        self.dim = 256
        self.ignore_label = ignore_label
        self.num_classes = num_classes
        self.region_memory_size = region_memory_size
        self.pixel_memory_size = pixel_memory_size
        self.pixel_contrast_size = pixel_contrast_size
        self.region_contrast_size = region_contrast_size

        ks = jax.random.split(key, 8)
        # Conv weights stored as (Cin, Cout) == PyTorch (Cout, Cin, 1, 1) transposed.
        self.ph_w1 = jax.random.normal(ks[0], (256, 256), jnp.float32) / jnp.sqrt(256.0)
        self.ph_w2 = jax.random.normal(ks[1], (256, 256), jnp.float32) / jnp.sqrt(256.0)
        self.tc_w1 = jax.random.normal(ks[2], (768, 256), jnp.float32) / jnp.sqrt(768.0)
        self.tc_w2 = jax.random.normal(ks[3], (256, 256), jnp.float32) / jnp.sqrt(256.0)
        # BatchNorm (eval-mode): gamma=1, beta=0, mean=0, var=1, eps=1e-5
        # => per-channel scale only; shift is identically zero.
        eps = 1e-5
        self.ph_bn_scale = jnp.full((1, 256), 1.0 / jnp.sqrt(1.0 + eps), jnp.float32)
        self.tc_bn_scale = jnp.full((1, 256), 1.0 / jnp.sqrt(1.0 + eps), jnp.float32)

        # Memory banks (L2-normalized random init, matching register_buffer setup).
        q = jax.random.normal(ks[4], (num_classes, region_memory_size, self.dim), jnp.float32)
        self.teacher_segment_queue = q / jnp.sqrt(jnp.sum(q * q, axis=2, keepdims=True))
        q = jax.random.normal(ks[5], (num_classes, pixel_memory_size, self.dim), jnp.float32)
        self.teacher_pixel_queue = q / jnp.sqrt(jnp.sum(q * q, axis=2, keepdims=True))

        self._pixel_perm_key = ks[6]
        self._region_perm_key = ks[7]

    def __call__(self, s_feats, t_feats, labels, predict):
        B, Cs, H, W = s_feats.shape
        Ct = t_feats.shape[1]

        # NCHW -> flattened NHWC rows (XLA glue outside the kernel).
        s_rows = jnp.transpose(s_feats, (0, 2, 3, 1)).reshape(-1, Cs)
        t_rows = jnp.transpose(t_feats, (0, 2, 3, 1)).reshape(-1, Ct)

        # Nearest-neighbor resize of labels to (H, W): PyTorch 'nearest' uses
        # floor(i * in/out).
        Hl, Wl = labels.shape[1], labels.shape[2]
        hi = jnp.floor(jnp.arange(H) * (Hl / H)).astype(jnp.int32)
        wi = jnp.floor(jnp.arange(W) * (Wl / W)).astype(jnp.int32)
        lab = labels[:, hi][:, :, wi]                         # (B, H, W)
        lab_flat = lab.reshape(-1)
        mask = (lab_flat != self.ignore_label).astype(jnp.float32).reshape(-1, 1)
        n_valid = jnp.sum(mask)

        # `predict` is reshaped but never used by the reference forward.
        _ = predict.reshape(B, -1)

        # TODO(synk): _dequeue_and_enqueue (torch.distributed all_gather,
        # randperm, in-place queue writes) not modeled; memory banks are fixed.

        # Deterministic "randperm" sampling of queue negatives (glue gather).
        pix_idx = jax.random.permutation(
            self._pixel_perm_key, self.pixel_memory_size)[:self.pixel_contrast_size]
        x_pixel = self.teacher_pixel_queue[:, pix_idx, :].reshape(-1, self.dim)
        reg_idx = jax.random.permutation(
            self._region_perm_key, self.region_memory_size)[:self.region_contrast_size]
        x_region = self.teacher_segment_queue[:, reg_idx, :].reshape(-1, self.dim)

        pix_sum, reg_sum = fused_contrast_kd(
            s_rows, t_rows, mask,
            self.ph_w1, self.ph_bn_scale, self.ph_w2,
            self.tc_w1, self.tc_bn_scale, self.tc_w2,
            x_pixel, x_region,
            contrast_temperature=self.contrast_temperature,
            contrast_kd_temperature=self.contrast_kd_temperature)

        # KL 'batchmean' over the valid rows, times kd_T^2 (as in the reference).
        scale = (self.contrast_kd_temperature ** 2) / jnp.maximum(n_valid, 1.0)
        pixel_sim_dis = jnp.where(n_valid > 0, pix_sum * scale, 0.0)
        region_sim_dis = jnp.where(n_valid > 0, reg_sum * scale, 0.0)
        return pixel_sim_dis, region_sim_dis


if __name__ == "__main__":
    key = jax.random.PRNGKey(0)
    k_mod, k_s, k_t, k_lab, k_ign, k_pred = jax.random.split(key, 6)

    num_classes = 4
    module = StudentSegContrastPallas(
        num_classes=num_classes,
        pixel_memory_size=64,
        region_memory_size=8,
        region_contrast_size=4,
        pixel_contrast_size=16,
        contrast_kd_temperature=1.0,
        contrast_temperature=0.1,
        ignore_label=255,
        key=k_mod)

    B, H, W = 2, 8, 8
    s_feats = jax.random.normal(k_s, (B, 256, H, W), jnp.float32)
    t_feats = jax.random.normal(k_t, (B, 768, H, W), jnp.float32)
    labels = jax.random.randint(k_lab, (B, 16, 16), 0, num_classes).astype(jnp.int32)
    ign = jax.random.bernoulli(k_ign, 0.1, (B, 16, 16))
    labels = jnp.where(ign, 255, labels)
    predict = jax.random.randint(k_pred, (B, 16, 16), 0, num_classes).astype(jnp.int32)

    pixel_sim_dis, region_sim_dis = module(s_feats, t_feats, labels, predict)
    jax.block_until_ready((pixel_sim_dis, region_sim_dis))
    assert jnp.isfinite(pixel_sim_dis) and jnp.isfinite(region_sim_dis)
    print("KERNEL_OK")
</pallas_src>

<mosaic_0001>
module attributes {stable_mosaic.version = 11 : i64} {
  func.func @_fused_kd_kernel(%arg0: i32, %arg1: i32, %arg2: memref<1xi32, #tpu.memory_space<smem>>, %arg3: memref<128x256xbf16, #tpu.memory_space<vmem>>, %arg4: memref<128x768xbf16, #tpu.memory_space<vmem>>, %arg5: memref<128x1xf32, #tpu.memory_space<vmem>>, %arg6: memref<256x256xbf16, #tpu.memory_space<vmem>>, %arg7: memref<256x256xbf16, #tpu.memory_space<vmem>>, %arg8: memref<768x256xbf16, #tpu.memory_space<vmem>>, %arg9: memref<256x256xbf16, #tpu.memory_space<vmem>>, %arg10: memref<256x128xbf16, #tpu.memory_space<vmem>>, %arg11: memref<256x128xbf16, #tpu.memory_space<vmem>>, %arg12: memref<1x128xf32, #tpu.memory_space<vmem>>, %arg13: memref<1x128xf32, #tpu.memory_space<vmem>>, %arg14: memref<1x1x1xf32, #tpu.memory_space<vmem>>, %arg15: memref<1x1x1xf32, #tpu.memory_space<vmem>>, %arg16: memref<1x1xf32, #tpu.memory_space<vmem>>, %arg17: memref<1x1xf32, #tpu.memory_space<vmem>>) attributes {dimension_semantics = [#tpu.dimension_semantics<parallel>, #tpu.dimension_semantics<arbitrary>], iteration_bounds = array<i64: 1, 1>, scalar_prefetch = 1 : i64, scratch_operands = 2 : i64, tpu.core_type = #tpu.core_type<tc>, window_params = [{transform_indices = @transform_0, window_bounds = array<i64: 128, 256>}, {transform_indices = @transform_1, window_bounds = array<i64: 128, 768>}, {transform_indices = @transform_2, window_bounds = array<i64: 128, 1>}, {pipeline_mode = #tpu.pipeline_mode<synchronous>, transform_indices = @transform_3, window_bounds = array<i64: 256, 256>}, {pipeline_mode = #tpu.pipeline_mode<synchronous>, transform_indices = @transform_4, window_bounds = array<i64: 256, 256>}, {pipeline_mode = #tpu.pipeline_mode<synchronous>, transform_indices = @transform_5, window_bounds = array<i64: 768, 256>}, {pipeline_mode = #tpu.pipeline_mode<synchronous>, transform_indices = @transform_6, window_bounds = array<i64: 256, 256>}, {pipeline_mode = #tpu.pipeline_mode<synchronous>, transform_indices = @transform_7, window_bounds = array<i64: 256, 128>}, {pipeline_mode = #tpu.pipeline_mode<synchronous>, transform_indices = @transform_8, window_bounds = array<i64: 256, 128>}, {pipeline_mode = #tpu.pipeline_mode<synchronous>, transform_indices = @transform_9, window_bounds = array<i64: 1, 128>}, {pipeline_mode = #tpu.pipeline_mode<synchronous>, transform_indices = @transform_10, window_bounds = array<i64: 1, 128>}, {transform_indices = @transform_11, window_bounds = array<i64: 1, 1, 1>}, {transform_indices = @transform_12, window_bounds = array<i64: 1, 1, 1>}]} {
    %c0_i32 = arith.constant 0 : i32
    %0 = arith.cmpi eq, %arg1, %c0_i32 : i32
    %1 = arith.extui %0 : i1 to i32
    %c0_i32_0 = arith.constant 0 : i32
    %2 = arith.cmpi ne, %1, %c0_i32_0 : i32
    scf.if %2 {
      %cst = arith.constant 0.000000e+00 : f32
      %13 = vector.broadcast %cst : f32 to vector<1x1xf32>
      %c0 = arith.constant 0 : index
      %c0_5 = arith.constant 0 : index
      %14 = vector.load %arg16[%c0, %c0_5] : memref<1x1xf32, #tpu.memory_space<vmem>>, vector<1x1xf32>
      tpu.vector_store %arg16[%c0, %c0_5], %13 {strides = array<i32>} : memref<1x1xf32, #tpu.memory_space<vmem>>, vector<1x1xf32>,
      %cst_6 = arith.constant 0.000000e+00 : f32
      %15 = vector.broadcast %cst_6 : f32 to vector<1x1xf32>
      %c0_7 = arith.constant 0 : index
      %c0_8 = arith.constant 0 : index
      %16 = vector.load %arg17[%c0_7, %c0_8] : memref<1x1xf32, #tpu.memory_space<vmem>>, vector<1x1xf32>
      tpu.vector_store %arg17[%c0_7, %c0_8], %15 {strides = array<i32>} : memref<1x1xf32, #tpu.memory_space<vmem>>, vector<1x1xf32>,
    } else {
    }
    %c1_i32 = arith.constant 1 : i32
    %3 = arith.muli %arg0, %c1_i32 : i32
    %4 = arith.addi %3, %arg1 : i32
    %5 = arith.index_cast %4 : i32 to index
    %6 = memref.load %arg2[%5] : memref<1xi32, #tpu.memory_space<smem>>
    %c0_i32_1 = arith.constant 0 : i32
    %7 = arith.cmpi sgt, %6, %c0_i32_1 : i32
    %8 = arith.extui %7 : i1 to i32
    %c0_i32_2 = arith.constant 0 : i32
    %9 = arith.cmpi ne, %8, %c0_i32_2 : i32
    scf.if %9 {
      %c0 = arith.constant 0 : index
      %c0_5 = arith.constant 0 : index
      %13 = vector.load %arg3[%c0, %c0_5] : memref<128x256xbf16, #tpu.memory_space<vmem>>, vector<128x256xbf16>
      %c0_6 = arith.constant 0 : index
      %c0_7 = arith.constant 0 : index
      %14 = vector.load %arg6[%c0_6, %c0_7] : memref<256x256xbf16, #tpu.memory_space<vmem>>, vector<256x256xbf16>
      %cst = arith.constant dense<0.000000e+00> : vector<128x256xf32>
      %15 = tpu.matmul %13, %14, %cst {dimension_numbers = #tpu.dot_dimension_numbers<[1], [0], [0], [1], [0, 0, 1, 1], [], []>} : vector<128x256xbf16>, vector<256x256xbf16>, vector<128x256xf32> -> vector<128x256xf32>
      %cst_8 = arith.constant 0.000000e+00 : f32
      %16 = vector.broadcast %cst_8 : f32 to vector<128x256xf32>
      %17 = arith.maximumf %15, %16 : vector<128x256xf32>
      %18 = arith.truncf %17 : vector<128x256xf32> to vector<128x256xbf16>
      %c0_9 = arith.constant 0 : index
      %c0_10 = arith.constant 0 : index
      %19 = vector.load %arg7[%c0_9, %c0_10] : memref<256x256xbf16, #tpu.memory_space<vmem>>, vector<256x256xbf16>
      %cst_11 = arith.constant dense<0.000000e+00> : vector<128x256xf32>
      %20 = tpu.matmul %18, %19, %cst_11 {dimension_numbers = #tpu.dot_dimension_numbers<[1], [0], [0], [1], [0, 0, 1, 1], [], []>} : vector<128x256xbf16>, vector<256x256xbf16>, vector<128x256xf32> -> vector<128x256xf32>
      %21 = arith.mulf %20, %20 : vector<128x256xf32>
      %cst_12 = arith.constant dense<0.000000e+00> : vector<128xf32>
      %22 = vector.multi_reduction <add>, %21, %cst_12 [1] : vector<128x256xf32> to vector<128xf32>
      %23 = vector.shape_cast %22 : vector<128xf32> to vector<128x1xf32>
      %cst_13 = arith.constant 1.000000e-24 : f32
      %24 = vector.broadcast %cst_13 : f32 to vector<128x1xf32>
      %25 = arith.addf %23, %24 : vector<128x1xf32>
      %26 = math.rsqrt %25 : vector<128x1xf32>
      %cst_14 = arith.constant 1.000000e+01 : f32
      %27 = vector.broadcast %cst_14 : f32 to vector<128x1xf32>
      %28 = arith.mulf %26, %27 : vector<128x1xf32>
      %29 = vector.broadcast %28 : vector<128x1xf32> to vector<128x256xf32>
      %30 = arith.mulf %20, %29 : vector<128x256xf32>
      %c0_15 = arith.constant 0 : index
      %c0_16 = arith.constant 0 : index
      %31 = vector.load %arg4[%c0_15, %c0_16] : memref<128x768xbf16, #tpu.memory_space<vmem>>, vector<128x768xbf16>
      %c0_17 = arith.constant 0 : index
      %c0_18 = arith.constant 0 : index
      %32 = vector.load %arg8[%c0_17, %c0_18] : memref<768x256xbf16, #tpu.memory_space<vmem>>, vector<768x256xbf16>
      %cst_19 = arith.constant dense<0.000000e+00> : vector<128x256xf32>
      %33 = tpu.matmul %31, %32, %cst_19 {dimension_numbers = #tpu.dot_dimension_numbers<[1], [0], [0], [1], [0, 0, 1, 1], [], []>} : vector<128x768xbf16>, vector<768x256xbf16>, vector<128x256xf32> -> vector<128x256xf32>
      %cst_20 = arith.constant 0.000000e+00 : f32
      %34 = vector.broadcast %cst_20 : f32 to vector<128x256xf32>
      %35 = arith.maximumf %33, %34 : vector<128x256xf32>
      %36 = arith.truncf %35 : vector<128x256xf32> to vector<128x256xbf16>
      %c0_21 = arith.constant 0 : index
      %c0_22 = arith.constant 0 : index
      %37 = vector.load %arg9[%c0_21, %c0_22] : memref<256x256xbf16, #tpu.memory_space<vmem>>, vector<256x256xbf16>
      %cst_23 = arith.constant dense<0.000000e+00> : vector<128x256xf32>
      %38 = tpu.matmul %36, %37, %cst_23 {dimension_numbers = #tpu.dot_dimension_numbers<[1], [0], [0], [1], [0, 0, 1, 1], [], []>} : vector<128x256xbf16>, vector<256x256xbf16>, vector<128x256xf32> -> vector<128x256xf32>
      %39 = arith.mulf %38, %38 : vector<128x256xf32>
      %cst_24 = arith.constant dense<0.000000e+00> : vector<128xf32>
      %40 = vector.multi_reduction <add>, %39, %cst_24 [1] : vector<128x256xf32> to vector<128xf32>
      %41 = vector.shape_cast %40 : vector<128xf32> to vector<128x1xf32>
      %cst_25 = arith.constant 1.000000e-24 : f32
      %42 = vector.broadcast %cst_25 : f32 to vector<128x1xf32>
      %43 = arith.addf %41, %42 : vector<128x1xf32>
      %44 = math.rsqrt %43 : vector<128x1xf32>
      %cst_26 = arith.constant 1.000000e+01 : f32
      %45 = vector.broadcast %cst_26 : f32 to vector<128x1xf32>
      %46 = arith.mulf %44, %45 : vector<128x1xf32>
      %47 = vector.broadcast %46 : vector<128x1xf32> to vector<128x256xf32>
      %48 = arith.mulf %38, %47 : vector<128x256xf32>
      %49 = tpu.concatenate %30, %48 in 0 : vector<128x256xf32>, vector<128x256xf32> -> vector<256x256xf32>
      %50 = arith.truncf %49 : vector<256x256xf32> to vector<256x256xbf16>
      %c0_27 = arith.constant 0 : index
      %c0_28 = arith.constant 0 : index
      %51 = vector.load %arg5[%c0_27, %c0_28] : memref<128x1xf32, #tpu.memory_space<vmem>>, vector<128x1xf32>
      %c0_29 = arith.constant 0 : index
      %c0_30 = arith.constant 0 : index
      %52 = vector.load %arg16[%c0_29, %c0_30] : memref<1x1xf32, #tpu.memory_space<vmem>>, vector<1x1xf32>
      %cst_31 = arith.constant -1.000000e+30 : f32
      %53 = vector.broadcast %cst_31 : f32 to vector<128x1xf32>
      %cst_32 = arith.constant 0.000000e+00 : f32
      %54 = vector.broadcast %cst_32 : f32 to vector<128x1xf32>
      %c0_i32_33 = arith.constant 0 : i32
      %c128_i32 = arith.constant 128 : i32
      %55 = arith.muli %c0_i32_33, %c128_i32 : i32
      %56 = tpu.assume_multiple %55, 128 : i32
      %c0_34 = arith.constant 0 : index
      %57 = arith.index_cast %56 : i32 to index
      %58 = vector.load %arg10[%c0_34, %57] : memref<256x128xbf16, #tpu.memory_space<vmem>>, vector<256x128xbf16>
      %cst_35 = arith.constant dense<0.000000e+00> : vector<256x128xf32>
      %59 = tpu.matmul %50, %58, %cst_35 {dimension_numbers = #tpu.dot_dimension_numbers<[1], [0], [0], [1], [0, 0, 1, 1], [], []>} : vector<256x256xbf16>, vector<256x128xbf16>, vector<256x128xf32> -> vector<256x128xf32>
      %60 = vector.extract_strided_slice %59 {offsets = [0, 0], sizes = [128, 128], strides = [1, 1]} : vector<256x128xf32> to vector<128x128xf32>
      %61 = vector.extract_strided_slice %59 {offsets = [128, 0], sizes = [128, 128], strides = [1, 1]} : vector<256x128xf32> to vector<128x128xf32>
      %cst_36 = arith.constant dense<0xFF800000> : vector<128xf32>
      %62 = vector.multi_reduction <maximumf>, %61, %cst_36 [1] : vector<128x128xf32> to vector<128xf32>
      %63 = vector.shape_cast %62 : vector<128xf32> to vector<128x1xf32>
      %64 = arith.maximumf %53, %63 : vector<128x1xf32>
      %cst_37 = arith.constant dense<0xFF800000> : vector<128xf32>
      %65 = vector.multi_reduction <maximumf>, %60, %cst_37 [1] : vector<128x128xf32> to vector<128xf32>
      %66 = vector.shape_cast %65 : vector<128xf32> to vector<128x1xf32>
      %67 = arith.maximumf %53, %66 : vector<128x1xf32>
      %68 = vector.broadcast %64 : vector<128x1xf32> to vector<128x128xf32>
      %69 = arith.subf %61, %68 : vector<128x128xf32>
      %70 = math.exp %69 : vector<128x128xf32>
      %71 = vector.broadcast %67 : vector<128x1xf32> to vector<128x128xf32>
      %72 = arith.subf %60, %71 : vector<128x128xf32>
      %73 = math.exp %72 : vector<128x128xf32>
      %c0_38 = arith.constant 0 : index
      %74 = arith.index_cast %56 : i32 to index
      %75 = vector.load %arg12[%c0_38, %74] : memref<1x128xf32, #tpu.memory_space<vmem>>, vector<1x128xf32>
      %76 = vector.broadcast %75 : vector<1x128xf32> to vector<128x128xf32>
      %77 = arith.mulf %70, %76 : vector<128x128xf32>
      %78 = vector.broadcast %75 : vector<1x128xf32> to vector<128x128xf32>
      %79 = arith.mulf %73, %78 : vector<128x128xf32>
      %80 = arith.subf %53, %64 : vector<128x1xf32>
      %81 = math.exp %80 : vector<128x1xf32>
      %82 = arith.subf %53, %67 : vector<128x1xf32>
      %83 = math.exp %82 : vector<128x1xf32>
      %84 = arith.mulf %81, %54 : vector<128x1xf32>
      %cst_39 = arith.constant dense<0.000000e+00> : vector<128xf32>
      %85 = vector.multi_reduction <add>, %77, %cst_39 [1] : vector<128x128xf32> to vector<128xf32>
      %86 = vector.shape_cast %85 : vector<128xf32> to vector<128x1xf32>
      %87 = arith.addf %84, %86 : vector<128x1xf32>
      %88 = arith.mulf %83, %54 : vector<128x1xf32>
      %cst_40 = arith.constant dense<0.000000e+00> : vector<128xf32>
      %89 = vector.multi_reduction <add>, %79, %cst_40 [1] : vector<128x128xf32> to vector<128xf32>
      %90 = vector.shape_cast %89 : vector<128xf32> to vector<128x1xf32>
      %91 = arith.addf %88, %90 : vector<128x1xf32>
      %92 = arith.mulf %81, %54 : vector<128x1xf32>
      %93 = arith.subf %61, %60 : vector<128x128xf32>
      %94 = arith.mulf %77, %93 : vector<128x128xf32>
      %cst_41 = arith.constant dense<0.000000e+00> : vector<128xf32>
      %95 = vector.multi_reduction <add>, %94, %cst_41 [1] : vector<128x128xf32> to vector<128xf32>
      %96 = vector.shape_cast %95 : vector<128xf32> to vector<128x1xf32>
      %97 = arith.addf %92, %96 : vector<128x1xf32>
      %c1_i32_42 = arith.constant 1 : i32
      %98 = tpu.reciprocal %87 {approx = true} : vector<128x1xf32> -> vector<128x1xf32>
      %99 = arith.mulf %97, %98 : vector<128x1xf32>
      %100 = math.log %87 : vector<128x1xf32>
      %101 = arith.addf %64, %100 : vector<128x1xf32>
      %102 = arith.subf %99, %101 : vector<128x1xf32>
      %103 = math.log %91 : vector<128x1xf32>
      %104 = arith.addf %67, %103 : vector<128x1xf32>
      %105 = arith.addf %102, %104 : vector<128x1xf32>
      %106 = arith.mulf %105, %51 : vector<128x1xf32>
      %107 = vector.shape_cast %106 : vector<128x1xf32> to vector<1x128x1xf32>
      %cst_43 = arith.constant dense<0.000000e+00> : vector<1xf32>
      %108 = vector.multi_reduction <add>, %107, %cst_43 [1, 2] : vector<1x128x1xf32> to vector<1xf32>
      %109 = vector.shape_cast %108 : vector<1xf32> to vector<1x1x1xf32>
      %110 = vector.extract %109[0, 0, 0] : f32 from vector<1x1x1xf32>
      %111 = vector.broadcast %110 : f32 to vector<1x1xf32>
      %112 = arith.addf %52, %111 : vector<1x1xf32>
      %c0_44 = arith.constant 0 : index
      %c0_45 = arith.constant 0 : index
      %113 = vector.load %arg16[%c0_44, %c0_45] : memref<1x1xf32, #tpu.memory_space<vmem>>, vector<1x1xf32>
      tpu.vector_store %arg16[%c0_44, %c0_45], %112 {strides = array<i32>} : memref<1x1xf32, #tpu.memory_space<vmem>>, vector<1x1xf32>,
      %c0_46 = arith.constant 0 : index
      %c0_47 = arith.constant 0 : index
      %114 = vector.load %arg17[%c0_46, %c0_47] : memref<1x1xf32, #tpu.memory_space<vmem>>, vector<1x1xf32>
      %cst_48 = arith.constant -1.000000e+30 : f32
      %115 = vector.broadcast %cst_48 : f32 to vector<128x1xf32>
      %cst_49 = arith.constant 0.000000e+00 : f32
      %116 = vector.broadcast %cst_49 : f32 to vector<128x1xf32>
      %c0_i32_50 = arith.constant 0 : i32
      %c128_i32_51 = arith.constant 128 : i32
      %117 = arith.muli %c0_i32_50, %c128_i32_51 : i32
      %118 = tpu.assume_multiple %117, 128 : i32
      %c0_52 = arith.constant 0 : index
      %119 = arith.index_cast %118 : i32 to index
      %120 = vector.load %arg11[%c0_52, %119] : memref<256x128xbf16, #tpu.memory_space<vmem>>, vector<256x128xbf16>
      %cst_53 = arith.constant dense<0.000000e+00> : vector<256x128xf32>
      %121 = tpu.matmul %50, %120, %cst_53 {dimension_numbers = #tpu.dot_dimension_numbers<[1], [0], [0], [1], [0, 0, 1, 1], [], []>} : vector<256x256xbf16>, vector<256x128xbf16>, vector<256x128xf32> -> vector<256x128xf32>
      %122 = vector.extract_strided_slice %121 {offsets = [0, 0], sizes = [128, 128], strides = [1, 1]} : vector<256x128xf32> to vector<128x128xf32>
      %123 = vector.extract_strided_slice %121 {offsets = [128, 0], sizes = [128, 128], strides = [1, 1]} : vector<256x128xf32> to vector<128x128xf32>
      %cst_54 = arith.constant dense<0xFF800000> : vector<128xf32>
      %124 = vector.multi_reduction <maximumf>, %123, %cst_54 [1] : vector<128x128xf32> to vector<128xf32>
      %125 = vector.shape_cast %124 : vector<128xf32> to vector<128x1xf32>
      %126 = arith.maximumf %115, %125 : vector<128x1xf32>
      %cst_55 = arith.constant dense<0xFF800000> : vector<128xf32>
      %127 = vector.multi_reduction <maximumf>, %122, %cst_55 [1] : vector<128x128xf32> to vector<128xf32>
      %128 = vector.shape_cast %127 : vector<128xf32> to vector<128x1xf32>
      %129 = arith.maximumf %115, %128 : vector<128x1xf32>
      %130 = vector.broadcast %126 : vector<128x1xf32> to vector<128x128xf32>
      %131 = arith.subf %123, %130 : vector<128x128xf32>
      %132 = math.exp %131 : vector<128x128xf32>
      %133 = vector.broadcast %129 : vector<128x1xf32> to vector<128x128xf32>
      %134 = arith.subf %122, %133 : vector<128x128xf32>
      %135 = math.exp %134 : vector<128x128xf32>
      %c0_56 = arith.constant 0 : index
      %136 = arith.index_cast %118 : i32 to index
      %137 = vector.load %arg13[%c0_56, %136] : memref<1x128xf32, #tpu.memory_space<vmem>>, vector<1x128xf32>
      %138 = vector.broadcast %137 : vector<1x128xf32> to vector<128x128xf32>
      %139 = arith.mulf %132, %138 : vector<128x128xf32>
      %140 = vector.broadcast %137 : vector<1x128xf32> to vector<128x128xf32>
      %141 = arith.mulf %135, %140 : vector<128x128xf32>
      %142 = arith.subf %115, %126 : vector<128x1xf32>
      %143 = math.exp %142 : vector<128x1xf32>
      %144 = arith.subf %115, %129 : vector<128x1xf32>
      %145 = math.exp %144 : vector<128x1xf32>
      %146 = arith.mulf %143, %116 : vector<128x1xf32>
      %cst_57 = arith.constant dense<0.000000e+00> : vector<128xf32>
      %147 = vector.multi_reduction <add>, %139, %cst_57 [1] : vector<128x128xf32> to vector<128xf32>
      %148 = vector.shape_cast %147 : vector<128xf32> to vector<128x1xf32>
      %149 = arith.addf %146, %148 : vector<128x1xf32>
      %150 = arith.mulf %145, %116 : vector<128x1xf32>
      %cst_58 = arith.constant dense<0.000000e+00> : vector<128xf32>
      %151 = vector.multi_reduction <add>, %141, %cst_58 [1] : vector<128x128xf32> to vector<128xf32>
      %152 = vector.shape_cast %151 : vector<128xf32> to vector<128x1xf32>
      %153 = arith.addf %150, %152 : vector<128x1xf32>
      %154 = arith.mulf %143, %116 : vector<128x1xf32>
      %155 = arith.subf %123, %122 : vector<128x128xf32>
      %156 = arith.mulf %139, %155 : vector<128x128xf32>
      %cst_59 = arith.constant dense<0.000000e+00> : vector<128xf32>
      %157 = vector.multi_reduction <add>, %156, %cst_59 [1] : vector<128x128xf32> to vector<128xf32>
      %158 = vector.shape_cast %157 : vector<128xf32> to vector<128x1xf32>
      %159 = arith.addf %154, %158 : vector<128x1xf32>
      %c1_i32_60 = arith.constant 1 : i32
      %160 = tpu.reciprocal %149 {approx = true} : vector<128x1xf32> -> vector<128x1xf32>
      %161 = arith.mulf %159, %160 : vector<128x1xf32>
      %162 = math.log %149 : vector<128x1xf32>
      %163 = arith.addf %126, %162 : vector<128x1xf32>
      %164 = arith.subf %161, %163 : vector<128x1xf32>
      %165 = math.log %153 : vector<128x1xf32>
      %166 = arith.addf %129, %165 : vector<128x1xf32>
      %167 = arith.addf %164, %166 : vector<128x1xf32>
      %168 = arith.mulf %167, %51 : vector<128x1xf32>
      %169 = vector.shape_cast %168 : vector<128x1xf32> to vector<1x128x1xf32>
      %cst_61 = arith.constant dense<0.000000e+00> : vector<1xf32>
      %170 = vector.multi_reduction <add>, %169, %cst_61 [1, 2] : vector<1x128x1xf32> to vector<1xf32>
      %171 = vector.shape_cast %170 : vector<1xf32> to vector<1x1x1xf32>
      %172 = vector.extract %171[0, 0, 0] : f32 from vector<1x1x1xf32>
      %173 = vector.broadcast %172 : f32 to vector<1x1xf32>
      %174 = arith.addf %114, %173 : vector<1x1xf32>
      %c0_62 = arith.constant 0 : index
      %c0_63 = arith.constant 0 : index
      %175 = vector.load %arg17[%c0_62, %c0_63] : memref<1x1xf32, #tpu.memory_space<vmem>>, vector<1x1xf32>
      tpu.vector_store %arg17[%c0_62, %c0_63], %174 {strides = array<i32>} : memref<1x1xf32, #tpu.memory_space<vmem>>, vector<1x1xf32>,
    } else {
    }
    %c0_i32_3 = arith.constant 0 : i32
    %10 = arith.cmpi eq, %arg1, %c0_i32_3 : i32
    %11 = arith.extui %10 : i1 to i32
    %c0_i32_4 = arith.constant 0 : i32
    %12 = arith.cmpi ne, %11, %c0_i32_4 : i32
    scf.if %12 {
      %c0 = arith.constant 0 : index
      %c0_5 = arith.constant 0 : index
      %13 = vector.load %arg16[%c0, %c0_5] : memref<1x1xf32, #tpu.memory_space<vmem>>, vector<1x1xf32>
      %14 = vector.shape_cast %13 : vector<1x1xf32> to vector<1x1x1xf32>
      %c0_6 = arith.constant 0 : index
      %c0_7 = arith.constant 0 : index
      %c0_8 = arith.constant 0 : index
      %15 = vector.load %arg14[%c0_6, %c0_7, %c0_8] : memref<1x1x1xf32, #tpu.memory_space<vmem>>, vector<1x1x1xf32>
      tpu.vector_store %arg14[%c0_6, %c0_7, %c0_8], %14 {strides = array<i32>} : memref<1x1x1xf32, #tpu.memory_space<vmem>>, vector<1x1x1xf32>,
      %c0_9 = arith.constant 0 : index
      %c0_10 = arith.constant 0 : index
      %16 = vector.load %arg17[%c0_9, %c0_10] : memref<1x1xf32, #tpu.memory_space<vmem>>, vector<1x1xf32>
      %17 = vector.shape_cast %16 : vector<1x1xf32> to vector<1x1x1xf32>
      %c0_11 = arith.constant 0 : index
      %c0_12 = arith.constant 0 : index
      %c0_13 = arith.constant 0 : index
      %18 = vector.load %arg15[%c0_11, %c0_12, %c0_13] : memref<1x1x1xf32, #tpu.memory_space<vmem>>, vector<1x1x1xf32>
      tpu.vector_store %arg15[%c0_11, %c0_12, %c0_13], %17 {strides = array<i32>} : memref<1x1x1xf32, #tpu.memory_space<vmem>>, vector<1x1x1xf32>,
    } else {
    }
    return
  }
  func.func @transform_0(%arg0: i32, %arg1: i32, %arg2: memref<1xi32, #tpu.memory_space<smem>>) -> (i32, i32) {
    %c1_i32 = arith.constant 1 : i32
    %0 = arith.muli %arg0, %c1_i32 : i32
    %1 = arith.addi %0, %arg1 : i32
    %c0_i32 = arith.constant 0 : i32
    %c0_i32_0 = arith.constant 0 : i32
    return %1, %c0_i32 : i32, i32
  }
  func.func @transform_1(%arg0: i32, %arg1: i32, %arg2: memref<1xi32, #tpu.memory_space<smem>>) -> (i32, i32) {
    %c1_i32 = arith.constant 1 : i32
    %0 = arith.muli %arg0, %c1_i32 : i32
    %1 = arith.addi %0, %arg1 : i32
    %c0_i32 = arith.constant 0 : i32
    %c0_i32_0 = arith.constant 0 : i32
    return %1, %c0_i32 : i32, i32
  }
  func.func @transform_2(%arg0: i32, %arg1: i32, %arg2: memref<1xi32, #tpu.memory_space<smem>>) -> (i32, i32) {
    %c1_i32 = arith.constant 1 : i32
    %0 = arith.muli %arg0, %c1_i32 : i32
    %1 = arith.addi %0, %arg1 : i32
    %c0_i32 = arith.constant 0 : i32
    %c0_i32_0 = arith.constant 0 : i32
    return %1, %c0_i32 : i32, i32
  }
  func.func @transform_3(%arg0: i32, %arg1: i32, %arg2: memref<1xi32, #tpu.memory_space<smem>>) -> (i32, i32) {
    %c0_i32 = arith.constant 0 : i32
    %c0_i32_0 = arith.constant 0 : i32
    %c0_i32_1 = arith.constant 0 : i32
    return %c0_i32, %c0_i32_0 : i32, i32
  }
  func.func @transform_4(%arg0: i32, %arg1: i32, %arg2: memref<1xi32, #tpu.memory_space<smem>>) -> (i32, i32) {
    %c0_i32 = arith.constant 0 : i32
    %c0_i32_0 = arith.constant 0 : i32
    %c0_i32_1 = arith.constant 0 : i32
    return %c0_i32, %c0_i32_0 : i32, i32
  }
  func.func @transform_5(%arg0: i32, %arg1: i32, %arg2: memref<1xi32, #tpu.memory_space<smem>>) -> (i32, i32) {
    %c0_i32 = arith.constant 0 : i32
    %c0_i32_0 = arith.constant 0 : i32
    %c0_i32_1 = arith.constant 0 : i32
    return %c0_i32, %c0_i32_0 : i32, i32
  }
  func.func @transform_6(%arg0: i32, %arg1: i32, %arg2: memref<1xi32, #tpu.memory_space<smem>>) -> (i32, i32) {
    %c0_i32 = arith.constant 0 : i32
    %c0_i32_0 = arith.constant 0 : i32
    %c0_i32_1 = arith.constant 0 : i32
    return %c0_i32, %c0_i32_0 : i32, i32
  }
  func.func @transform_7(%arg0: i32, %arg1: i32, %arg2: memref<1xi32, #tpu.memory_space<smem>>) -> (i32, i32) {
    %c0_i32 = arith.constant 0 : i32
    %c0_i32_0 = arith.constant 0 : i32
    %c0_i32_1 = arith.constant 0 : i32
    return %c0_i32, %c0_i32_0 : i32, i32
  }
  func.func @transform_8(%arg0: i32, %arg1: i32, %arg2: memref<1xi32, #tpu.memory_space<smem>>) -> (i32, i32) {
    %c0_i32 = arith.constant 0 : i32
    %c0_i32_0 = arith.constant 0 : i32
    %c0_i32_1 = arith.constant 0 : i32
    return %c0_i32, %c0_i32_0 : i32, i32
  }
  func.func @transform_9(%arg0: i32, %arg1: i32, %arg2: memref<1xi32, #tpu.memory_space<smem>>) -> (i32, i32) {
    %c0_i32 = arith.constant 0 : i32
    %c0_i32_0 = arith.constant 0 : i32
    %c0_i32_1 = arith.constant 0 : i32
    return %c0_i32, %c0_i32_0 : i32, i32
  }
  func.func @transform_10(%arg0: i32, %arg1: i32, %arg2: memref<1xi32, #tpu.memory_space<smem>>) -> (i32, i32) {
    %c0_i32 = arith.constant 0 : i32
    %c0_i32_0 = arith.constant 0 : i32
    %c0_i32_1 = arith.constant 0 : i32
    return %c0_i32, %c0_i32_0 : i32, i32
  }
  func.func @transform_11(%arg0: i32, %arg1: i32, %arg2: memref<1xi32, #tpu.memory_space<smem>>) -> (i32, i32, i32) {
    %c0_i32 = arith.constant 0 : i32
    %c0_i32_0 = arith.constant 0 : i32
    %c0_i32_1 = arith.constant 0 : i32
    return %arg0, %c0_i32, %c0_i32_0 : i32, i32, i32
  }
  func.func @transform_12(%arg0: i32, %arg1: i32, %arg2: memref<1xi32, #tpu.memory_space<smem>>) -> (i32, i32, i32) {
    %c0_i32 = arith.constant 0 : i32
    %c0_i32_0 = arith.constant 0 : i32
    %c0_i32_1 = arith.constant 0 : i32
    return %arg0, %c0_i32, %c0_i32_0 : i32, i32, i32
  }
}

</mosaic_0001>

<bundles_post_ra>
// kernel: tpu_custom_call.1
= control target key start
LH: loop header
LB: loop body
LE: loop exit
PB: predicated region body
PF: predicated region fallthrough
CT: control target
= control target key end

     0   :  { %20 = vsyncpa [#allocation7], 0  ;;  %s8651_s0 = inlined_call_operand.<no memory space> [shape: s32[1], index: 0, kind: input, shape index: {}]   ;;  %s8652_s1 = inlined_call_operand.vmem [shape: bf16[128,256], index: 1, kind: input, shape index: {}]   ;;  %s8653_s2 = inlined_call_operand.hbm [shape: bf16[128,768], index: 2, kind: input, shape index: {}]   ;;  %s8654_s3 = inlined_call_operand.vmem [shape: f32[128,1], index: 3, kind: input, shape index: {}]   ;;  %s8655_s4 = inlined_call_operand.hbm [shape: bf16[256,256], index: 4, kind: input, shape index: {}]   ;;  %s8656_s5 = inlined_call_operand.hbm [shape: bf16[256,256], index: 5, kind: input, shape index: {}]   ;;  %s8657_s6 = inlined_call_operand.hbm [shape: bf16[768,256], index: 6, kind: input, shape index: {}]   ;;  %s8658_s7 = inlined_call_operand.hbm [shape: bf16[256,256], index: 7, kind: input, shape index: {}]   ;;  %s8659_s8 = inlined_call_operand.hbm [shape: bf16[256,128], index: 8, kind: input, shape index: {}]   ;;  %s8660_s9 = inlined_call_operand.hbm [shape: bf16[256,128], index: 9, kind: input, shape index: {}]   ;;  %s8661_s10 = inlined_call_operand.vmem [shape: f32[1,128], index: 10, kind: input, shape index: {}]   ;;  %s8662_s11 = inlined_call_operand.vmem [shape: f32[1,128], index: 11, kind: input, shape index: {}]   ;;  %s8663_s12 = inlined_call_operand.hbm [shape: f32[1,1,1], index: 12, kind: output, shape index: {0}]   ;;  %s8664_s13 = inlined_call_operand.hbm [shape: f32[1,1,1], index: 13, kind: output, shape index: {1}]  }
   0x1   :  { %21 = vsyncpa [#allocation10], 0 }
   0x2   :  { %22 = vsyncpa [#allocation13], 0 }
   0x3   :  { %23 = vsyncpa [#allocation16], 0 }
   0x4   :  { %24 = vsyncpa [#allocation8], 0 }
   0x5   :  { %25 = vsyncpa [#allocation20], 0  ;;  %s6766_s25 = smov [#allocation9]   ;;  %s6556_s29 = scalar_lea.hbm %s8655_s4, 4096 }
   0x6   :  { %s69_s26 = sshll.u32 %s6766_s25, 4  ;;  %p6557_p0 = scmp.ne.s32.totalorder %s8655_s4, %s6556_s29  ;;  %s70_s26 = int_to_ptr.vmem [resolvable:$true] %s69_s26 }
   0x7   :  { %p6560_p1 = scmp.lt.u32.totalorder %s6556_s29, %s8655_s4 }
   0x9   :  { %p6562_p2 = pnand %p6560_p1, %p6557_p0 }
   0xb   :  { %6565 = shalt.err (!%p6562_p2)
}
   0xc   :  { %s6566_s17 = scalar_lea.vmem %s70_s26, 4096  ;;  %p6571_p4 = scmp.lt.s32.totalorder %s70_s26, %s70_s26 }
   0xd   :  { %p6567_p3 = scmp.ne.s32.totalorder %s70_s26, %s6566_s17  ;;  %p6572_p5 = scmp.lt.s32.totalorder %s6566_s17, %s6566_s17 }
   0xf   :  { %p6573_p6 = por %p6572_p5, %p6571_p4 }
  0x11   :  { %p6574_p7 = pnand %p6573_p6, %p6567_p3 }
  0x13   :  { %6577 = shalt.err (!%p6574_p7)
}
  0x14   :  { %s6767_s18 = smov 128   ;;  %s6768_s19 = smov 8  }
  0x15   :  { %75 = dma.hbm_to_vmem [thread:$0]  %s8655_s4, 4096, %s70_s26, [#allocation10], %s6767_s18, %s6767_s18, %s6768_s19  }
  0x16   :  { %s6769_s22 = smov [#allocation12]   ;;  %s6770_s24 = smov [#allocation15]  }
  0x17   :  { %s93_s23 = sshll.u32 %s6769_s22, 4  ;;  %s117_s25 = sshll.u32 %s6770_s24, 4  ;;  %s94_s23 = int_to_ptr.vmem [resolvable:$true] %s93_s23  ;;  %s118_s25 = int_to_ptr.vmem [resolvable:$true] %s117_s25 }
  0x18   :  { %s6578_s29 = scalar_lea.hbm %s8657_s6, 12288 }
  0x19   :  { %p6579_p8 = scmp.ne.s32.totalorder %s8657_s6, %s6578_s29  ;;  %p6582_p9 = scmp.lt.u32.totalorder %s6578_s29, %s8657_s6 }
  0x1b   :  { %p6584_p10 = pnand %p6582_p9, %p6579_p8 }
  0x1d   :  { %6587 = shalt.err (!%p6584_p10)
}
  0x1e   :  { %s6588_s4 = scalar_lea.vmem %s94_s23, 12288  ;;  %p6593_p12 = scmp.lt.s32.totalorder %s94_s23, %s94_s23 }
  0x1f   :  { %p6589_p11 = scmp.ne.s32.totalorder %s94_s23, %s6588_s4  ;;  %p6594_p13 = scmp.lt.s32.totalorder %s6588_s4, %s6588_s4 }
  0x21   :  { %p6595_p0 = por %p6594_p13, %p6593_p12 }
  0x23   :  { %p6596_p1 = pnand %p6595_p0, %p6589_p11 }
  0x25   :  { %6599 = shalt.err (!%p6596_p1)
}
  0x26   :  { %99 = dma.hbm_to_vmem [thread:$0]  %s8657_s6, 12288, %s94_s23, [#allocation13], %s6767_s18, %s6767_s18, %s6768_s19  }
  0x27   :  { %s6600_s22 = scalar_lea.hbm %s8659_s8, 2048 }
  0x28   :  { %p6601_p2 = scmp.ne.s32.totalorder %s8659_s8, %s6600_s22  ;;  %p6604_p3 = scmp.lt.u32.totalorder %s6600_s22, %s8659_s8 }
  0x2a   :  { %p6606_p4 = pnand %p6604_p3, %p6601_p2 }
  0x2c   :  { %6609 = shalt.err (!%p6606_p4)
}
  0x2d   :  { %s6610_s30 = scalar_lea.vmem %s118_s25, 2048  ;;  %p6615_p6 = scmp.lt.s32.totalorder %s118_s25, %s118_s25 }
  0x2e   :  { %p6611_p5 = scmp.ne.s32.totalorder %s118_s25, %s6610_s30  ;;  %p6616_p7 = scmp.lt.s32.totalorder %s6610_s30, %s6610_s30 }
  0x30   :  { %p6617_p8 = por %p6616_p7, %p6615_p6 }
  0x32   :  { %p6618_p9 = pnand %p6617_p8, %p6611_p5 }
  0x34   :  { %6621 = shalt.err (!%p6618_p9)
}
  0x35   :  { %s6771_s6 = smov 64   ;;  %s6772_s23 = smov 4  }
  0x36   :  { %123 = dma.hbm_to_vmem [thread:$0]  %s8659_s8, 2048, %s118_s25, [#allocation16], %s6771_s6, %s6771_s6, %s6772_s23  }
  0x37   :  { %s6773_s16 = smov [#allocation6]   ;;  %s6622_s20 = scalar_lea.hbm %s8653_s2, 6144 }
  0x38   :  { %s47_s4 = sshll.u32 %s6773_s16, 4  ;;  %p6623_p10 = scmp.ne.s32.totalorder %s8653_s2, %s6622_s20  ;;  %s48_s4 = int_to_ptr.vmem [resolvable:$true] %s47_s4 }
  0x39   :  { %p6626_p11 = scmp.lt.u32.totalorder %s6622_s20, %s8653_s2 }
  0x3b   :  { %p6628_p12 = pnand %p6626_p11, %p6623_p10 }
  0x3d   :  { %6631 = shalt.err (!%p6628_p12)
}
  0x3e   :  { %s6632_s28 = scalar_lea.vmem %s48_s4, 6144  ;;  %p6637_p0 = scmp.lt.s32.totalorder %s48_s4, %s48_s4 }
  0x3f   :  { %p6633_p13 = scmp.ne.s32.totalorder %s48_s4, %s6632_s28  ;;  %p6638_p1 = scmp.lt.s32.totalorder %s6632_s28, %s6632_s28 }
  0x41   :  { %p6639_p2 = por %p6638_p1, %p6637_p0 }
  0x43   :  { %p6640_p3 = pnand %p6639_p2, %p6633_p13 }
  0x45   :  { %6643 = shalt.err (!%p6640_p3)
}
  0x46   :  { %s6774_s8 = smov 384   ;;  %s6775_s25 = smov 24  }
  0x47   :  { %53 = dma.hbm_to_vmem [thread:$0]  %s8653_s2, 6144, %s48_s4, [#allocation7], %s6774_s8, %s6774_s8, %s6775_s25  }
  0x48   :  { %s6776_s14 = smov [#allocation11]   ;;  %s6777_s16 = smov [#allocation14]  }
  0x49   :  { %s81_s15 = sshll.u32 %s6776_s14, 4  ;;  %s105_s26 = sshll.u32 %s6777_s16, 4  ;;  %s82_s15 = int_to_ptr.vmem [resolvable:$true] %s81_s15  ;;  %s6909_s26 = int_to_ptr.vmem [resolvable:$true] %s105_s26 }
  0x4a   :  { %s6644_s21 = scalar_lea.hbm %s8656_s5, 4096 }
  0x4b   :  { %p6645_p4 = scmp.ne.s32.totalorder %s8656_s5, %s6644_s21  ;;  %p6648_p5 = scmp.lt.u32.totalorder %s6644_s21, %s8656_s5 }
  0x4d   :  { %p6650_p6 = pnand %p6648_p5, %p6645_p4 }
  0x4f   :  { %6653 = shalt.err (!%p6650_p6)
}
  0x50   :  { %s6654_s2 = scalar_lea.vmem %s82_s15, 4096  ;;  %p6659_p8 = scmp.lt.s32.totalorder %s82_s15, %s82_s15 }
  0x51   :  { %p6655_p7 = scmp.ne.s32.totalorder %s82_s15, %s6654_s2  ;;  %p6660_p9 = scmp.lt.s32.totalorder %s6654_s2, %s6654_s2 }
  0x53   :  { %p6661_p10 = por %p6660_p9, %p6659_p8 }
  0x55   :  { %p6662_p11 = pnand %p6661_p10, %p6655_p7 }
  0x57   :  { %6665 = shalt.err (!%p6662_p11)
}
  0x58   :  { %87 = dma.hbm_to_vmem [thread:$0]  %s8656_s5, 4096, %s82_s15, [#allocation10], %s6767_s18, %s6767_s18, %s6768_s19  }
  0x59   :  { %s6666_s30 = scalar_lea.hbm %s8658_s7, 4096 }
  0x5a   :  { %p6667_p12 = scmp.ne.s32.totalorder %s8658_s7, %s6666_s30  ;;  %p6670_p13 = scmp.lt.u32.totalorder %s6666_s30, %s8658_s7 }
  0x5c   :  { %p6672_p0 = pnand %p6670_p13, %p6667_p12 }
  0x5e   :  { %6675 = shalt.err (!%p6672_p0)
}
  0x5f   :  { %s6676_s21 = scalar_lea.vmem %s6909_s26, 4096  ;;  %p6681_p2 = scmp.lt.s32.totalorder %s6909_s26, %s6909_s26 }
  0x60   :  { %p6677_p1 = scmp.ne.s32.totalorder %s6909_s26, %s6676_s21  ;;  %p6682_p3 = scmp.lt.s32.totalorder %s6676_s21, %s6676_s21 }
  0x62   :  { %p6683_p4 = por %p6682_p3, %p6681_p2 }
  0x64   :  { %p6684_p5 = pnand %p6683_p4, %p6677_p1 }
  0x66   :  { %6687 = shalt.err (!%p6684_p5)
}
  0x67   :  { %111 = dma.hbm_to_vmem [thread:$0]  %s8658_s7, 4096, %s6909_s26, [#allocation13], %s6767_s18, %s6767_s18, %s6768_s19  }
  0x68   :  { %s6778_s22 = smov [#allocation17]   ;;  %s6688_s2 = scalar_lea.hbm %s8660_s9, 2048 }
  0x69   :  { %s129_s24 = sshll.u32 %s6778_s22, 4  ;;  %p6689_p6 = scmp.ne.s32.totalorder %s8660_s9, %s6688_s2  ;;  %s130_s24 = int_to_ptr.vmem [resolvable:$true] %s129_s24 }
  0x6a   :  { %p6692_p7 = scmp.lt.u32.totalorder %s6688_s2, %s8660_s9 }
  0x6c   :  { %p6694_p8 = pnand %p6692_p7, %p6689_p6 }
  0x6e   :  { %6697 = shalt.err (!%p6694_p8)
}
  0x6f   :  { %s6698_s30 = scalar_lea.vmem %s130_s24, 2048  ;;  %p6703_p10 = scmp.lt.s32.totalorder %s130_s24, %s130_s24 }
  0x70   :  { %p6699_p9 = scmp.ne.s32.totalorder %s130_s24, %s6698_s30  ;;  %p6704_p11 = scmp.lt.s32.totalorder %s6698_s30, %s6698_s30 }
  0x72   :  { %p6705_p12 = por %p6704_p11, %p6703_p10 }
  0x74   :  { %p6706_p13 = pnand %p6705_p12, %p6699_p9 }
  0x76   :  { %6709 = shalt.err (!%p6706_p13)
}
  0x77   :  { %135 = dma.hbm_to_vmem [thread:$0]  %s8660_s9, 2048, %s130_s24, [#allocation16], %s6771_s6, %s6771_s6, %s6772_s23  }
  0x78   :  { %6754 = dma.done.wait [#allocation7], 6144  }
  0x79   :  { %6755 = vsyncadd [#allocation7], 4294961152 }
  0x7a   :  { %6756 = dma.done.wait [#allocation10], 8192  }
  0x7b   :  { %6757 = vsyncadd [#allocation10], 4294959104 }
  0x7c   :  { %6758 = dma.done.wait [#allocation13], 16384  }
  0x7d   :  { %6759 = vsyncadd [#allocation13], 4294950912 }
  0x7e   :  { %6760 = dma.done.wait [#allocation16], 4096  }
  0x7f   :  { %6761 = vsyncadd [#allocation16], 4294963200  ;;  %vm198_vm0 = vcmask 0   ;;  %v6779_v0 = vmov 0.0   ;;  %p5027_p0 = scmp.le.s32.totalorder %s8651_s0, 0 }
  0x80   :  { %199 = vst.msk [vmem:[#allocation2] sm:$0x1] %vm198_vm0, %v6779_v0  ;;  %200 = vst.msk [vmem:[#allocation3] sm:$0x1] %vm198_vm0, %v6779_v0 }
  0x81   :  { %206 = sbr.rel (%p5027_p0) target bundleno = 1847 (0x737), region = 81 }
  0x88   :  { %v5626_v1 = vld [vmem:[#allocation9 + $0x4] ss:$8 sps:$4 sm:$0xff]   ;;  %v5630_v3 = vld [vmem:[#allocation9] ss:$8 sps:$4 sm:$0xff]   ;;  %v5632_v5 = vld [vmem:[#allocation9 + $0x14] ss:$8 sps:$4 sm:$0xff]  }
  0x89   :  { %v5628_v2 = vld [vmem:[#allocation12 + $0x4] ss:$8 sps:$4 sm:$0xff]   ;;  %495 = vmatprep.subr.bf16.mxu1 %v5626_v1  ;;  %v5631_v4 = vld [vmem:[#allocation12] ss:$8 sps:$4 sm:$0xff]   ;;  %v5634_v6 = vld [vmem:[#allocation12 + $0x14] ss:$8 sps:$4 sm:$0xff]  }
  0x8a   :  { %1985 = vmatprep.subr.bf16.mxu0 %v5628_v2  ;;  %496 = vmatpush1.bf16.msra.mxu1 %v5630_v3  ;;  %v5636_v7 = vld [vmem:[#allocation9 + $0x10] ss:$8 sps:$4 sm:$0xff]   ;;  %v5638_v9 = vld [vmem:[#allocation9 + $0x24] ss:$8 sps:$4 sm:$0xff]   ;;  %v5642_v11 = vld [vmem:[#allocation9 + $0x20] ss:$8 sps:$4 sm:$0xff]  }
  0x8b   :  { %1986 = vmatpush1.bf16.msra.mxu0 %v5631_v4  ;;  %497 = vmatprep.subr.bf16.mxu1 %v5632_v5  ;;  %v5637_v8 = vld [vmem:[#allocation12 + $0x10] ss:$8 sps:$4 sm:$0xff]   ;;  %v5640_v10 = vld [vmem:[#allocation12 + $0x24] ss:$8 sps:$4 sm:$0xff]   ;;  %v5643_v12 = vld [vmem:[#allocation12 + $0x20] ss:$8 sps:$4 sm:$0xff]  }
  0x8c   :  { %1987 = vmatprep.subr.bf16.mxu0 %v5634_v6  ;;  %v5644_v13 = vld [vmem:[#allocation9 + $0x34] ss:$8 sps:$4 sm:$0xff]   ;;  %v5648_v15 = vld [vmem:[#allocation9 + $0x30] ss:$8 sps:$4 sm:$0xff]   ;;  %v5650_v17 = vld [vmem:[#allocation9 + $0x44] ss:$8 sps:$4 sm:$0xff]  }
  0x8d   :  { %v5646_v14 = vld [vmem:[#allocation12 + $0x34] ss:$8 sps:$4 sm:$0xff]   ;;  %v5649_v16 = vld [vmem:[#allocation12 + $0x30] ss:$8 sps:$4 sm:$0xff]   ;;  %v5652_v18 = vld [vmem:[#allocation12 + $0x44] ss:$8 sps:$4 sm:$0xff]  }
  0x8e   :  { %498 = vmatpush1.bf16.msra.mxu1 %v5636_v7  ;;  %v5654_v19 = vld [vmem:[#allocation9 + $0x40] ss:$8 sps:$4 sm:$0xff]   ;;  %v5656_v21 = vld [vmem:[#allocation9 + $0x54] ss:$8 sps:$4 sm:$0xff]   ;;  %v5660_v23 = vld [vmem:[#allocation9 + $0x50] ss:$8 sps:$4 sm:$0xff]  }
  0x8f   :  { %1988 = vmatpush1.bf16.msra.mxu0 %v5637_v8  ;;  %499 = vmatprep.subr.bf16.mxu1 %v5638_v9  ;;  %v5655_v20 = vld [vmem:[#allocation12 + $0x40] ss:$8 sps:$4 sm:$0xff]   ;;  %v5658_v22 = vld [vmem:[#allocation12 + $0x54] ss:$8 sps:$4 sm:$0xff]   ;;  %v5661_v24 = vld [vmem:[#allocation12 + $0x50] ss:$8 sps:$4 sm:$0xff]  }
  0x90   :  { %1989 = vmatprep.subr.bf16.mxu0 %v5640_v10  ;;  %v5662_v25 = vld [vmem:[#allocation9 + $0x64] ss:$8 sps:$4 sm:$0xff]   ;;  %v5666_v27 = vld [vmem:[#allocation9 + $0x60] ss:$8 sps:$4 sm:$0xff]   ;;  %v5668_v29 = vld [vmem:[#allocation9 + $0x74] ss:$8 sps:$4 sm:$0xff]  }
  0x91   :  { %v5664_v26 = vld [vmem:[#allocation12 + $0x64] ss:$8 sps:$4 sm:$0xff]   ;;  %v5667_v28 = vld [vmem:[#allocation12 + $0x60] ss:$8 sps:$4 sm:$0xff]   ;;  %v5670_v30 = vld [vmem:[#allocation12 + $0x74] ss:$8 sps:$4 sm:$0xff]  }
  0x92   :  { %500 = vmatpush1.bf16.msra.mxu1 %v5642_v11  ;;  %v5672_v31 = vld [vmem:[#allocation9 + $0x70] ss:$8 sps:$4 sm:$0xff]   ;;  %v5674_v33 = vld [vmem:[#allocation9 + $0x84] ss:$8 sps:$4 sm:$0xff]   ;;  %v5678_v35 = vld [vmem:[#allocation9 + $0x80] ss:$8 sps:$4 sm:$0xff]  }
  0x93   :  { %1990 = vmatpush1.bf16.msra.mxu0 %v5643_v12  ;;  %501 = vmatprep.subr.bf16.mxu1 %v5644_v13  ;;  %v5673_v32 = vld [vmem:[#allocation12 + $0x70] ss:$8 sps:$4 sm:$0xff]   ;;  %v5676_v34 = vld [vmem:[#allocation12 + $0x84] ss:$8 sps:$4 sm:$0xff]   ;;  %v5679_v36 = vld [vmem:[#allocation12 + $0x80] ss:$8 sps:$4 sm:$0xff]  }
  0x94   :  { %1991 = vmatprep.subr.bf16.mxu0 %v5646_v14  ;;  %v5680_v37 = vld [vmem:[#allocation9 + $0x94] ss:$8 sps:$4 sm:$0xff]   ;;  %v5684_v39 = vld [vmem:[#allocation9 + $0x90] ss:$8 sps:$4 sm:$0xff]   ;;  %v5686_v41 = vld [vmem:[#allocation9 + $0xa4] ss:$8 sps:$4 sm:$0xff]  }
  0x95   :  { %v5682_v38 = vld [vmem:[#allocation12 + $0x94] ss:$8 sps:$4 sm:$0xff]   ;;  %v5685_v40 = vld [vmem:[#allocation12 + $0x90] ss:$8 sps:$4 sm:$0xff]   ;;  %v5688_v42 = vld [vmem:[#allocation12 + $0xa4] ss:$8 sps:$4 sm:$0xff]  }
  0x96   :  { %502 = vmatpush1.bf16.msra.mxu1 %v5648_v15  ;;  %v5690_v43 = vld [vmem:[#allocation9 + $0xa0] ss:$8 sps:$4 sm:$0xff]   ;;  %v5692_v45 = vld [vmem:[#allocation9 + $0xb4] ss:$8 sps:$4 sm:$0xff]   ;;  %v5696_v47 = vld [vmem:[#allocation9 + $0xb0] ss:$8 sps:$4 sm:$0xff]  }
  0x97   :  { %1992 = vmatpush1.bf16.msra.mxu0 %v5649_v16  ;;  %503 = vmatprep.subr.bf16.mxu1 %v5650_v17  ;;  %v5691_v44 = vld [vmem:[#allocation12 + $0xa0] ss:$8 sps:$4 sm:$0xff]   ;;  %v5694_v46 = vld [vmem:[#allocation12 + $0xb4] ss:$8 sps:$4 sm:$0xff]   ;;  %v5697_v48 = vld [vmem:[#allocation12 + $0xb0] ss:$8 sps:$4 sm:$0xff]  }
  0x98   :  { %1993 = vmatprep.subr.bf16.mxu0 %v5652_v18  ;;  %v5698_v49 = vld [vmem:[#allocation9 + $0xc4] ss:$8 sps:$4 sm:$0xff]   ;;  %v5702_v53 = vld [vmem:[#allocation9 + $0xc0] ss:$8 sps:$4 sm:$0xff]   ;;  %v5704_v55 = vld [vmem:[#allocation9 + $0xd4] ss:$8 sps:$4 sm:$0xff]  }
  0x99   :  { %v5724_v50 = vld [vmem:[%s8652_s1 + $0x4] ss:$8 sps:$4 sm:$0xff]   ;;  %v5706_v56 = vld [vmem:[#allocation12 + $0xd4] ss:$8 sps:$4 sm:$0xff]   ;;  %v5708_v57 = vld [vmem:[#allocation9 + $0xd0] ss:$8 sps:$4 sm:$0xff]  }
  0x9a   :  { %504 = vmatpush1.bf16.msra.mxu1 %v5654_v19  ;;  %v5700_v51 = vld [vmem:[#allocation12 + $0xc4] ss:$8 sps:$4 sm:$0xff]   ;;  %527 = vmatprep.mubr.bf16.mxu1 %v5724_v50  ;;  %v5703_v54 = vld [vmem:[#allocation12 + $0xc0] ss:$8 sps:$4 sm:$0xff]   ;;  %v5709_v58 = vld [vmem:[#allocation12 + $0xd0] ss:$8 sps:$4 sm:$0xff]  }
  0x9b   :  { %1994 = vmatpush1.bf16.msra.mxu0 %v5655_v20  ;;  %505 = vmatprep.subr.bf16.mxu1 %v5656_v21  ;;  %v5727_v52 = vld [vmem:[#allocation6 + $0x4] ss:$24 sps:$4 sm:$0xff]   ;;  %v5714_v61 = vld [vmem:[#allocation9 + $0xe0] ss:$8 sps:$4 sm:$0xff]   ;;  %v5720_v1 = vld [vmem:[#allocation9 + $0xf0] ss:$8 sps:$4 sm:$0xff]  }
  0x9c   :  { %1995 = vmatprep.subr.bf16.mxu0 %v5658_v22  ;;  %2017 = vmatprep.mubr.bf16.mxu0 %v5727_v52  ;;  %v5710_v59 = vld [vmem:[#allocation9 + $0xe4] ss:$8 sps:$4 sm:$0xff]   ;;  %v5715_v62 = vld [vmem:[#allocation12 + $0xe0] ss:$8 sps:$4 sm:$0xff]   ;;  %v5716_v63 = vld [vmem:[#allocation9 + $0xf4] ss:$8 sps:$4 sm:$0xff]  }
  0x9d   :  { %v5712_v60 = vld [vmem:[#allocation12 + $0xe4] ss:$8 sps:$4 sm:$0xff]   ;;  %v5718_v0 = vld [vmem:[#allocation12 + $0xf4] ss:$8 sps:$4 sm:$0xff]   ;;  %v5721_v2 = vld [vmem:[#allocation12 + $0xf0] ss:$8 sps:$4 sm:$0xff]  }
  0x9e   :  { %506 = vmatpush1.bf16.msra.mxu1 %v5660_v23  ;;  %v5730_v3 = vld [vmem:[#allocation12 + $0x104] ss:$8 sps:$4 sm:$0xff]   ;;  %v5725_v5 = vld [vmem:[#allocation6] ss:$24 sps:$4 sm:$0xff]   ;;  %v5733_v7 = vld [vmem:[#allocation12 + $0x114] ss:$8 sps:$4 sm:$0xff]  }
  0x9f   :  { %1996 = vmatpush1.bf16.msra.mxu0 %v5661_v24  ;;  %507 = vmatprep.subr.bf16.mxu1 %v5662_v25  ;;  %v5722_v4 = vld [vmem:[%s8652_s1] ss:$8 sps:$4 sm:$0xff]   ;;  %v5734_v8 = vld [vmem:[%s8652_s1 + $0x14] ss:$8 sps:$4 sm:$0xff]   ;;  %v5738_v12 = vld [vmem:[%s8652_s1 + $0x10] ss:$8 sps:$4 sm:$0xff]  }
  0xa0   :  { %1997 = vmatprep.subr.bf16.mxu0 %v5664_v26  ;;  %v5728_v6 = vld [vmem:[#allocation12 + $0x100] ss:$8 sps:$4 sm:$0xff]   ;;  %v5736_v9 = vld [vmem:[#allocation6 + $0x34] ss:$24 sps:$4 sm:$0xff]   ;;  %v5731_v10 = vld [vmem:[#allocation12 + $0x110] ss:$8 sps:$4 sm:$0xff]  }
  0xa1   :  { %v5742_v11 = vld [vmem:[#allocation12 + $0x124] ss:$8 sps:$4 sm:$0xff]   ;;  %v5739_v13 = vld [vmem:[#allocation6 + $0x30] ss:$24 sps:$4 sm:$0xff]   ;;  %v5745_v15 = vld [vmem:[#allocation12 + $0x134] ss:$8 sps:$4 sm:$0xff]  }
  0xa2   :  { %508 = vmatpush1.bf16.msra.mxu1 %v5666_v27  ;;  %v5740_v14 = vld [vmem:[#allocation12 + $0x120] ss:$8 sps:$4 sm:$0xff]   ;;  %v5748_v17 = vld [vmem:[#allocation6 + $0x64] ss:$24 sps:$4 sm:$0xff]   ;;  %v5743_v18 = vld [vmem:[#allocation12 + $0x130] ss:$8 sps:$4 sm:$0xff]  }
  0xa3   :  { %1998 = vmatpush1.bf16.msra.mxu0 %v5667_v28  ;;  %509 = vmatprep.subr.bf16.mxu1 %v5668_v29  ;;  %v5746_v16 = vld [vmem:[%s8652_s1 + $0x24] ss:$8 sps:$4 sm:$0xff]   ;;  %v5750_v20 = vld [vmem:[%s8652_s1 + $0x20] ss:$8 sps:$4 sm:$0xff]   ;;  %v5758_v24 = vld [vmem:[%s8652_s1 + $0x34] ss:$8 sps:$4 sm:$0xff]  }
  0xa4   :  { %1999 = vmatprep.subr.bf16.mxu0 %v5670_v30  ;;  %v5754_v19 = vld [vmem:[#allocation12 + $0x144] ss:$8 sps:$4 sm:$0xff]   ;;  %v5751_v21 = vld [vmem:[#allocation6 + $0x60] ss:$24 sps:$4 sm:$0xff]   ;;  %v5757_v23 = vld [vmem:[#allocation12 + $0x154] ss:$8 sps:$4 sm:$0xff]  }
  0xa5   :  { %v5752_v22 = vld [vmem:[#allocation12 + $0x140] ss:$8 sps:$4 sm:$0xff]   ;;  %v5760_v25 = vld [vmem:[#allocation6 + $0x94] ss:$24 sps:$4 sm:$0xff]   ;;  %v5755_v26 = vld [vmem:[#allocation12 + $0x150] ss:$8 sps:$4 sm:$0xff]  }
  0xa6   :  { %510 = vmatpush1.bf16.msra.mxu1 %v5672_v31  ;;  %v5766_v27 = vld [vmem:[#allocation12 + $0x164] ss:$8 sps:$4 sm:$0xff]   ;;  %v5763_v29 = vld [vmem:[#allocation6 + $0x90] ss:$24 sps:$4 sm:$0xff]   ;;  %v5769_v31 = vld [vmem:[#allocation12 + $0x174] ss:$8 sps:$4 sm:$0xff]  }
  0xa7   :  { %2000 = vmatpush1.bf16.msra.mxu0 %v5673_v32  ;;  %511 = vmatprep.subr.bf16.mxu1 %v5674_v33  ;;  %v5762_v28 = vld [vmem:[%s8652_s1 + $0x30] ss:$8 sps:$4 sm:$0xff]   ;;  %v5764_v30 = vld [vmem:[#allocation12 + $0x160] ss:$8 sps:$4 sm:$0xff]   ;;  %v5772_v33 = vld [vmem:[#allocation6 + $0xc4] ss:$24 sps:$4 sm:$0xff]  }
  0xa8   :  { %2001 = vmatprep.subr.bf16.mxu0 %v5676_v34  ;;  %v5770_v32 = vld [vmem:[%s8652_s1 + $0x44] ss:$8 sps:$4 sm:$0xff]   ;;  %v5767_v34 = vld [vmem:[#allocation12 + $0x170] ss:$8 sps:$4 sm:$0xff]   ;;  %v5798_v52 = vld [vmem:[%s8652_s1 + $0x60] ss:$8 sps:$4 sm:$0xff]  }
  0xa9   :  { %v5791_v50 = vld [vmem:[#allocation12 + $0x1b0] ss:$8 sps:$4 sm:$0xff]   ;;  %vm3886_vm1 = vcmask 7168  }
  0xaa   :  { %512 = vmatpush1.bf16.msra.mxu1 %v5678_v35  ;;  %v5778_v35 = vld [vmem:[#allocation12 + $0x184] ss:$8 sps:$4 sm:$0xff]  }
  0xab   :  { %2002 = vmatpush1.bf16.msra.mxu0 %v5679_v36  ;;  %513 = vmatprep.subr.bf16.mxu1 %v5680_v37  ;;  %v5774_v36 = vld [vmem:[%s8652_s1 + $0x40] ss:$8 sps:$4 sm:$0xff]  }
  0xac   :  { %2003 = vmatprep.subr.bf16.mxu0 %v5682_v38  ;;  %v5775_v37 = vld [vmem:[#allocation6 + $0xc0] ss:$24 sps:$4 sm:$0xff]  }
  0xad   :  { %v5776_v38 = vld [vmem:[#allocation12 + $0x180] ss:$8 sps:$4 sm:$0xff]  }
  0xae   :  { %514 = vmatpush1.bf16.msra.mxu1 %v5684_v39  ;;  %v5781_v39 = vld [vmem:[#allocation12 + $0x194] ss:$8 sps:$4 sm:$0xff]  }
  0xaf   :  { %2004 = vmatpush1.bf16.msra.mxu0 %v5685_v40  ;;  %515 = vmatprep.subr.bf16.mxu1 %v5686_v41  ;;  %v5782_v40 = vld [vmem:[%s8652_s1 + $0x54] ss:$8 sps:$4 sm:$0xff]  }
  0xb0   :  { %2005 = vmatprep.subr.bf16.mxu0 %v5688_v42  ;;  %v5784_v41 = vld [vmem:[#allocation6 + $0xf4] ss:$24 sps:$4 sm:$0xff]   ;;  %v5779_v42 = vld [vmem:[#allocation12 + $0x190] ss:$8 sps:$4 sm:$0xff]  }
  0xb2   :  { %516 = vmatpush1.bf16.msra.mxu1 %v5690_v43  ;;  %v5790_v43 = vld [vmem:[#allocation12 + $0x1a4] ss:$8 sps:$4 sm:$0xff]  }
  0xb3   :  { %2006 = vmatpush1.bf16.msra.mxu0 %v5691_v44  ;;  %517 = vmatprep.subr.bf16.mxu1 %v5692_v45  ;;  %v5786_v44 = vld [vmem:[%s8652_s1 + $0x50] ss:$8 sps:$4 sm:$0xff]  }
  0xb4   :  { %2007 = vmatprep.subr.bf16.mxu0 %v5694_v46  ;;  %v5787_v45 = vld [vmem:[#allocation6 + $0xf0] ss:$24 sps:$4 sm:$0xff]  }
  0xb5   :  { %v5788_v46 = vld [vmem:[#allocation12 + $0x1a0] ss:$8 sps:$4 sm:$0xff]  }
  0xb6   :  { %518 = vmatpush1.bf16.msra.mxu1 %v5696_v47  ;;  %v5793_v47 = vld [vmem:[#allocation12 + $0x1b4] ss:$8 sps:$4 sm:$0xff]  }
  0xb7   :  { %2008 = vmatpush1.bf16.msra.mxu0 %v5697_v48  ;;  %519 = vmatprep.subr.bf16.mxu1 %v5698_v49  ;;  %v5794_v48 = vld [vmem:[%s8652_s1 + $0x64] ss:$8 sps:$4 sm:$0xff]  }
  0xb8   :  { %2009 = vmatprep.subr.bf16.mxu0 %v5700_v51  ;;  %v5796_v49 = vld [vmem:[#allocation6 + $0x124] ss:$24 sps:$4 sm:$0xff]  }
  0xb9   :  { %v5802_v51 = vld [vmem:[#allocation12 + $0x1c4] ss:$8 sps:$4 sm:$0xff]  }
  0xba   :  { %520 = vmatpush1.bf16.msra.mxu1 %v5702_v53  ;;  %v5799_v53 = vld [vmem:[#allocation6 + $0x120] ss:$24 sps:$4 sm:$0xff]  }
  0xbb   :  { %2010 = vmatpush1.bf16.msra.mxu0 %v5703_v54  ;;  %521 = vmatprep.subr.bf16.mxu1 %v5704_v55  ;;  %v5800_v54 = vld [vmem:[#allocation12 + $0x1c0] ss:$8 sps:$4 sm:$0xff]   ;;  %v5805_v55 = vld [vmem:[#allocation12 + $0x1d4] ss:$8 sps:$4 sm:$0xff]  }
  0xbc   :  { %2011 = vmatprep.subr.bf16.mxu0 %v5706_v56  ;;  %v5806_v56 = vld [vmem:[%s8652_s1 + $0x74] ss:$8 sps:$4 sm:$0xff]  }
  0xbe   :  { %522 = vmatpush1.bf16.msra.mxu1 %v5708_v57  ;;  %v5808_v57 = vld [vmem:[#allocation6 + $0x154] ss:$24 sps:$4 sm:$0xff]  }
  0xbf   :  { %2012 = vmatpush1.bf16.msra.mxu0 %v5709_v58  ;;  %523 = vmatprep.subr.bf16.mxu1 %v5710_v59  ;;  %v5803_v58 = vld [vmem:[#allocation12 + $0x1d0] ss:$8 sps:$4 sm:$0xff]   ;;  %v5814_v59 = vld [vmem:[#allocation12 + $0x1e4] ss:$8 sps:$4 sm:$0xff]  }
  0xc0   :  { %2013 = vmatprep.subr.bf16.mxu0 %v5712_v60  ;;  %v5810_v60 = vld [vmem:[%s8652_s1 + $0x70] ss:$8 sps:$4 sm:$0xff]  }
  0xc2   :  { %524 = vmatpush1.bf16.msra.mxu1 %v5714_v61  ;;  %v5811_v61 = vld [vmem:[#allocation6 + $0x150] ss:$24 sps:$4 sm:$0xff]  }
  0xc3   :  { %2014 = vmatpush1.bf16.msra.mxu0 %v5715_v62  ;;  %525 = vmatprep.subr.bf16.mxu1 %v5716_v63  ;;  %v5812_v62 = vld [vmem:[#allocation12 + $0x1e0] ss:$8 sps:$4 sm:$0xff]   ;;  %v5820_v63 = vld [vmem:[#allocation6 + $0xc] ss:$24 sps:$4 sm:$0xff]  }
  0xc4   :  { %2015 = vmatprep.subr.bf16.mxu0 %v5718_v0  ;;  %v5817_v0 = vld [vmem:[#allocation12 + $0x1f4] ss:$8 sps:$4 sm:$0xff]  }
  0xc6   :  { %526 = vmatpush1.bf16.msra.mxu1 %v5720_v1  ;;  %v5902_v1 = vld [vmem:[#allocation11] ss:$8 sps:$4 sm:$0xff]  }
  0xc7   :  { %2016 = vmatpush1.bf16.msra.mxu0 %v5721_v2  ;;  %v5904_v2 = vld [vmem:[#allocation11 + $0x4] ss:$8 sps:$4 sm:$0xff]  }
  0xc8   :  { %2098 = vmatprep.subr.bf16.mxu0 %v5730_v3  ;;  %v5815_v3 = vld [vmem:[#allocation12 + $0x1f0] ss:$8 sps:$4 sm:$0xff]   ;;  %848 = vmatprep.subr.bf16.mxu1 %v5904_v2 }
  0xc9   :  { %528 = vmatmul.mubr.bf16.vlgmr.msra.gmra.mrb[0].mxu1 %v5722_v4  ;;  %v5818_v4 = vld [vmem:[#allocation6 + $0x8] ss:$24 sps:$4 sm:$0xff]   ;;  %v5953_v2 = vld [vmem:[#allocation11 + $0xd0] ss:$8 sps:$4 sm:$0xff]  }
  0xca   :  { %2018 = vmatmul.mubr.bf16.vlgmr.msra.gmra.mrb[0].mxu0 %v5725_v5  ;;  %537 = vmatprep.mubr.bf16.mxu1 %v5734_v8  ;;  %v5823_v5 = vld [vmem:[#allocation12 + $0x204] ss:$8 sps:$4 sm:$0xff]   ;;  %v5821_v8 = vld [vmem:[#allocation12 + $0x200] ss:$8 sps:$4 sm:$0xff]  }
  0xcb   :  { %2099 = vmatpush1.bf16.msra.mxu0 %v5728_v6  ;;  %2027 = vmatprep.mubr.bf16.mxu0 %v5736_v9  ;;  %v5907_v6 = vld [vmem:[#allocation11 + $0x10] ss:$8 sps:$4 sm:$0xff]   ;;  %v5913_v9 = vld [vmem:[#allocation11 + $0x24] ss:$8 sps:$4 sm:$0xff]  }
  0xcc   :  { %2100 = vmatprep.subr.bf16.mxu0 %v5733_v7  ;;  %849 = vmatpush1.bf16.msra.mxu1 %v5902_v1  ;;  %v5909_v7 = vld [vmem:[#allocation11 + $0x14] ss:$8 sps:$4 sm:$0xff]   ;;  %v5877_v1 = vld [vmem:[#allocation12 + $0x2c4] ss:$8 sps:$4 sm:$0xff]  }
  0xcd   :  { %850 = vmatprep.subr.bf16.mxu1 %v5909_v7  ;;  %v5880_v7 = vld [vmem:[#allocation12 + $0x2d4] ss:$8 sps:$4 sm:$0xff]  }
  0xcf   :  { %2101 = vmatpush1.bf16.msra.mxu0 %v5731_v10  ;;  %v5827_v10 = vld [vmem:[#allocation6 + $0x3c] ss:$24 sps:$4 sm:$0xff]  }
  0xd0   :  { %2102 = vmatprep.subr.bf16.mxu0 %v5742_v11  ;;  %v5826_v11 = vld [vmem:[#allocation12 + $0x214] ss:$8 sps:$4 sm:$0xff]   ;;  %851 = vmatpush1.bf16.msra.mxu1 %v5907_v6 }
  0xd1   :  { %538 = vmatmul.mubr.bf16.gmra.mrb[4].mxu1 %v5738_v12  ;;  %v5911_v12 = vld [vmem:[#allocation11 + $0x20] ss:$8 sps:$4 sm:$0xff]   ;;  %852 = vmatprep.subr.bf16.mxu1 %v5913_v9  ;;  %v5881_v6 = vld [vmem:[#allocation6 + $0x15c] ss:$24 sps:$4 sm:$0xff]  }
  0xd2   :  { %2028 = vmatmul.mubr.bf16.gmra.mrb[4].mxu0 %v5739_v13  ;;  %547 = vmatprep.mubr.bf16.mxu1 %v5746_v16  ;;  %v5918_v13 = vld [vmem:[#allocation11 + $0x34] ss:$8 sps:$4 sm:$0xff]   ;;  %v5829_v16 = vld [vmem:[#allocation6 + $0x38] ss:$24 sps:$4 sm:$0xff]  }
  0xd3   :  { %2103 = vmatpush1.bf16.msra.mxu0 %v5740_v14  ;;  %2037 = vmatprep.mubr.bf16.mxu0 %v5748_v17  ;;  %v5824_v14 = vld [vmem:[#allocation12 + $0x210] ss:$8 sps:$4 sm:$0xff]   ;;  %v5961_v9 = vld [vmem:[#allocation11 + $0xf4] ss:$8 sps:$4 sm:$0xff]  }
  0xd4   :  { %2104 = vmatprep.subr.bf16.mxu0 %v5745_v15  ;;  %v5832_v15 = vld [vmem:[#allocation12 + $0x224] ss:$8 sps:$4 sm:$0xff]   ;;  %853 = vmatpush1.bf16.msra.mxu1 %v5911_v12  ;;  %v5916_v17 = vld [vmem:[#allocation11 + $0x30] ss:$8 sps:$4 sm:$0xff]  }
  0xd5   :  { %854 = vmatprep.subr.bf16.mxu1 %v5918_v13  ;;  %v5959_v12 = vld [vmem:[#allocation11 + $0xf0] ss:$8 sps:$4 sm:$0xff]  }
  0xd6   :  { %v5883_v13 = vld [vmem:[#allocation6 + $0x158] ss:$24 sps:$4 sm:$0xff]  }
  0xd7   :  { %2105 = vmatpush1.bf16.msra.mxu0 %v5743_v18  ;;  %v5830_v18 = vld [vmem:[#allocation12 + $0x220] ss:$8 sps:$4 sm:$0xff]  }
  0xd8   :  { %2106 = vmatprep.subr.bf16.mxu0 %v5754_v19  ;;  %v5922_v19 = vld [vmem:[#allocation11 + $0x44] ss:$8 sps:$4 sm:$0xff]   ;;  %855 = vmatpush1.bf16.msra.mxu1 %v5916_v17  ;;  %v5887_v17 = vld [vmem:[#allocation12 + $0x2f0] ss:$8 sps:$4 sm:$0xff]  }
  0xd9   :  { %548 = vmatmul.mubr.bf16.gmra.mrb[8].mxu1 %v5750_v20  ;;  %v5836_v20 = vld [vmem:[#allocation6 + $0x6c] ss:$24 sps:$4 sm:$0xff]   ;;  %856 = vmatprep.subr.bf16.mxu1 %v5922_v19 }
  0xda   :  { %2038 = vmatmul.mubr.bf16.gmra.mrb[8].mxu0 %v5751_v21  ;;  %557 = vmatprep.mubr.bf16.mxu1 %v5758_v24  ;;  %v5835_v21 = vld [vmem:[#allocation12 + $0x234] ss:$8 sps:$4 sm:$0xff]   ;;  %v5833_v24 = vld [vmem:[#allocation12 + $0x230] ss:$8 sps:$4 sm:$0xff]  }
  0xdb   :  { %2107 = vmatpush1.bf16.msra.mxu0 %v5752_v22  ;;  %2047 = vmatprep.mubr.bf16.mxu0 %v5760_v25  ;;  %v5920_v22 = vld [vmem:[#allocation11 + $0x40] ss:$8 sps:$4 sm:$0xff]   ;;  %v5841_v25 = vld [vmem:[#allocation12 + $0x244] ss:$8 sps:$4 sm:$0xff]  }
  0xdc   :  { %2108 = vmatprep.subr.bf16.mxu0 %v5757_v23  ;;  %v5927_v23 = vld [vmem:[#allocation11 + $0x54] ss:$8 sps:$4 sm:$0xff]   ;;  %857 = vmatpush1.bf16.msra.mxu1 %v5920_v22  ;;  %v5898_v22 = vld [vmem:[#allocation6 + $0x70] ss:$24 sps:$4 sm:$0xff]  }
  0xdd   :  { %858 = vmatprep.subr.bf16.mxu1 %v5927_v23  ;;  %v5893_v19 = vld [vmem:[#allocation6 + $0x44] ss:$24 sps:$4 sm:$0xff]  }
  0xde   :  { %v5899_v23 = vld [vmem:[#allocation6 + $0xa4] ss:$24 sps:$4 sm:$0xff]  }
  0xdf   :  { %2109 = vmatpush1.bf16.msra.mxu0 %v5755_v26  ;;  %v5838_v26 = vld [vmem:[#allocation6 + $0x68] ss:$24 sps:$4 sm:$0xff]  }
  0xe0   :  { %2110 = vmatprep.subr.bf16.mxu0 %v5766_v27  ;;  %v5925_v27 = vld [vmem:[#allocation11 + $0x50] ss:$8 sps:$4 sm:$0xff]  }
  0xe1   :  { %558 = vmatmul.mubr.bf16.gmra.mrb[12].mxu1 %v5762_v28  ;;  %v5839_v28 = vld [vmem:[#allocation12 + $0x240] ss:$8 sps:$4 sm:$0xff]  }
  0xe2   :  { %2048 = vmatmul.mubr.bf16.gmra.mrb[12].mxu0 %v5763_v29  ;;  %567 = vmatprep.mubr.bf16.mxu1 %v5770_v32  ;;  %v5931_v29 = vld [vmem:[#allocation11 + $0x64] ss:$8 sps:$4 sm:$0xff]   ;;  %v5842_v32 = vld [vmem:[#allocation12 + $0x250] ss:$8 sps:$4 sm:$0xff]  }
  0xe3   :  { %2111 = vmatpush1.bf16.msra.mxu0 %v5764_v30  ;;  %2057 = vmatprep.mubr.bf16.mxu0 %v5772_v33  ;;  %v5845_v30 = vld [vmem:[#allocation6 + $0x9c] ss:$24 sps:$4 sm:$0xff]   ;;  %v5929_v33 = vld [vmem:[#allocation11 + $0x60] ss:$8 sps:$4 sm:$0xff]  }
  0xe4   :  { %2112 = vmatprep.subr.bf16.mxu0 %v5769_v31  ;;  %v5844_v31 = vld [vmem:[#allocation12 + $0x254] ss:$8 sps:$4 sm:$0xff]   ;;  %859 = vmatpush1.bf16.msra.mxu1 %v5925_v27  ;;  %v5910_v27 = vld [vmem:[#allocation6 + $0xd0] ss:$24 sps:$4 sm:$0xff]  }
  0xe5   :  { %860 = vmatprep.subr.bf16.mxu1 %v5931_v29  ;;  %v5919_v29 = vld [vmem:[#allocation6 + $0x100] ss:$24 sps:$4 sm:$0xff]  }
  0xe7   :  { %2113 = vmatpush1.bf16.msra.mxu0 %v5767_v34  ;;  %v5936_v34 = vld [vmem:[#allocation11 + $0x74] ss:$8 sps:$4 sm:$0xff]  }
  0xe8   :  { %2114 = vmatprep.subr.bf16.mxu0 %v5778_v35  ;;  %v5850_v35 = vld [vmem:[#allocation12 + $0x264] ss:$8 sps:$4 sm:$0xff]   ;;  %861 = vmatpush1.bf16.msra.mxu1 %v5929_v33  ;;  %v5937_v33 = vld [vmem:[#allocation6 + $0x160] ss:$24 sps:$4 sm:$0xff]  }
  0xe9   :  { %568 = vmatmul.mubr.bf16.gmra.mrb[16].mxu1 %v5774_v36  ;;  %v5847_v36 = vld [vmem:[#allocation6 + $0x98] ss:$24 sps:$4 sm:$0xff]   ;;  %862 = vmatprep.subr.bf16.mxu1 %v5936_v34 }
  0xea   :  { %2058 = vmatmul.mubr.bf16.gmra.mrb[16].mxu0 %v5775_v37  ;;  %577 = vmatprep.mubr.bf16.mxu1 %v5782_v40  ;;  %v5934_v37 = vld [vmem:[#allocation11 + $0x70] ss:$8 sps:$4 sm:$0xff]   ;;  %v5940_v40 = vld [vmem:[#allocation11 + $0x84] ss:$8 sps:$4 sm:$0xff]  }
  0xeb   :  { %2115 = vmatpush1.bf16.msra.mxu0 %v5776_v38  ;;  %2067 = vmatprep.mubr.bf16.mxu0 %v5784_v41  ;;  %v5848_v38 = vld [vmem:[#allocation12 + $0x260] ss:$8 sps:$4 sm:$0xff]   ;;  %v5853_v41 = vld [vmem:[#allocation12 + $0x274] ss:$8 sps:$4 sm:$0xff]  }
  0xec   :  { %2116 = vmatprep.subr.bf16.mxu0 %v5781_v39  ;;  %v5854_v39 = vld [vmem:[#allocation6 + $0xcc] ss:$24 sps:$4 sm:$0xff]   ;;  %863 = vmatpush1.bf16.msra.mxu1 %v5934_v37 }
  0xed   :  { %864 = vmatprep.subr.bf16.mxu1 %v5940_v40 }
  0xef   :  { %2117 = vmatpush1.bf16.msra.mxu0 %v5779_v42  ;;  %v5938_v42 = vld [vmem:[#allocation11 + $0x80] ss:$8 sps:$4 sm:$0xff]  }
  0xf0   :  { %2118 = vmatprep.subr.bf16.mxu0 %v5790_v43  ;;  %v5851_v43 = vld [vmem:[#allocation12 + $0x270] ss:$8 sps:$4 sm:$0xff]   ;;  %865 = vmatpush1.bf16.msra.mxu1 %v5938_v42 }
  0xf1   :  { %578 = vmatmul.mubr.bf16.gmra.mrb[20].mxu1 %v5786_v44  ;;  %v5943_v44 = vld [vmem:[#allocation11 + $0x94] ss:$8 sps:$4 sm:$0xff]  }
  0xf2   :  { %2068 = vmatmul.mubr.bf16.gmra.mrb[20].mxu0 %v5787_v45  ;;  %587 = vmatprep.mubr.bf16.mxu1 %v5794_v48  ;;  %v5859_v45 = vld [vmem:[#allocation12 + $0x284] ss:$8 sps:$4 sm:$0xff]  }
  0xf3   :  { %2119 = vmatpush1.bf16.msra.mxu0 %v5788_v46  ;;  %2077 = vmatprep.mubr.bf16.mxu0 %v5796_v49  ;;  %v5941_v46 = vld [vmem:[#allocation11 + $0x90] ss:$8 sps:$4 sm:$0xff]   ;;  %v5946_v48 = vld [vmem:[#allocation11 + $0xa4] ss:$8 sps:$4 sm:$0xff]   ;;  %v5857_v49 = vld [vmem:[#allocation12 + $0x280] ss:$8 sps:$4 sm:$0xff]  }
  0xf4   :  { %2120 = vmatprep.subr.bf16.mxu0 %v5793_v47  ;;  %v5856_v47 = vld [vmem:[#allocation6 + $0xc8] ss:$24 sps:$4 sm:$0xff]   ;;  %866 = vmatprep.subr.bf16.mxu1 %v5943_v44 }
  0xf5   :  { %867 = vmatpush1.bf16.msra.mxu1 %v5941_v46  ;;  %v5962_v44 = vld [vmem:[#allocation14] ss:$8 sps:$4 sm:$0xff]  }
  0xf6   :  { %868 = vmatprep.subr.bf16.mxu1 %v5946_v48 }
  0xf7   :  { %2121 = vmatpush1.bf16.msra.mxu0 %v5791_v50  ;;  %v5863_v50 = vld [vmem:[#allocation6 + $0xfc] ss:$24 sps:$4 sm:$0xff]  }
  0xf8   :  { %2122 = vmatprep.subr.bf16.mxu0 %v5802_v51  ;;  %v5862_v51 = vld [vmem:[#allocation12 + $0x294] ss:$8 sps:$4 sm:$0xff]  }
  0xf9   :  { %588 = vmatmul.mubr.bf16.gmra.mrb[24].mxu1 %v5798_v52  ;;  %v5944_v52 = vld [vmem:[#allocation11 + $0xa0] ss:$8 sps:$4 sm:$0xff]  }
  0xfa   :  { %2078 = vmatmul.mubr.bf16.gmra.mrb[24].mxu0 %v5799_v53  ;;  %597 = vmatprep.mubr.bf16.mxu1 %v5806_v56  ;;  %v5949_v53 = vld [vmem:[#allocation11 + $0xb4] ss:$8 sps:$4 sm:$0xff]   ;;  %v5947_v56 = vld [vmem:[#allocation11 + $0xb0] ss:$8 sps:$4 sm:$0xff]  }
  0xfb   :  { %2123 = vmatpush1.bf16.msra.mxu0 %v5800_v54  ;;  %2087 = vmatprep.mubr.bf16.mxu0 %v5808_v57  ;;  %v5860_v54 = vld [vmem:[#allocation12 + $0x290] ss:$8 sps:$4 sm:$0xff]  }
  0xfc   :  { %2124 = vmatprep.subr.bf16.mxu0 %v5805_v55  ;;  %v5868_v55 = vld [vmem:[#allocation12 + $0x2a4] ss:$8 sps:$4 sm:$0xff]   ;;  %v5865_v57 = vld [vmem:[#allocation6 + $0xf8] ss:$24 sps:$4 sm:$0xff]   ;;  %869 = vmatpush1.bf16.msra.mxu1 %v5944_v52 }
  0xfd   :  { %870 = vmatprep.subr.bf16.mxu1 %v5949_v53 }
  0xff   :  { %2125 = vmatpush1.bf16.msra.mxu0 %v5803_v58  ;;  %v5952_v58 = vld [vmem:[#allocation11 + $0xc4] ss:$8 sps:$4 sm:$0xff]  }
 0x100   :  { %2126 = vmatprep.subr.bf16.mxu0 %v5814_v59  ;;  %v5866_v59 = vld [vmem:[#allocation12 + $0x2a0] ss:$8 sps:$4 sm:$0xff]   ;;  %871 = vmatpush1.bf16.msra.mxu1 %v5947_v56 }
 0x101   :  { %598 = vmatmul.mubr.bf16.gmra.mrb[28].mxu1 %v5810_v60  ;;  %v5872_v60 = vld [vmem:[#allocation6 + $0x12c] ss:$24 sps:$4 sm:$0xff]   ;;  %872 = vmatprep.subr.bf16.mxu1 %v5952_v58  ;;  %v5968_v58 = vld [vmem:[#allocation14 + $0x20] ss:$8 sps:$4 sm:$0xff]  }
 0x102   :  { %2088 = vmatmul.mubr.bf16.gmra.mrb[28].mxu0 %v5811_v61  ;;  %v5871_v61 = vld [vmem:[#allocation12 + $0x2b4] ss:$8 sps:$4 sm:$0xff]  }
 0x103   :  { %2127 = vmatpush1.bf16.msra.mxu0 %v5812_v62  ;;  %2130 = vmatprep.mubr.bf16.mxu0 %v5820_v63  ;;  %v5950_v62 = vld [vmem:[#allocation11 + $0xc0] ss:$8 sps:$4 sm:$0xff]   ;;  %v5955_v63 = vld [vmem:[#allocation11 + $0xd4] ss:$8 sps:$4 sm:$0xff]  }
 0x104   :  { %2128 = vmatprep.subr.bf16.mxu0 %v5817_v0  ;;  %v5869_v0 = vld [vmem:[#allocation12 + $0x2b0] ss:$8 sps:$4 sm:$0xff]   ;;  %873 = vmatpush1.bf16.msra.mxu1 %v5950_v62 }
 0x105   :  { %874 = vmatprep.subr.bf16.mxu1 %v5955_v63 }
 0x107   :  { %2129 = vmatpush1.bf16.msra.mxu0 %v5815_v3  ;;  %v5874_v3 = vld [vmem:[#allocation6 + $0x128] ss:$24 sps:$4 sm:$0xff]  }
 0x108   :  { %2211 = vmatprep.subr.bf16.mxu0 %v5823_v5  ;;  %v5875_v5 = vld [vmem:[#allocation12 + $0x2c0] ss:$8 sps:$4 sm:$0xff]   ;;  %875 = vmatpush1.bf16.msra.mxu1 %v5953_v2 }
 0x10a   :  { %2131 = vmatmul.mubr.bf16.vlgmr.msra.gmra.mrb[0].mxu0 %v5818_v4  ;;  %v5958_v4 = vld [vmem:[#allocation11 + $0xe4] ss:$8 sps:$4 sm:$0xff]  }
 0x10b   :  { %2212 = vmatpush1.bf16.msra.mxu0 %v5821_v8  ;;  %2140 = vmatprep.mubr.bf16.mxu0 %v5827_v10  ;;  %v5956_v8 = vld [vmem:[#allocation11 + $0xe0] ss:$8 sps:$4 sm:$0xff]   ;;  %v5878_v10 = vld [vmem:[#allocation12 + $0x2d0] ss:$8 sps:$4 sm:$0xff]  }
 0x10c   :  { %2213 = vmatprep.subr.bf16.mxu0 %v5826_v11  ;;  %876 = vmatprep.subr.bf16.mxu1 %v5958_v4  ;;  %v5886_v11 = vld [vmem:[#allocation12 + $0x2e4] ss:$8 sps:$4 sm:$0xff]  }
 0x10d   :  { %877 = vmatpush1.bf16.msra.mxu1 %v5956_v8  ;;  %v5976_v4 = vld [vmem:[#allocation14 + $0x44] ss:$8 sps:$4 sm:$0xff]   ;;  %v5974_v8 = vld [vmem:[#allocation14 + $0x40] ss:$8 sps:$4 sm:$0xff]  }
 0x10e   :  { %878 = vmatprep.subr.bf16.mxu1 %v5961_v9  ;;  %v5979_v9 = vld [vmem:[#allocation14 + $0x54] ss:$8 sps:$4 sm:$0xff]  }
 0x10f   :  { %2214 = vmatpush1.bf16.msra.mxu0 %v5824_v14  ;;  %v5884_v14 = vld [vmem:[#allocation12 + $0x2e0] ss:$8 sps:$4 sm:$0xff]  }
 0x110   :  { %2215 = vmatprep.subr.bf16.mxu0 %v5832_v15  ;;  %v5892_v15 = vld [vmem:[#allocation6 + $0x14] ss:$24 sps:$4 sm:$0xff]  }
 0x111   :  { %879 = vmatpush1.bf16.msra.mxu1 %v5959_v12 }
 0x112   :  { %2141 = vmatmul.mubr.bf16.gmra.mrb[4].mxu0 %v5829_v16  ;;  %v5889_v16 = vld [vmem:[#allocation12 + $0x2f4] ss:$8 sps:$4 sm:$0xff]  }
 0x113   :  { %2216 = vmatpush1.bf16.msra.mxu0 %v5830_v18  ;;  %2150 = vmatprep.mubr.bf16.mxu0 %v5836_v20  ;;  %v5890_v18 = vld [vmem:[#allocation6 + $0x10] ss:$24 sps:$4 sm:$0xff]   ;;  %v5895_v20 = vld [vmem:[#allocation6 + $0x40] ss:$24 sps:$4 sm:$0xff]  }
 0x114   :  { %2217 = vmatprep.subr.bf16.mxu0 %v5835_v21  ;;  %v5896_v21 = vld [vmem:[#allocation6 + $0x74] ss:$24 sps:$4 sm:$0xff]  }
 0x117   :  { %2218 = vmatpush1.bf16.msra.mxu0 %v5833_v24  ;;  %v5901_v24 = vld [vmem:[#allocation6 + $0xa0] ss:$24 sps:$4 sm:$0xff]  }
 0x118   :  { %2219 = vmatprep.subr.bf16.mxu0 %v5841_v25  ;;  %v5964_v25 = vld [vmem:[#allocation14 + $0x4] ss:$8 sps:$4 sm:$0xff]  }
 0x119   :  { %2564 = vmatprep.subr.bf16.mxu1 %v5964_v25 }
 0x11a   :  { %2151 = vmatmul.mubr.bf16.gmra.mrb[8].mxu0 %v5838_v26  ;;  %v5905_v26 = vld [vmem:[#allocation6 + $0xd4] ss:$24 sps:$4 sm:$0xff]  }
 0x11b   :  { %2220 = vmatpush1.bf16.msra.mxu0 %v5839_v28  ;;  %2160 = vmatprep.mubr.bf16.mxu0 %v5845_v30  ;;  %v5914_v28 = vld [vmem:[#allocation6 + $0x104] ss:$24 sps:$4 sm:$0xff]   ;;  %v5923_v30 = vld [vmem:[#allocation6 + $0x134] ss:$24 sps:$4 sm:$0xff]  }
 0x11c   :  { %2221 = vmatprep.subr.bf16.mxu0 %v5844_v31  ;;  %v5928_v31 = vld [vmem:[#allocation6 + $0x130] ss:$24 sps:$4 sm:$0xff]  }
 0x11f   :  { %2222 = vmatpush1.bf16.msra.mxu0 %v5842_v32  ;;  %v5932_v32 = vld [vmem:[#allocation6 + $0x164] ss:$24 sps:$4 sm:$0xff]  }
 0x120   :  { %2223 = vmatprep.subr.bf16.mxu0 %v5850_v35 }
 0x122   :  { %2161 = vmatmul.mubr.bf16.gmra.mrb[12].mxu0 %v5847_v36 }
 0x123   :  { %2224 = vmatpush1.bf16.msra.mxu0 %v5848_v38  ;;  %2170 = vmatprep.mubr.bf16.mxu0 %v5854_v39 }
 0x124   :  { %2225 = vmatprep.subr.bf16.mxu0 %v5853_v41 }
 0x127   :  { %2226 = vmatpush1.bf16.msra.mxu0 %v5851_v43 }
 0x128   :  { %2227 = vmatprep.subr.bf16.mxu0 %v5859_v45  ;;  %v5967_v45 = vld [vmem:[#allocation14 + $0x14] ss:$8 sps:$4 sm:$0xff]  }
 0x12a   :  { %2171 = vmatmul.mubr.bf16.gmra.mrb[16].mxu0 %v5856_v47 }
 0x12b   :  { %2228 = vmatpush1.bf16.msra.mxu0 %v5857_v49  ;;  %2180 = vmatprep.mubr.bf16.mxu0 %v5863_v50 }
 0x12c   :  { %2229 = vmatprep.subr.bf16.mxu0 %v5862_v51  ;;  %v5965_v51 = vld [vmem:[#allocation14 + $0x10] ss:$8 sps:$4 sm:$0xff]  }
 0x12f   :  { %2230 = vmatpush1.bf16.msra.mxu0 %v5860_v54  ;;  %v5970_v54 = vld [vmem:[#allocation14 + $0x24] ss:$8 sps:$4 sm:$0xff]  }
 0x130   :  { %2231 = vmatprep.subr.bf16.mxu0 %v5868_v55 }
 0x132   :  { %2181 = vmatmul.mubr.bf16.gmra.mrb[20].mxu0 %v5865_v57 }
 0x133   :  { %2232 = vmatpush1.bf16.msra.mxu0 %v5866_v59  ;;  %2190 = vmatprep.mubr.bf16.mxu0 %v5872_v60  ;;  %v5973_v59 = vld [vmem:[#allocation14 + $0x34] ss:$8 sps:$4 sm:$0xff]  }
 0x134   :  { %2233 = vmatprep.subr.bf16.mxu0 %v5871_v61 }
 0x137   :  { %2234 = vmatpush1.bf16.msra.mxu0 %v5869_v0 }
 0x138   :  { %2235 = vmatprep.subr.bf16.mxu0 %v5877_v1  ;;  %v5971_v1 = vld [vmem:[#allocation14 + $0x30] ss:$8 sps:$4 sm:$0xff]  }
 0x13a   :  { %2191 = vmatmul.mubr.bf16.gmra.mrb[24].mxu0 %v5874_v3 }
 0x13b   :  { %2236 = vmatpush1.bf16.msra.mxu0 %v5875_v5  ;;  %2200 = vmatprep.mubr.bf16.mxu0 %v5881_v6 }
 0x13c   :  { %2237 = vmatprep.subr.bf16.mxu0 %v5880_v7 }
 0x13f   :  { %2238 = vmatpush1.bf16.msra.mxu0 %v5878_v10 }
 0x140   :  { %2239 = vmatprep.subr.bf16.mxu0 %v5886_v11 }
 0x142   :  { %2201 = vmatmul.mubr.bf16.gmra.mrb[28].mxu0 %v5883_v13 }
 0x143   :  { %2240 = vmatpush1.bf16.msra.mxu0 %v5884_v14  ;;  %2243 = vmatprep.mubr.bf16.mxu0 %v5892_v15  ;;  %v5977_v15 = vld [vmem:[#allocation14 + $0x50] ss:$8 sps:$4 sm:$0xff]  }
 0x144   :  { %2241 = vmatprep.subr.bf16.mxu0 %v5889_v16 }
 0x147   :  { %2242 = vmatpush1.bf16.msra.mxu0 %v5887_v17 }
 0x14a   :  { %2244 = vmatmul.mubr.bf16.vlgmr.msra.gmra.mrb[0].mxu0 %v5890_v18  ;;  %v5982_v18 = vld [vmem:[#allocation14 + $0x64] ss:$8 sps:$4 sm:$0xff]  }
 0x14b   :  { %2253 = vmatprep.mubr.bf16.mxu0 %v5893_v19 }
 0x152   :  { %2254 = vmatmul.mubr.bf16.gmra.mrb[4].mxu0 %v5895_v20 }
 0x153   :  { %2263 = vmatprep.mubr.bf16.mxu0 %v5896_v21 }
 0x15a   :  { %2264 = vmatmul.mubr.bf16.gmra.mrb[8].mxu0 %v5898_v22  ;;  %v5980_v22 = vld [vmem:[#allocation14 + $0x60] ss:$8 sps:$4 sm:$0xff]  }
 0x15b   :  { %2273 = vmatprep.mubr.bf16.mxu0 %v5899_v23  ;;  %v5985_v23 = vld [vmem:[#allocation14 + $0x74] ss:$8 sps:$4 sm:$0xff]  }
 0x162   :  { %2274 = vmatmul.mubr.bf16.gmra.mrb[12].mxu0 %v5901_v24 }
 0x163   :  { %2283 = vmatprep.mubr.bf16.mxu0 %v5905_v26 }
 0x16a   :  { %2284 = vmatmul.mubr.bf16.gmra.mrb[16].mxu0 %v5910_v27 }
 0x16b   :  { %2293 = vmatprep.mubr.bf16.mxu0 %v5914_v28 }
 0x172   :  { %2294 = vmatmul.mubr.bf16.gmra.mrb[20].mxu0 %v5919_v29  ;;  %v5983_v29 = vld [vmem:[#allocation14 + $0x70] ss:$8 sps:$4 sm:$0xff]  }
 0x173   :  { %2303 = vmatprep.mubr.bf16.mxu0 %v5923_v30 }
 0x17a   :  { %2304 = vmatmul.mubr.bf16.gmra.mrb[24].mxu0 %v5928_v31 }
 0x17b   :  { %2313 = vmatprep.mubr.bf16.mxu0 %v5932_v32  ;;  %v5988_v32 = vld [vmem:[#allocation14 + $0x84] ss:$8 sps:$4 sm:$0xff]  }
 0x182   :  { %2314 = vmatmul.mubr.bf16.gmra.mrb[28].mxu0 %v5937_v33 }
 0x19c   :  { %v529_v34 = vpop.f32.mrb[0].mxu1 }
 0x19d   :  { %v608_v35 = vmax.f32 %v529_v34, 0.0  ;;  %v531_v36 = vpop.f32.mrb[1].mxu1 }
 0x19e   :  { %v609_v37 = vmax.f32 %v531_v36, 0.0  ;;  %v533_v38 = vpop.f32.mrb[2].mxu1  ;;  %v5986_v36 = vld [vmem:[#allocation14 + $0x80] ss:$8 sps:$4 sm:$0xff]  }
 0x19f   :  { %v610_v39 = vmax.f32 %v533_v38, 0.0  ;;  %v535_v40 = vpop.f32.mrb[3].mxu1 }
 0x1a0   :  { %v611_v41 = vmax.f32 %v535_v40, 0.0 }
 0x1a1   :  { %v640_v42 = vpack.c.bf16 %v610_v39, %v608_v35 }
 0x1a2   :  { %v641_v43 = vpack.c.bf16 %v611_v41, %v609_v37  ;;  %v5991_v37 = vld [vmem:[#allocation14 + $0x94] ss:$8 sps:$4 sm:$0xff]  }
 0x1a4   :  { %v539_v46 = vpop.f32.mrb[4].mxu1  ;;  %880 = vmatprep.mubr.bf16.mxu1 %v641_v43  ;;  %v5989_v43 = vld [vmem:[#allocation14 + $0x90] ss:$8 sps:$4 sm:$0xff]  }
 0x1a5   :  { %v612_v47 = vmax.f32 %v539_v46, 0.0  ;;  %v541_v48 = vpop.f32.mrb[5].mxu1  ;;  %881 = vmatmul.mubr.bf16.vlgmr.msra.gmra.mrb[32].mxu1 %v640_v42  ;;  %v5994_v46 = vld [vmem:[#allocation14 + $0xa4] ss:$8 sps:$4 sm:$0xff]  }
 0x1a6   :  { %v613_v49 = vmax.f32 %v541_v48, 0.0  ;;  %v543_v50 = vpop.f32.mrb[6].mxu1  ;;  %2565 = vmatpush1.bf16.msra.mxu1 %v5962_v44 }
 0x1a7   :  { %v614_v52 = vmax.f32 %v543_v50, 0.0  ;;  %v545_v53 = vpop.f32.mrb[7].mxu1  ;;  %2566 = vmatprep.subr.bf16.mxu1 %v5967_v45  ;;  %v5992_v50 = vld [vmem:[#allocation14 + $0xa0] ss:$8 sps:$4 sm:$0xff]  }
 0x1a8   :  { %v615_v55 = vmax.f32 %v545_v53, 0.0 }
 0x1a9   :  { %v642_v56 = vpack.c.bf16 %v614_v52, %v612_v47 }
 0x1aa   :  { %v643_v57 = vpack.c.bf16 %v615_v55, %v613_v49  ;;  %2567 = vmatpush1.bf16.msra.mxu1 %v5965_v51  ;;  %v5997_v51 = vld [vmem:[#allocation14 + $0xb4] ss:$8 sps:$4 sm:$0xff]  }
 0x1ab   :  { %2568 = vmatprep.subr.bf16.mxu1 %v5970_v54 }
 0x1ac   :  { %v549_v60 = vpop.f32.mrb[8].mxu1  ;;  %890 = vmatprep.mubr.bf16.mxu1 %v643_v57  ;;  %v5995_v57 = vld [vmem:[#allocation14 + $0xb0] ss:$8 sps:$4 sm:$0xff]  }
 0x1ad   :  { %v616_v61 = vmax.f32 %v549_v60, 0.0  ;;  %v551_v62 = vpop.f32.mrb[9].mxu1  ;;  %891 = vmatmul.mubr.bf16.gmra.mrb[36].mxu1 %v642_v56  ;;  %v6000_v60 = vld [vmem:[#allocation14 + $0xc4] ss:$8 sps:$4 sm:$0xff]  }
 0x1ae   :  { %v617_v63 = vmax.f32 %v551_v62, 0.0  ;;  %v553_v0 = vpop.f32.mrb[10].mxu1  ;;  %2569 = vmatpush1.bf16.msra.mxu1 %v5968_v58 }
 0x1af   :  { %v618_v2 = vmax.f32 %v553_v0, 0.0  ;;  %v555_v3 = vpop.f32.mrb[11].mxu1  ;;  %2570 = vmatprep.subr.bf16.mxu1 %v5973_v59  ;;  %v5998_v0 = vld [vmem:[#allocation14 + $0xc0] ss:$8 sps:$4 sm:$0xff]  }
 0x1b0   :  { %v619_v5 = vmax.f32 %v555_v3, 0.0 }
 0x1b1   :  { %v644_v6 = vpack.c.bf16 %v618_v2, %v616_v61 }
 0x1b2   :  { %v645_v7 = vpack.c.bf16 %v619_v5, %v617_v63  ;;  %2571 = vmatpush1.bf16.msra.mxu1 %v5971_v1  ;;  %v6003_v1 = vld [vmem:[#allocation14 + $0xd4] ss:$8 sps:$4 sm:$0xff]  }
 0x1b3   :  { %2572 = vmatprep.subr.bf16.mxu1 %v5976_v4 }
 0x1b4   :  { %v559_v10 = vpop.f32.mrb[12].mxu1  ;;  %900 = vmatprep.mubr.bf16.mxu1 %v645_v7  ;;  %v6001_v7 = vld [vmem:[#allocation14 + $0xd0] ss:$8 sps:$4 sm:$0xff]  }
 0x1b5   :  { %v620_v11 = vmax.f32 %v559_v10, 0.0  ;;  %v561_v12 = vpop.f32.mrb[13].mxu1  ;;  %901 = vmatmul.mubr.bf16.gmra.mrb[40].mxu1 %v644_v6  ;;  %v6006_v10 = vld [vmem:[#allocation14 + $0xe4] ss:$8 sps:$4 sm:$0xff]  }
 0x1b6   :  { %v621_v13 = vmax.f32 %v561_v12, 0.0  ;;  %v563_v14 = vpop.f32.mrb[14].mxu1  ;;  %2573 = vmatpush1.bf16.msra.mxu1 %v5974_v8 }
 0x1b7   :  { %v622_v16 = vmax.f32 %v563_v14, 0.0  ;;  %v565_v17 = vpop.f32.mrb[15].mxu1  ;;  %2574 = vmatprep.subr.bf16.mxu1 %v5979_v9  ;;  %v6004_v14 = vld [vmem:[#allocation14 + $0xe0] ss:$8 sps:$4 sm:$0xff]  }
 0x1b8   :  { %v623_v19 = vmax.f32 %v565_v17, 0.0 }
 0x1b9   :  { %v646_v20 = vpack.c.bf16 %v622_v16, %v620_v11  ;;  %v6007_v16 = vld [vmem:[#allocation14 + $0xf0] ss:$8 sps:$4 sm:$0xff]  }
 0x1ba   :  { %v647_v21 = vpack.c.bf16 %v623_v19, %v621_v13  ;;  %2575 = vmatpush1.bf16.msra.mxu1 %v5977_v15  ;;  %v6009_v15 = vld [vmem:[#allocation14 + $0xf4] ss:$8 sps:$4 sm:$0xff]  }
 0x1bb   :  { %2576 = vmatprep.subr.bf16.mxu1 %v5982_v18 }
 0x1bc   :  { %v569_v24 = vpop.f32.mrb[16].mxu1  ;;  %910 = vmatprep.mubr.bf16.mxu1 %v647_v21 }
 0x1bd   :  { %v624_v25 = vmax.f32 %v569_v24, 0.0  ;;  %v571_v26 = vpop.f32.mrb[17].mxu1  ;;  %911 = vmatmul.mubr.bf16.gmra.mrb[44].mxu1 %v646_v20 }
 0x1be   :  { %v625_v27 = vmax.f32 %v571_v26, 0.0  ;;  %v573_v28 = vpop.f32.mrb[18].mxu1  ;;  %2577 = vmatpush1.bf16.msra.mxu1 %v5980_v22 }
 0x1bf   :  { %v626_v30 = vmax.f32 %v573_v28, 0.0  ;;  %v575_v31 = vpop.f32.mrb[19].mxu1  ;;  %2578 = vmatprep.subr.bf16.mxu1 %v5985_v23 }
 0x1c0   :  { %v627_v33 = vmax.f32 %v575_v31, 0.0 }
 0x1c1   :  { %v648_v34 = vpack.c.bf16 %v626_v30, %v624_v25 }
 0x1c2   :  { %v649_v35 = vpack.c.bf16 %v627_v33, %v625_v27  ;;  %2579 = vmatpush1.bf16.msra.mxu1 %v5983_v29 }
 0x1c3   :  { %2580 = vmatprep.subr.bf16.mxu1 %v5988_v32 }
 0x1c4   :  { %v579_v38 = vpop.f32.mrb[20].mxu1  ;;  %920 = vmatprep.mubr.bf16.mxu1 %v649_v35 }
 0x1c5   :  { %v628_v39 = vmax.f32 %v579_v38, 0.0  ;;  %v581_v40 = vpop.f32.mrb[21].mxu1  ;;  %921 = vmatmul.mubr.bf16.gmra.mrb[48].mxu1 %v648_v34 }
 0x1c6   :  { %v629_v41 = vmax.f32 %v581_v40, 0.0  ;;  %v583_v42 = vpop.f32.mrb[22].mxu1  ;;  %2581 = vmatpush1.bf16.msra.mxu1 %v5986_v36 }
 0x1c7   :  { %v630_v44 = vmax.f32 %v583_v42, 0.0  ;;  %v585_v45 = vpop.f32.mrb[23].mxu1  ;;  %2582 = vmatprep.subr.bf16.mxu1 %v5991_v37 }
 0x1c8   :  { %v631_v47 = vmax.f32 %v585_v45, 0.0 }
 0x1c9   :  { %v650_v48 = vpack.c.bf16 %v630_v44, %v628_v39 }
 0x1ca   :  { %v651_v49 = vpack.c.bf16 %v631_v47, %v629_v41  ;;  %2583 = vmatpush1.bf16.msra.mxu1 %v5989_v43 }
 0x1cb   :  { %2584 = vmatprep.subr.bf16.mxu1 %v5994_v46 }
 0x1cc   :  { %v589_v52 = vpop.f32.mrb[24].mxu1  ;;  %930 = vmatprep.mubr.bf16.mxu1 %v651_v49 }
 0x1cd   :  { %v632_v53 = vmax.f32 %v589_v52, 0.0  ;;  %v591_v54 = vpop.f32.mrb[25].mxu1  ;;  %931 = vmatmul.mubr.bf16.gmra.mrb[52].mxu1 %v650_v48 }
 0x1ce   :  { %v633_v55 = vmax.f32 %v591_v54, 0.0  ;;  %v593_v56 = vpop.f32.mrb[26].mxu1  ;;  %2585 = vmatpush1.bf16.msra.mxu1 %v5992_v50 }
 0x1cf   :  { %v634_v58 = vmax.f32 %v593_v56, 0.0  ;;  %v595_v59 = vpop.f32.mrb[27].mxu1  ;;  %2586 = vmatprep.subr.bf16.mxu1 %v5997_v51 }
 0x1d0   :  { %v635_v61 = vmax.f32 %v595_v59, 0.0 }
 0x1d1   :  { %v652_v62 = vpack.c.bf16 %v634_v58, %v632_v53 }
 0x1d2   :  { %v653_v63 = vpack.c.bf16 %v635_v61, %v633_v55  ;;  %2587 = vmatpush1.bf16.msra.mxu1 %v5995_v57 }
 0x1d3   :  { %2588 = vmatprep.subr.bf16.mxu1 %v6000_v60 }
 0x1d4   :  { %v599_v2 = vpop.f32.mrb[28].mxu1  ;;  %940 = vmatprep.mubr.bf16.mxu1 %v653_v63 }
 0x1d5   :  { %v636_v3 = vmax.f32 %v599_v2, 0.0  ;;  %v601_v4 = vpop.f32.mrb[29].mxu1  ;;  %941 = vmatmul.mubr.bf16.gmra.mrb[56].mxu1 %v652_v62 }
 0x1d6   :  { %v637_v5 = vmax.f32 %v601_v4, 0.0  ;;  %v603_v6 = vpop.f32.mrb[30].mxu1  ;;  %2589 = vmatpush1.bf16.msra.mxu1 %v5998_v0 }
 0x1d7   :  { %v638_v8 = vmax.f32 %v603_v6, 0.0  ;;  %v605_v9 = vpop.f32.mrb[31].mxu1  ;;  %2590 = vmatprep.subr.bf16.mxu1 %v6003_v1 }
 0x1d8   :  { %v639_v11 = vmax.f32 %v605_v9, 0.0 }
 0x1d9   :  { %v654_v12 = vpack.c.bf16 %v638_v8, %v636_v3 }
 0x1da   :  { %v655_v13 = vpack.c.bf16 %v639_v11, %v637_v5  ;;  %2591 = vmatpush1.bf16.msra.mxu1 %v6001_v7 }
 0x1db   :  { %2592 = vmatprep.subr.bf16.mxu1 %v6006_v10 }
 0x1dc   :  { %950 = vmatprep.mubr.bf16.mxu1 %v655_v13 }
 0x1dd   :  { %951 = vmatmul.mubr.bf16.gmra.mrb[60].mxu1 %v654_v12 }
 0x1de   :  { %2593 = vmatpush1.bf16.msra.mxu1 %v6004_v14 }
 0x1df   :  { %2594 = vmatprep.subr.bf16.mxu1 %v6009_v15 }
 0x1e2   :  { %2595 = vmatpush1.bf16.msra.mxu1 %v6007_v16 }
 0x21d   :  { %v2245_v17 = vpop.f32.mrb[0].mxu0 }
 0x21e   :  { %v2247_v18 = vpop.f32.mrb[1].mxu0  ;;  %v2324_v20 = vmax.f32 %v2245_v17, 0.0 }
 0x21f   :  { %v2249_v19 = vpop.f32.mrb[2].mxu0  ;;  %v2325_v23 = vmax.f32 %v2247_v18, 0.0 }
 0x220   :  { %v2326_v21 = vmax.f32 %v2249_v19, 0.0  ;;  %v2251_v22 = vpop.f32.mrb[3].mxu0 }
 0x221   :  { %v2327_v24 = vmax.f32 %v2251_v22, 0.0 }
 0x222   :  { %v2356_v25 = vpack.c.bf16 %v2326_v21, %v2324_v20 }
 0x223   :  { %v2357_v26 = vpack.c.bf16 %v2327_v24, %v2325_v23 }
 0x225   :  { %v2255_v27 = vpop.f32.mrb[4].mxu0  ;;  %2596 = vmatprep.mubr.bf16.mxu1 %v2357_v26 }
 0x226   :  { %v2257_v28 = vpop.f32.mrb[5].mxu0  ;;  %2597 = vmatmul.mubr.bf16.vlgmr.msra.gmra.mrb[64].mxu1 %v2356_v25  ;;  %v2328_v30 = vmax.f32 %v2255_v27, 0.0 }
 0x227   :  { %v2259_v29 = vpop.f32.mrb[6].mxu0  ;;  %v2329_v33 = vmax.f32 %v2257_v28, 0.0 }
 0x228   :  { %v2330_v31 = vmax.f32 %v2259_v29, 0.0  ;;  %v2261_v32 = vpop.f32.mrb[7].mxu0 }
 0x229   :  { %v2331_v34 = vmax.f32 %v2261_v32, 0.0 }
 0x22a   :  { %v2358_v35 = vpack.c.bf16 %v2330_v31, %v2328_v30 }
 0x22b   :  { %v2359_v36 = vpack.c.bf16 %v2331_v34, %v2329_v33 }
 0x22d   :  { %v2265_v37 = vpop.f32.mrb[8].mxu0  ;;  %2606 = vmatprep.mubr.bf16.mxu1 %v2359_v36 }
 0x22e   :  { %v2267_v38 = vpop.f32.mrb[9].mxu0  ;;  %2607 = vmatmul.mubr.bf16.gmra.mrb[68].mxu1 %v2358_v35  ;;  %v2332_v40 = vmax.f32 %v2265_v37, 0.0 }
 0x22f   :  { %v2269_v39 = vpop.f32.mrb[10].mxu0  ;;  %v2333_v43 = vmax.f32 %v2267_v38, 0.0 }
 0x230   :  { %v2334_v41 = vmax.f32 %v2269_v39, 0.0  ;;  %v2271_v42 = vpop.f32.mrb[11].mxu0 }
 0x231   :  { %v2335_v44 = vmax.f32 %v2271_v42, 0.0 }
 0x232   :  { %v2360_v45 = vpack.c.bf16 %v2334_v41, %v2332_v40 }
 0x233   :  { %v2361_v46 = vpack.c.bf16 %v2335_v44, %v2333_v43 }
 0x235   :  { %v2275_v47 = vpop.f32.mrb[12].mxu0  ;;  %2616 = vmatprep.mubr.bf16.mxu1 %v2361_v46 }
 0x236   :  { %v2277_v48 = vpop.f32.mrb[13].mxu0  ;;  %2617 = vmatmul.mubr.bf16.gmra.mrb[72].mxu1 %v2360_v45  ;;  %v2336_v50 = vmax.f32 %v2275_v47, 0.0 }
 0x237   :  { %v2279_v49 = vpop.f32.mrb[14].mxu0  ;;  %v2337_v53 = vmax.f32 %v2277_v48, 0.0  ;;  %v6010_v48 = vld [vmem:[#allocation15 + $0x40] sm:$0xff]  }
 0x238   :  { %v2338_v51 = vmax.f32 %v2279_v49, 0.0  ;;  %v2281_v52 = vpop.f32.mrb[15].mxu0  ;;  %v6011_v49 = vld [vmem:[#allocation17 + $0x40] sm:$0xff]   ;;  %5318 = vmatprep.subr.bf16.mxu1 %v6010_v48 }
 0x239   :  { %v2339_v54 = vmax.f32 %v2281_v52, 0.0  ;;  %v6012_v52 = vld [vmem:[#allocation15] sm:$0xff]   ;;  %5430 = vmatprep.subr.bf16.mxu0 %v6011_v49  ;;  %v6036_v49 = vld [vmem:[#allocation17 + $0x30] sm:$0xff]  }
 0x23a   :  { %v2362_v55 = vpack.c.bf16 %v2338_v51, %v2336_v50  ;;  %5319 = vmatpush3.bf16.msra.mxu1 %v6012_v52 }
 0x23b   :  { %v2363_v56 = vpack.c.bf16 %v2339_v54, %v2337_v53  ;;  %v6013_v53 = vld [vmem:[#allocation17] sm:$0xff]  }
 0x23c   :  { %5431 = vmatpush3.bf16.msra.mxu0 %v6013_v53 }
 0x23d   :  { %v2285_v57 = vpop.f32.mrb[16].mxu0  ;;  %2626 = vmatprep.mubr.bf16.mxu1 %v2363_v56 }
 0x23e   :  { %v2287_v58 = vpop.f32.mrb[17].mxu0  ;;  %2627 = vmatmul.mubr.bf16.gmra.mrb[76].mxu1 %v2362_v55  ;;  %v2340_v60 = vmax.f32 %v2285_v57, 0.0  ;;  %v6014_v57 = vld [vmem:[#allocation15 + $0x48] sm:$0xff]  }
 0x23f   :  { %v2289_v59 = vpop.f32.mrb[18].mxu0  ;;  %v2341_v63 = vmax.f32 %v2287_v58, 0.0  ;;  %v6015_v58 = vld [vmem:[#allocation17 + $0x48] sm:$0xff]   ;;  %5320 = vmatprep.subr.bf16.mxu1 %v6014_v57  ;;  %v6040_v57 = vld [vmem:[#allocation15 + $0x38] sm:$0xff]  }
 0x240   :  { %v2342_v61 = vmax.f32 %v2289_v59, 0.0  ;;  %v2291_v62 = vpop.f32.mrb[19].mxu0  ;;  %v6016_v59 = vld [vmem:[#allocation15 + $0x8] sm:$0xff]   ;;  %5432 = vmatprep.subr.bf16.mxu0 %v6015_v58  ;;  %v6041_v58 = vld [vmem:[#allocation17 + $0x38] sm:$0xff]  }
 0x241   :  { %v2343_v0 = vmax.f32 %v2291_v62, 0.0  ;;  %5321 = vmatpush3.bf16.msra.mxu1 %v6016_v59 }
 0x242   :  { %v2364_v1 = vpack.c.bf16 %v2342_v61, %v2340_v60  ;;  %v6017_v60 = vld [vmem:[#allocation17 + $0x8] sm:$0xff]  }
 0x243   :  { %v2365_v2 = vpack.c.bf16 %v2343_v0, %v2341_v63  ;;  %5433 = vmatpush3.bf16.msra.mxu0 %v6017_v60 }
 0x245   :  { %v2295_v3 = vpop.f32.mrb[20].mxu0  ;;  %2636 = vmatprep.mubr.bf16.mxu1 %v2365_v2  ;;  %v6018_v2 = vld [vmem:[#allocation15 + $0x50] sm:$0xff]  }
 0x246   :  { %v2297_v4 = vpop.f32.mrb[21].mxu0  ;;  %2637 = vmatmul.mubr.bf16.gmra.mrb[80].mxu1 %v2364_v1  ;;  %v2344_v6 = vmax.f32 %v2295_v3, 0.0  ;;  %v6019_v3 = vld [vmem:[#allocation17 + $0x50] sm:$0xff]   ;;  %5322 = vmatprep.subr.bf16.mxu1 %v6018_v2 }
 0x247   :  { %v2299_v5 = vpop.f32.mrb[22].mxu0  ;;  %v2345_v9 = vmax.f32 %v2297_v4, 0.0  ;;  %5434 = vmatprep.subr.bf16.mxu0 %v6019_v3 }
 0x248   :  { %v2346_v7 = vmax.f32 %v2299_v5, 0.0  ;;  %v2301_v8 = vpop.f32.mrb[23].mxu0 }
 0x249   :  { %v2347_v10 = vmax.f32 %v2301_v8, 0.0 }
 0x24a   :  { %v2366_v11 = vpack.c.bf16 %v2346_v7, %v2344_v6  ;;  %v6020_v6 = vld [vmem:[#allocation15 + $0x10] sm:$0xff]  }
 0x24b   :  { %v2367_v12 = vpack.c.bf16 %v2347_v10, %v2345_v9  ;;  %v6021_v7 = vld [vmem:[#allocation17 + $0x10] sm:$0xff]   ;;  %5323 = vmatpush3.bf16.msra.mxu1 %v6020_v6 }
 0x24c   :  { %5435 = vmatpush3.bf16.msra.mxu0 %v6021_v7 }
 0x24d   :  { %v2305_v13 = vpop.f32.mrb[24].mxu0  ;;  %2646 = vmatprep.mubr.bf16.mxu1 %v2367_v12  ;;  %v6023_v12 = vld [vmem:[#allocation17 + $0x58] sm:$0xff]  }
 0x24e   :  { %v2307_v14 = vpop.f32.mrb[25].mxu0  ;;  %2647 = vmatmul.mubr.bf16.gmra.mrb[84].mxu1 %v2366_v11  ;;  %v2348_v16 = vmax.f32 %v2305_v13, 0.0  ;;  %v6022_v11 = vld [vmem:[#allocation15 + $0x58] sm:$0xff]   ;;  %5436 = vmatprep.subr.bf16.mxu0 %v6023_v12 }
 0x24f   :  { %v2309_v15 = vpop.f32.mrb[26].mxu0  ;;  %v2349_v19 = vmax.f32 %v2307_v14, 0.0  ;;  %v6024_v13 = vld [vmem:[#allocation15 + $0x18] sm:$0xff]   ;;  %5324 = vmatprep.subr.bf16.mxu1 %v6022_v11 }
 0x250   :  { %v2350_v17 = vmax.f32 %v2309_v15, 0.0  ;;  %v2311_v18 = vpop.f32.mrb[27].mxu0  ;;  %v6025_v14 = vld [vmem:[#allocation17 + $0x18] sm:$0xff]   ;;  %5325 = vmatpush3.bf16.msra.mxu1 %v6024_v13 }
 0x251   :  { %v2351_v20 = vmax.f32 %v2311_v18, 0.0  ;;  %5437 = vmatpush3.bf16.msra.mxu0 %v6025_v14 }
 0x252   :  { %v2368_v21 = vpack.c.bf16 %v2350_v17, %v2348_v16 }
 0x253   :  { %v2369_v22 = vpack.c.bf16 %v2351_v20, %v2349_v19  ;;  %v6026_v20 = vld [vmem:[#allocation15 + $0x60] sm:$0xff]  }
 0x254   :  { %5326 = vmatprep.subr.bf16.mxu1 %v6026_v20 }
 0x255   :  { %v2315_v23 = vpop.f32.mrb[28].mxu0  ;;  %2656 = vmatprep.mubr.bf16.mxu1 %v2369_v22 }
 0x256   :  { %v2317_v24 = vpop.f32.mrb[29].mxu0  ;;  %2657 = vmatmul.mubr.bf16.gmra.mrb[88].mxu1 %v2368_v21  ;;  %v2352_v26 = vmax.f32 %v2315_v23, 0.0  ;;  %v6027_v21 = vld [vmem:[#allocation17 + $0x60] sm:$0xff]  }
 0x257   :  { %v2319_v25 = vpop.f32.mrb[30].mxu0  ;;  %v2353_v29 = vmax.f32 %v2317_v24, 0.0  ;;  %v6028_v24 = vld [vmem:[#allocation15 + $0x20] sm:$0xff]   ;;  %5438 = vmatprep.subr.bf16.mxu0 %v6027_v21 }
 0x258   :  { %v2354_v27 = vmax.f32 %v2319_v25, 0.0  ;;  %v2321_v28 = vpop.f32.mrb[31].mxu0  ;;  %v6029_v25 = vld [vmem:[#allocation17 + $0x20] sm:$0xff]   ;;  %5327 = vmatpush3.bf16.msra.mxu1 %v6028_v24 }
 0x259   :  { %v2355_v30 = vmax.f32 %v2321_v28, 0.0  ;;  %5439 = vmatpush3.bf16.msra.mxu0 %v6029_v25 }
 0x25a   :  { %v2370_v31 = vpack.c.bf16 %v2354_v27, %v2352_v26 }
 0x25b   :  { %v2371_v32 = vpack.c.bf16 %v2355_v30, %v2353_v29  ;;  %v6030_v29 = vld [vmem:[#allocation15 + $0x68] sm:$0xff]  }
 0x25c   :  { %v6031_v30 = vld [vmem:[#allocation17 + $0x68] sm:$0xff]   ;;  %5328 = vmatprep.subr.bf16.mxu1 %v6030_v29 }
 0x25d   :  { %2666 = vmatprep.mubr.bf16.mxu1 %v2371_v32  ;;  %v6033_v32 = vld [vmem:[#allocation17 + $0x28] sm:$0xff]   ;;  %5440 = vmatprep.subr.bf16.mxu0 %v6031_v30 }
 0x25e   :  { %2667 = vmatmul.mubr.bf16.gmra.mrb[92].mxu1 %v2370_v31  ;;  %v6032_v31 = vld [vmem:[#allocation15 + $0x28] sm:$0xff]   ;;  %5441 = vmatpush3.bf16.msra.mxu0 %v6033_v32 }
 0x25f   :  { %5329 = vmatpush3.bf16.msra.mxu1 %v6032_v31 }
 0x278   :  { %v7014_v33 = vpop.f32.mrb[32].mxu1 }
 0x279   :  { %v961_v34 = vmul.f32 %v7014_v33, %v7014_v33  ;;  %v7018_v35 = vpop.f32.mrb[33].mxu1 }
 0x27a   :  { %v962_v36 = vmul.f32 %v7018_v35, %v7018_v35  ;;  %v7022_v37 = vpop.f32.mrb[34].mxu1 }
 0x27b   :  { %v963_v38 = vmul.f32 %v7022_v37, %v7022_v37  ;;  %v7026_v39 = vpop.f32.mrb[35].mxu1 }
 0x27c   :  { %v964_v40 = vmul.f32 %v7026_v39, %v7026_v39  ;;  %v993_v41 = vadd.f32 %v962_v36, %v961_v34 }
 0x27e   :  { %994 = vadd.xlane.f32.xlu0 %v993_v41  ;;  %v996_v42 = vadd.f32 %v964_v40, %v963_v38 }
 0x280   :  { %v7030_v43 = vpop.f32.mrb[36].mxu1 }
 0x281   :  { %v965_v44 = vmul.f32 %v7030_v43, %v7030_v43  ;;  %v7034_v45 = vpop.f32.mrb[37].mxu1 }
 0x282   :  { %v966_v46 = vmul.f32 %v7034_v45, %v7034_v45  ;;  %997 = vadd.xlane.f32.xlu0 %v996_v42  ;;  %v7038_v47 = vpop.f32.mrb[38].mxu1  ;;  %v6034_v42 = vld [vmem:[#allocation15 + $0x70] sm:$0xff]  }
 0x283   :  { %v967_v50 = vmul.f32 %v7038_v47, %v7038_v47  ;;  %v7042_v51 = vpop.f32.mrb[39].mxu1  ;;  %5330 = vmatprep.subr.bf16.mxu1 %v6034_v42 }
 0x284   :  { %v968_v54 = vmul.f32 %v7042_v51, %v7042_v51  ;;  %v999_v55 = vadd.f32 %v966_v46, %v965_v44  ;;  %v6035_v44 = vld [vmem:[#allocation17 + $0x70] sm:$0xff]  }
 0x285   :  { %5442 = vmatprep.subr.bf16.mxu0 %v6035_v44 }
 0x286   :  { %1000 = vadd.xlane.f32.xlu1 %v999_v55  ;;  %v1002_v56 = vadd.f32 %v968_v54, %v967_v50  ;;  %v6037_v50 = vld [vmem:[#allocation15 + $0x30] sm:$0xff]   ;;  %5443 = vmatpush3.bf16.msra.mxu0 %v6036_v49  ;;  %v6038_v55 = vld [vmem:[#allocation15 + $0x78] sm:$0xff]  }
 0x287   :  { %5331 = vmatpush3.bf16.msra.mxu1 %v6037_v50 }
 0x288   :  { %v7046_v61 = vpop.f32.mrb[40].mxu1  ;;  %5332 = vmatprep.subr.bf16.mxu1 %v6038_v55 }
 0x289   :  { %v969_v62 = vmul.f32 %v7046_v61, %v7046_v61  ;;  %v7050_v63 = vpop.f32.mrb[41].mxu1 }
 0x28a   :  { %v970_v0 = vmul.f32 %v7050_v63, %v7050_v63  ;;  %1003 = vadd.xlane.f32.xlu1 %v1002_v56  ;;  %v7054_v1 = vpop.f32.mrb[42].mxu1  ;;  %v6039_v56 = vld [vmem:[#allocation17 + $0x78] sm:$0xff]  }
 0x28b   :  { %v971_v4 = vmul.f32 %v7054_v1, %v7054_v1  ;;  %v7058_v5 = vpop.f32.mrb[43].mxu1  ;;  %5444 = vmatprep.subr.bf16.mxu0 %v6039_v56  ;;  %5333 = vmatpush3.bf16.msra.mxu1 %v6040_v57 }
 0x28c   :  { %v972_v8 = vmul.f32 %v7058_v5, %v7058_v5  ;;  %v1005_v9 = vadd.f32 %v970_v0, %v969_v62  ;;  %5445 = vmatpush3.bf16.msra.mxu0 %v6041_v58 }
 0x28e   :  { %1006 = vadd.xlane.f32.xlu0 %v1005_v9  ;;  %v1008_v10 = vadd.f32 %v972_v8, %v971_v4 }
 0x290   :  { %1009 = vadd.xlane.f32.xlu1 %v1008_v10  ;;  %v7062_v15 = vpop.f32.mrb[44].mxu1 }
 0x291   :  { %v973_v16 = vmul.f32 %v7062_v15, %v7062_v15  ;;  %v7066_v17 = vpop.f32.mrb[45].mxu1 }
 0x292   :  { %v974_v18 = vmul.f32 %v7066_v17, %v7066_v17  ;;  %v7070_v19 = vpop.f32.mrb[46].mxu1 }
 0x293   :  { %v975_v22 = vmul.f32 %v7070_v19, %v7070_v19  ;;  %v7074_v23 = vpop.f32.mrb[47].mxu1 }
 0x294   :  { %v976_v26 = vmul.f32 %v7074_v23, %v7074_v23  ;;  %v1011_v27 = vadd.f32 %v974_v18, %v973_v16 }
 0x296   :  { %1012 = vadd.xlane.f32.xlu0 %v1011_v27  ;;  %v1014_v28 = vadd.f32 %v976_v26, %v975_v22 }
 0x298   :  { %1015 = vadd.xlane.f32.xlu1 %v1014_v28  ;;  %v7078_v34 = vpop.f32.mrb[48].mxu1 }
 0x299   :  { %v977_v36 = vmul.f32 %v7078_v34, %v7078_v34  ;;  %v7082_v38 = vpop.f32.mrb[49].mxu1 }
 0x29a   :  { %v978_v40 = vmul.f32 %v7082_v38, %v7082_v38  ;;  %v7086_v41 = vpop.f32.mrb[50].mxu1 }
 0x29b   :  { %v979_v46 = vmul.f32 %v7086_v41, %v7086_v41  ;;  %v7090_v48 = vpop.f32.mrb[51].mxu1 }
 0x29c   :  { %v980_v52 = vmul.f32 %v7090_v48, %v7090_v48  ;;  %v1017_v53 = vadd.f32 %v978_v40, %v977_v36 }
 0x29e   :  { %1018 = vadd.xlane.f32.xlu0 %v1017_v53  ;;  %v1020_v54 = vadd.f32 %v980_v52, %v979_v46 }
 0x2a0   :  { %1021 = vadd.xlane.f32.xlu1 %v1020_v54  ;;  %v7094_v59 = vpop.f32.mrb[52].mxu1 }
 0x2a1   :  { %v981_v60 = vmul.f32 %v7094_v59, %v7094_v59  ;;  %v7098_v62 = vpop.f32.mrb[53].mxu1 }
 0x2a2   :  { %v982_v0 = vmul.f32 %v7098_v62, %v7098_v62  ;;  %v7102_v2 = vpop.f32.mrb[54].mxu1 }
 0x2a3   :  { %v983_v3 = vmul.f32 %v7102_v2, %v7102_v2  ;;  %v7106_v4 = vpop.f32.mrb[55].mxu1 }
 0x2a4   :  { %v984_v6 = vmul.f32 %v7106_v4, %v7106_v4  ;;  %v1023_v7 = vadd.f32 %v982_v0, %v981_v60 }
 0x2a6   :  { %1024 = vadd.xlane.f32.xlu0 %v1023_v7  ;;  %v1026_v8 = vadd.f32 %v984_v6, %v983_v3 }
 0x2a8   :  { %1027 = vadd.xlane.f32.xlu1 %v1026_v8  ;;  %v7110_v9 = vpop.f32.mrb[56].mxu1 }
 0x2a9   :  { %v985_v10 = vmul.f32 %v7110_v9, %v7110_v9  ;;  %v7114_v11 = vpop.f32.mrb[57].mxu1 }
 0x2aa   :  { %v986_v12 = vmul.f32 %v7114_v11, %v7114_v11  ;;  %v7118_v13 = vpop.f32.mrb[58].mxu1 }
 0x2ab   :  { %v987_v14 = vmul.f32 %v7118_v13, %v7118_v13  ;;  %v7122_v16 = vpop.f32.mrb[59].mxu1 }
 0x2ac   :  { %v988_v18 = vmul.f32 %v7122_v16, %v7122_v16  ;;  %v1029_v20 = vadd.f32 %v986_v12, %v985_v10 }
 0x2ae   :  { %1030 = vadd.xlane.f32.xlu0 %v1029_v20  ;;  %v1032_v21 = vadd.f32 %v988_v18, %v987_v14 }
 0x2b0   :  { %1033 = vadd.xlane.f32.xlu1 %v1032_v21  ;;  %v7126_v22 = vpop.f32.mrb[60].mxu1 }
 0x2b1   :  { %v989_v24 = vmul.f32 %v7126_v22, %v7126_v22  ;;  %v7130_v25 = vpop.f32.mrb[61].mxu1 }
 0x2b2   :  { %v990_v26 = vmul.f32 %v7130_v25, %v7130_v25  ;;  %v7134_v27 = vpop.f32.mrb[62].mxu1 }
 0x2b3   :  { %v991_v28 = vmul.f32 %v7134_v27, %v7134_v27  ;;  %v7138_v29 = vpop.f32.mrb[63].mxu1 }
 0x2b4   :  { %v992_v30 = vmul.f32 %v7138_v29, %v7138_v29  ;;  %v1035_v31 = vadd.f32 %v990_v26, %v989_v24 }
 0x2b6   :  { %1036 = vadd.xlane.f32.xlu0 %v1035_v31  ;;  %v1038_v32 = vadd.f32 %v992_v30, %v991_v28 }
 0x2b8   :  { %1039 = vadd.xlane.f32.xlu1 %v1038_v32 }
 0x2f9   :  { %v7142_v36 = vpop.f32.mrb[64].mxu1 }
 0x2fa   :  { %v2677_v40 = vmul.f32 %v7142_v36, %v7142_v36  ;;  %v7146_v42 = vpop.f32.mrb[65].mxu1 }
 0x2fb   :  { %v2678_v44 = vmul.f32 %v7146_v42, %v7146_v42  ;;  %v7150_v46 = vpop.f32.mrb[66].mxu1 }
 0x2fc   :  { %v2679_v49 = vmul.f32 %v7150_v46, %v7150_v46  ;;  %v7154_v50 = vpop.f32.mrb[67].mxu1 }
 0x2fd   :  { %v2680_v52 = vmul.f32 %v7154_v50, %v7154_v50  ;;  %v2709_v53 = vadd.f32 %v2678_v44, %v2677_v40 }
 0x2ff   :  { %2710 = vadd.xlane.f32.xlu0 %v2709_v53  ;;  %v2712_v54 = vadd.f32 %v2680_v52, %v2679_v49 }
 0x301   :  { %v7158_v55 = vpop.f32.mrb[68].mxu1  ;;  %2713 = vadd.xlane.f32.xlu1 %v2712_v54 }
 0x302   :  { %v2681_v56 = vmul.f32 %v7158_v55, %v7158_v55  ;;  %v7162_v57 = vpop.f32.mrb[69].mxu1 }
 0x303   :  { %v2682_v58 = vmul.f32 %v7162_v57, %v7162_v57  ;;  %v7166_v60 = vpop.f32.mrb[70].mxu1 }
 0x304   :  { %v2683_v0 = vmul.f32 %v7166_v60, %v7166_v60  ;;  %v7170_v3 = vpop.f32.mrb[71].mxu1 }
 0x305   :  { %v2684_v6 = vmul.f32 %v7170_v3, %v7170_v3  ;;  %v2715_v7 = vadd.f32 %v2682_v58, %v2681_v56 }
 0x307   :  { %2716 = vadd.xlane.f32.xlu0 %v2715_v7  ;;  %v2718_v8 = vadd.f32 %v2684_v6, %v2683_v0 }
 0x309   :  { %v7174_v10 = vpop.f32.mrb[72].mxu1  ;;  %2719 = vadd.xlane.f32.xlu1 %v2718_v8 }
 0x30a   :  { %v2685_v12 = vmul.f32 %v7174_v10, %v7174_v10  ;;  %v7178_v14 = vpop.f32.mrb[73].mxu1 }
 0x30b   :  { %v2686_v18 = vmul.f32 %v7178_v14, %v7178_v14  ;;  %v7182_v20 = vpop.f32.mrb[74].mxu1  ;;  %v995_v24 = vpop.xlane.xlu0 %994 }
 0x30c   :  { %v2687_v21 = vmul.f32 %v7182_v20, %v7182_v20  ;;  %v7186_v26 = vpop.f32.mrb[75].mxu1  ;;  %v1041_v28 = vadd.f32 1e-24, %v995_v24 }
 0x30d   :  { %v2688_v30 = vmul.f32 %v7186_v26, %v7186_v26  ;;  %v2721_v31 = vadd.f32 %v2686_v18, %v2685_v12 }
 0x30e   :  { %6042 = vrsqrt.f32 %v1041_v28 }
 0x30f   :  { %2722 = vadd.xlane.f32.xlu0 %v2721_v31  ;;  %v2724_v32 = vadd.f32 %v2688_v30, %v2687_v21  ;;  %v998_v40 = vpop.xlane.xlu0 %997 }
 0x310   :  { %v1042_v44 = vadd.f32 1e-24, %v998_v40 }
 0x311   :  { %v7190_v49 = vpop.f32.mrb[76].mxu1  ;;  %2725 = vadd.xlane.f32.xlu1 %v2724_v32 }
 0x312   :  { %8832 = vst [vmem:[#allocation27_spill] sm:$0xff] %v7190_v49  ;;  %v2689_v52 = vmul.f32 %v7190_v49, %v7190_v49  ;;  %v7194_v53 = vpop.f32.mrb[77].mxu1  ;;  %6044 = vrsqrt.f32 %v1042_v44 }
 0x313   :  { %v2690_v54 = vmul.f32 %v7194_v53, %v7194_v53  ;;  %v7198_v56 = vpop.f32.mrb[78].mxu1  ;;  %v1001_v0 = vpop.xlane.xlu1 %1000 }
 0x314   :  { %8833 = vst [vmem:[#allocation28_spill] sm:$0xff] %v7198_v56  ;;  %v2691_v58 = vmul.f32 %v7198_v56, %v7198_v56  ;;  %v7202_v6 = vpop.f32.mrb[79].mxu1  ;;  %v1043_v7 = vadd.f32 1e-24, %v1001_v0 }
 0x315   :  { %8834 = vst [vmem:[#allocation29_spill] sm:$0xff] %v7202_v6  ;;  %v2692_v8 = vmul.f32 %v7202_v6, %v7202_v6  ;;  %v2727_v12 = vadd.f32 %v2690_v54, %v2689_v52 }
 0x316   :  { %6046 = vrsqrt.f32 %v1043_v7 }
 0x317   :  { %2728 = vadd.xlane.f32.xlu0 %v2727_v12  ;;  %v2730_v18 = vadd.f32 %v2692_v8, %v2691_v58  ;;  %v1004_v21 = vpop.xlane.xlu1 %1003 }
 0x318   :  { %v6043_v24 = vpop.eup %6042  ;;  %v1044_v28 = vadd.f32 1e-24, %v1004_v21 }
 0x319   :  { %v7206_v30 = vpop.f32.mrb[80].mxu1  ;;  %2731 = vadd.xlane.f32.xlu1 %v2730_v18  ;;  %v1073_v52 = vmul.f32 10.0, %v6043_v24 }
 0x31a   :  { %8835 = vst [vmem:[#allocation30_spill] sm:$0xff] %v7206_v30  ;;  %v2693_v31 = vmul.f32 %v7206_v30, %v7206_v30  ;;  %v7210_v32 = vpop.f32.mrb[81].mxu1  ;;  %6048 = vrsqrt.f32 %v1044_v28 }
 0x31b   :  { %8836 = vst [vmem:[#allocation31_spill] sm:$0xff] %v7210_v32  ;;  %v2694_v40 = vmul.f32 %v7210_v32, %v7210_v32  ;;  %v7214_v44 = vpop.f32.mrb[82].mxu1  ;;  %v1007_v58 = vpop.xlane.xlu0 %1006  ;;  %v1089_v24 = vmul.f32 %v1073_v52, %v7014_v33 }
 0x31c   :  { %8837 = vst [vmem:[#allocation32_spill] sm:$0xff] %v7214_v44  ;;  %v2695_v54 = vmul.f32 %v7214_v44, %v7214_v44  ;;  %v7218_v0 = vpop.f32.mrb[83].mxu1  ;;  %v6045_v7 = vpop.eup %6044  ;;  %v1045_v8 = vadd.f32 1e-24, %v1007_v58  ;;  %v1090_v44 = vmul.f32 %v1073_v52, %v7018_v35 }
 0x31d   :  { %v2696_v12 = vmul.f32 %v7218_v0, %v7218_v0  ;;  %v2733_v18 = vadd.f32 %v2694_v40, %v2693_v31  ;;  %v1074_v21 = vmul.f32 10.0, %v6045_v7  ;;  %v1010_v28 = vpop.xlane.xlu1 %1009 }
 0x31e   :  { %6050 = vrsqrt.f32 %v1045_v8  ;;  %v1046_v30 = vadd.f32 1e-24, %v1010_v28 }
 0x31f   :  { %2734 = vadd.xlane.f32.xlu0 %v2733_v18  ;;  %v2736_v32 = vadd.f32 %v2696_v12, %v2695_v54  ;;  %v1091_v56 = vmul.f32 %v1074_v21, %v7022_v37  ;;  %v1092_v49 = vmul.f32 %v1074_v21, %v7026_v39 }
 0x320   :  { %v6047_v6 = vpop.eup %6046  ;;  %6052 = vrsqrt.f32 %v1046_v30 }
 0x321   :  { %v7226_v58 = vpop.f32.mrb[84].mxu1  ;;  %2737 = vadd.xlane.f32.xlu1 %v2736_v32  ;;  %v2837_v31 = vpack.c.bf16 %v1091_v56, %v1089_v24  ;;  %v2838_v54 = vpack.c.bf16 %v1092_v49, %v1090_v44  ;;  %v1075_v35 = vmul.f32 10.0, %v6047_v6 }
 0x322   :  { %v2697_v40 = vmul.f32 %v7226_v58, %v7226_v58  ;;  %v7230_v7 = vpop.f32.mrb[85].mxu1 }
 0x323   :  { %v2698_v33 = vmul.f32 %v7230_v7, %v7230_v7  ;;  %v7234_v37 = vpop.f32.mrb[86].mxu1  ;;  %4092 = vmatprep.mubr.bf16.mxu0 %v2838_v54  ;;  %v1013_v30 = vpop.xlane.xlu0 %1012  ;;  %3046 = vmatprep.mubr.bf16.mxu1 %v2838_v54  ;;  %v1094_v21 = vmul.f32 %v1075_v35, %v7034_v45  ;;  %v1093_v24 = vmul.f32 %v1075_v35, %v7030_v43 }
 0x324   :  { %8838 = vst [vmem:[#allocation33_spill] sm:$0xff] %v7234_v37  ;;  %v2699_v39 = vmul.f32 %v7234_v37, %v7234_v37  ;;  %v7238_v52 = vpop.f32.mrb[87].mxu1  ;;  %v6049_v56 = vpop.eup %6048  ;;  %v1047_v32 = vadd.f32 1e-24, %v1013_v30  ;;  %3047 = vmatmul.mubr.bf16.vlgmr.msra.gmra.mrb[96].mxu1 %v2837_v31  ;;  %4093 = vmatmul.mubr.bf16.vlgmr.msra.gmra.mrb[32].mxu0 %v2837_v31 }
 0x325   :  { %v2700_v8 = vmul.f32 %v7238_v52, %v7238_v52  ;;  %v2739_v49 = vadd.f32 %v2698_v33, %v2697_v40  ;;  %v1076_v44 = vmul.f32 10.0, %v6049_v56  ;;  %v1016_v12 = vpop.xlane.xlu1 %1015 }
 0x326   :  { %6054 = vrsqrt.f32 %v1047_v32  ;;  %v1048_v6 = vadd.f32 1e-24, %v1016_v12 }
 0x327   :  { %2740 = vadd.xlane.f32.xlu0 %v2739_v49  ;;  %v2742_v18 = vadd.f32 %v2700_v8, %v2699_v39  ;;  %v1096_v28 = vmul.f32 %v1076_v44, %v7042_v51  ;;  %v1095_v54 = vmul.f32 %v1076_v44, %v7038_v47 }
 0x328   :  { %v6051_v30 = vpop.eup %6050  ;;  %6056 = vrsqrt.f32 %v1048_v6 }
 0x329   :  { %v7246_v37 = vpop.f32.mrb[88].mxu1  ;;  %2743 = vadd.xlane.f32.xlu1 %v2742_v18  ;;  %v1077_v31 = vmul.f32 10.0, %v6051_v30  ;;  %v2840_v39 = vpack.c.bf16 %v1096_v28, %v1094_v21  ;;  %v2839_v56 = vpack.c.bf16 %v1095_v54, %v1093_v24 }
 0x32a   :  { %v2701_v40 = vmul.f32 %v7246_v37, %v7246_v37  ;;  %v7250_v33 = vpop.f32.mrb[89].mxu1  ;;  %v6053_v45 = vpop.eup %6052 }
 0x32b   :  { %v2702_v51 = vmul.f32 %v7250_v33, %v7250_v33  ;;  %v7254_v43 = vpop.f32.mrb[90].mxu1  ;;  %v1078_v47 = vmul.f32 10.0, %v6053_v45  ;;  %4100 = vmatprep.mubr.bf16.mxu0 %v2840_v39  ;;  %v1019_v32 = vpop.xlane.xlu0 %1018  ;;  %3054 = vmatprep.mubr.bf16.mxu1 %v2840_v39  ;;  %v1098_v18 = vmul.f32 %v1077_v31, %v7050_v63  ;;  %v1097_v28 = vmul.f32 %v1077_v31, %v7046_v61 }
 0x32c   :  { %8839 = vst [vmem:[#allocation34_spill] sm:$0xff] %v7254_v43  ;;  %v2703_v35 = vmul.f32 %v7254_v43, %v7254_v43  ;;  %v7258_v8 = vpop.f32.mrb[91].mxu1  ;;  %v1049_v49 = vadd.f32 1e-24, %v1019_v32  ;;  %3055 = vmatmul.mubr.bf16.gmra.mrb[100].mxu1 %v2839_v56  ;;  %4101 = vmatmul.mubr.bf16.gmra.mrb[36].mxu0 %v2839_v56 }
 0x32d   :  { %v2704_v44 = vmul.f32 %v7258_v8, %v7258_v8  ;;  %v2745_v12 = vadd.f32 %v2702_v51, %v2701_v40  ;;  %v1022_v6 = vpop.xlane.xlu1 %1021  ;;  %v1100_v21 = vmul.f32 %v1078_v47, %v7058_v5  ;;  %v1099_v24 = vmul.f32 %v1078_v47, %v7054_v1 }
 0x32e   :  { %6058 = vrsqrt.f32 %v1049_v49  ;;  %v1050_v54 = vadd.f32 1e-24, %v1022_v6 }
 0x32f   :  { %2746 = vadd.xlane.f32.xlu0 %v2745_v12  ;;  %v2748_v30 = vadd.f32 %v2704_v44, %v2703_v35  ;;  %v2842_v39 = vpack.c.bf16 %v1100_v21, %v1098_v18  ;;  %v2841_v45 = vpack.c.bf16 %v1099_v24, %v1097_v28 }
 0x330   :  { %v6055_v32 = vpop.eup %6054  ;;  %6060 = vrsqrt.f32 %v1050_v54 }
 0x331   :  { %v7266_v43 = vpop.f32.mrb[92].mxu1  ;;  %2749 = vadd.xlane.f32.xlu1 %v2748_v30  ;;  %v1079_v40 = vmul.f32 10.0, %v6055_v32  ;;  %3062 = vmatprep.mubr.bf16.mxu1 %v2842_v39 }
 0x332   :  { %v2705_v63 = vmul.f32 %v7266_v43, %v7266_v43  ;;  %v7270_v5 = vpop.f32.mrb[93].mxu1  ;;  %4108 = vmatprep.mubr.bf16.mxu0 %v2842_v39  ;;  %v6057_v61 = vpop.eup %6056 }
 0x333   :  { %v2706_v1 = vmul.f32 %v7270_v5, %v7270_v5  ;;  %v7274_v31 = vpop.f32.mrb[94].mxu1  ;;  %v1080_v56 = vmul.f32 10.0, %v6057_v61  ;;  %v1025_v47 = vpop.xlane.xlu0 %1024  ;;  %v1102_v18 = vmul.f32 %v1079_v40, %v7066_v17  ;;  %v1101_v28 = vmul.f32 %v1079_v40, %v7062_v15 }
 0x334   :  { %v2707_v51 = vmul.f32 %v7274_v31, %v7274_v31  ;;  %v7278_v35 = vpop.f32.mrb[95].mxu1  ;;  %v1051_v49 = vadd.f32 1e-24, %v1025_v47  ;;  %3063 = vmatmul.mubr.bf16.gmra.mrb[104].mxu1 %v2841_v45  ;;  %4109 = vmatmul.mubr.bf16.gmra.mrb[40].mxu0 %v2841_v45 }
 0x335   :  { %v2708_v44 = vmul.f32 %v7278_v35, %v7278_v35  ;;  %v2751_v12 = vadd.f32 %v2706_v1, %v2705_v63  ;;  %v1028_v6 = vpop.xlane.xlu1 %1027  ;;  %v1104_v21 = vmul.f32 %v1080_v56, %v7074_v23  ;;  %v1103_v24 = vmul.f32 %v1080_v56, %v7070_v19 }
 0x336   :  { %6062 = vrsqrt.f32 %v1051_v49  ;;  %v1052_v54 = vadd.f32 1e-24, %v1028_v6 }
 0x337   :  { %2752 = vadd.xlane.f32.xlu0 %v2751_v12  ;;  %v2754_v30 = vadd.f32 %v2708_v44, %v2707_v51  ;;  %v2844_v39 = vpack.c.bf16 %v1104_v21, %v1102_v18  ;;  %v2843_v32 = vpack.c.bf16 %v1103_v24, %v1101_v28 }
 0x338   :  { %v6059_v61 = vpop.eup %6058  ;;  %6064 = vrsqrt.f32 %v1052_v54 }
 0x339   :  { %2755 = vadd.xlane.f32.xlu1 %v2754_v30  ;;  %v1081_v45 = vmul.f32 10.0, %v6059_v61  ;;  %3070 = vmatprep.mubr.bf16.mxu1 %v2844_v39 }
 0x33a   :  { %4116 = vmatprep.mubr.bf16.mxu0 %v2844_v39  ;;  %v6061_v63 = vpop.eup %6060 }
 0x33b   :  { %v1082_v17 = vmul.f32 10.0, %v6061_v63  ;;  %v1031_v1 = vpop.xlane.xlu0 %1030  ;;  %v1106_v19 = vmul.f32 %v1081_v45, %v7082_v38  ;;  %v1105_v56 = vmul.f32 %v1081_v45, %v7078_v34 }
 0x33c   :  { %v1053_v23 = vadd.f32 1e-24, %v1031_v1  ;;  %3071 = vmatmul.mubr.bf16.gmra.mrb[108].mxu1 %v2843_v32  ;;  %4117 = vmatmul.mubr.bf16.gmra.mrb[44].mxu0 %v2843_v32 }
 0x33d   :  { %v1034_v15 = vpop.xlane.xlu1 %1033  ;;  %v1108_v40 = vmul.f32 %v1082_v17, %v7090_v48  ;;  %v1107_v51 = vmul.f32 %v1082_v17, %v7086_v41 }
 0x33e   :  { %6066 = vrsqrt.f32 %v1053_v23  ;;  %v1054_v47 = vadd.f32 1e-24, %v1034_v15 }
 0x33f   :  { %v2846_v49 = vpack.c.bf16 %v1108_v40, %v1106_v19  ;;  %v2845_v44 = vpack.c.bf16 %v1107_v51, %v1105_v56 }
 0x340   :  { %v6063_v12 = vpop.eup %6062  ;;  %6068 = vrsqrt.f32 %v1054_v47 }
 0x341   :  { %v1083_v6 = vmul.f32 10.0, %v6063_v12  ;;  %3078 = vmatprep.mubr.bf16.mxu1 %v2846_v49  ;;  %4124 = vmatprep.mubr.bf16.mxu0 %v2846_v49 }
 0x342   :  { %v6065_v18 = vpop.eup %6064 }
 0x343   :  { %v1084_v21 = vmul.f32 10.0, %v6065_v18  ;;  %v1037_v28 = vpop.xlane.xlu0 %1036  ;;  %v1110_v34 = vmul.f32 %v1083_v6, %v7098_v62  ;;  %v1109_v48 = vmul.f32 %v1083_v6, %v7094_v59 }
 0x344   :  { %v1055_v24 = vadd.f32 1e-24, %v1037_v28  ;;  %3079 = vmatmul.mubr.bf16.gmra.mrb[112].mxu1 %v2845_v44  ;;  %4125 = vmatmul.mubr.bf16.gmra.mrb[48].mxu0 %v2845_v44 }
 0x345   :  { %v1040_v38 = vpop.xlane.xlu1 %1039  ;;  %v1112_v41 = vmul.f32 %v1084_v21, %v7106_v4  ;;  %v1111_v54 = vmul.f32 %v1084_v21, %v7102_v2 }
 0x346   :  { %6070 = vrsqrt.f32 %v1055_v24  ;;  %v1056_v30 = vadd.f32 1e-24, %v1040_v38 }
 0x347   :  { %v2848_v39 = vpack.c.bf16 %v1112_v41, %v1110_v34  ;;  %v2847_v32 = vpack.c.bf16 %v1111_v54, %v1109_v48 }
 0x348   :  { %v6067_v61 = vpop.eup %6066  ;;  %6072 = vrsqrt.f32 %v1056_v30 }
 0x349   :  { %v1085_v45 = vmul.f32 10.0, %v6067_v61  ;;  %3086 = vmatprep.mubr.bf16.mxu1 %v2848_v39  ;;  %4132 = vmatprep.mubr.bf16.mxu0 %v2848_v39 }
 0x34a   :  { %v6069_v63 = vpop.eup %6068 }
 0x34b   :  { %v1086_v17 = vmul.f32 10.0, %v6069_v63  ;;  %v1114_v62 = vmul.f32 %v1085_v45, %v7114_v11  ;;  %v1113_v59 = vmul.f32 %v1085_v45, %v7110_v9 }
 0x34c   :  { %3087 = vmatmul.mubr.bf16.gmra.mrb[116].mxu1 %v2847_v32  ;;  %4133 = vmatmul.mubr.bf16.gmra.mrb[52].mxu0 %v2847_v32 }
 0x34d   :  { %v1116_v4 = vmul.f32 %v1086_v17, %v7122_v16  ;;  %v1115_v2 = vmul.f32 %v1086_v17, %v7118_v13 }
 0x34f   :  { %v2850_v1 = vpack.c.bf16 %v1116_v4, %v1114_v62  ;;  %v2849_v23 = vpack.c.bf16 %v1115_v2, %v1113_v59 }
 0x350   :  { %v6071_v15 = vpop.eup %6070 }
 0x351   :  { %v1087_v19 = vmul.f32 10.0, %v6071_v15  ;;  %3094 = vmatprep.mubr.bf16.mxu1 %v2850_v1  ;;  %4140 = vmatprep.mubr.bf16.mxu0 %v2850_v1 }
 0x352   :  { %v6073_v40 = vpop.eup %6072 }
 0x353   :  { %v1088_v56 = vmul.f32 10.0, %v6073_v40  ;;  %v1118_v51 = vmul.f32 %v1087_v19, %v7130_v25  ;;  %v1117_v16 = vmul.f32 %v1087_v19, %v7126_v22 }
 0x354   :  { %3095 = vmatmul.mubr.bf16.gmra.mrb[120].mxu1 %v2849_v23  ;;  %4141 = vmatmul.mubr.bf16.gmra.mrb[56].mxu0 %v2849_v23 }
 0x355   :  { %v1120_v11 = vmul.f32 %v1088_v56, %v7138_v29  ;;  %v1119_v9 = vmul.f32 %v1088_v56, %v7134_v27 }
 0x357   :  { %v2852_v47 = vpack.c.bf16 %v1120_v11, %v1118_v51  ;;  %v2851_v13 = vpack.c.bf16 %v1119_v9, %v1117_v16 }
 0x359   :  { %3102 = vmatprep.mubr.bf16.mxu1 %v2852_v47  ;;  %4148 = vmatprep.mubr.bf16.mxu0 %v2852_v47 }
 0x35c   :  { %3103 = vmatmul.mubr.bf16.gmra.mrb[124].mxu1 %v2851_v13  ;;  %4149 = vmatmul.mubr.bf16.gmra.mrb[60].mxu0 %v2851_v13 }
 0x38c   :  { %v2711_v49 = vpop.xlane.xlu0 %2710 }
 0x38d   :  { %v2757_v44 = vadd.f32 1e-24, %v2711_v49 }
 0x38e   :  { %v2714_v12 = vpop.xlane.xlu1 %2713 }
 0x38f   :  { %6074 = vrsqrt.f32 %v2757_v44  ;;  %v2758_v6 = vadd.f32 1e-24, %v2714_v12 }
 0x391   :  { %6076 = vrsqrt.f32 %v2758_v6 }
 0x394   :  { %v2717_v18 = vpop.xlane.xlu0 %2716 }
 0x395   :  { %v2759_v25 = vadd.f32 1e-24, %v2717_v18 }
 0x396   :  { %v2720_v21 = vpop.xlane.xlu1 %2719 }
 0x397   :  { %6078 = vrsqrt.f32 %v2759_v25  ;;  %v2760_v29 = vadd.f32 1e-24, %v2720_v21 }
 0x399   :  { %v6075_v22 = vpop.eup %6074  ;;  %6080 = vrsqrt.f32 %v2760_v29  ;;  %v8840_v29 = vld [vmem:[#allocation29_spill] sm:$0xff] }
 0x39a   :  { %v2789_v27 = vmul.f32 10.0, %v6075_v22  ;;  %v8841_v22 = vld [vmem:[#allocation27_spill] sm:$0xff] }
 0x39b   :  { %v6077_v28 = vpop.eup %6076 }
 0x39c   :  { %v2790_v24 = vmul.f32 10.0, %v6077_v28  ;;  %v2723_v38 = vpop.xlane.xlu0 %2722  ;;  %v2806_v48 = vmul.f32 %v2789_v27, %v7146_v42  ;;  %v2805_v30 = vmul.f32 %v2789_v27, %v7142_v36  ;;  %v8842_v28 = vld [vmem:[#allocation28_spill] sm:$0xff] }
 0x39d   :  { %v2761_v34 = vadd.f32 1e-24, %v2723_v38 }
 0x39e   :  { %v2726_v41 = vpop.xlane.xlu1 %2725  ;;  %v2808_v54 = vmul.f32 %v2790_v24, %v7154_v50  ;;  %v2807_v39 = vmul.f32 %v2790_v24, %v7150_v46 }
 0x39f   :  { %6082 = vrsqrt.f32 %v2761_v34  ;;  %v2762_v32 = vadd.f32 1e-24, %v2726_v41 }
 0x3a0   :  { %v2854_v61 = vpack.c.bf16 %v2808_v54, %v2806_v48  ;;  %v2853_v45 = vpack.c.bf16 %v2807_v39, %v2805_v30 }
 0x3a1   :  { %v6079_v63 = vpop.eup %6078  ;;  %6084 = vrsqrt.f32 %v2762_v32 }
 0x3a2   :  { %v2791_v17 = vmul.f32 10.0, %v6079_v63  ;;  %3110 = vmatprep.mubr.bf16.mxu1 %v2854_v61  ;;  %4156 = vmatprep.mubr.bf16.mxu0 %v2854_v61 }
 0x3a3   :  { %v6081_v62 = vpop.eup %6080  ;;  %3111 = vmatmul.mubr.bf16.gmra.mrb[128].mxu1 %v2853_v45  ;;  %4157 = vmatmul.mubr.bf16.gmra.mrb[64].mxu0 %v2853_v45  ;;  %v8843_v45 = vld [vmem:[#allocation31_spill] sm:$0xff] }
 0x3a4   :  { %v2792_v4 = vmul.f32 10.0, %v6081_v62  ;;  %v2729_v42 = vpop.xlane.xlu0 %2728  ;;  %v2810_v36 = vmul.f32 %v2791_v17, %v7162_v57  ;;  %v2809_v2 = vmul.f32 %v2791_v17, %v7158_v55  ;;  %v8844_v62 = vld [vmem:[#allocation30_spill] sm:$0xff] }
 0x3a5   :  { %v2763_v59 = vadd.f32 1e-24, %v2729_v42  ;;  %v8845_v42 = vld [vmem:[#allocation32_spill] sm:$0xff] }
 0x3a6   :  { %v2732_v50 = vpop.xlane.xlu1 %2731  ;;  %v2812_v46 = vmul.f32 %v2792_v4, %v7170_v3  ;;  %v2811_v1 = vmul.f32 %v2792_v4, %v7166_v60 }
 0x3a7   :  { %6086 = vrsqrt.f32 %v2763_v59  ;;  %v2764_v23 = vadd.f32 1e-24, %v2732_v50 }
 0x3a8   :  { %v2856_v15 = vpack.c.bf16 %v2812_v46, %v2810_v36  ;;  %v2855_v19 = vpack.c.bf16 %v2811_v1, %v2809_v2 }
 0x3a9   :  { %v6083_v40 = vpop.eup %6082  ;;  %6088 = vrsqrt.f32 %v2764_v23 }
 0x3aa   :  { %v2793_v56 = vmul.f32 10.0, %v6083_v40  ;;  %3118 = vmatprep.mubr.bf16.mxu1 %v2856_v15  ;;  %4164 = vmatprep.mubr.bf16.mxu0 %v2856_v15 }
 0x3ab   :  { %v6085_v51 = vpop.eup %6084  ;;  %3119 = vmatmul.mubr.bf16.gmra.mrb[132].mxu1 %v2855_v19  ;;  %4165 = vmatmul.mubr.bf16.gmra.mrb[68].mxu0 %v2855_v19 }
 0x3ac   :  { %v2794_v11 = vmul.f32 10.0, %v6085_v51  ;;  %v2735_v57 = vpop.xlane.xlu0 %2734  ;;  %v2814_v55 = vmul.f32 %v2793_v56, %v7178_v14  ;;  %v2813_v9 = vmul.f32 %v2793_v56, %v7174_v10 }
 0x3ad   :  { %v2765_v16 = vadd.f32 1e-24, %v2735_v57  ;;  %v8846_v57 = vld [vmem:[#allocation33_spill] sm:$0xff] }
 0x3ae   :  { %v2738_v3 = vpop.xlane.xlu1 %2737  ;;  %v2816_v60 = vmul.f32 %v2794_v11, %v7186_v26  ;;  %v2815_v47 = vmul.f32 %v2794_v11, %v7182_v20 }
 0x3af   :  { %6090 = vrsqrt.f32 %v2765_v16  ;;  %v2766_v13 = vadd.f32 1e-24, %v2738_v3 }
 0x3b0   :  { %v2858_v49 = vpack.c.bf16 %v2816_v60, %v2814_v55  ;;  %v2857_v44 = vpack.c.bf16 %v2815_v47, %v2813_v9 }
 0x3b1   :  { %v6087_v12 = vpop.eup %6086  ;;  %6092 = vrsqrt.f32 %v2766_v13 }
 0x3b2   :  { %v2795_v6 = vmul.f32 10.0, %v6087_v12  ;;  %3126 = vmatprep.mubr.bf16.mxu1 %v2858_v49  ;;  %4172 = vmatprep.mubr.bf16.mxu0 %v2858_v49 }
 0x3b3   :  { %v6089_v18 = vpop.eup %6088  ;;  %3127 = vmatmul.mubr.bf16.gmra.mrb[136].mxu1 %v2857_v44  ;;  %4173 = vmatmul.mubr.bf16.gmra.mrb[72].mxu0 %v2857_v44  ;;  %v8847_v44 = vld [vmem:[#allocation34_spill] sm:$0xff] }
 0x3b4   :  { %v2796_v25 = vmul.f32 10.0, %v6089_v18  ;;  %v2741_v14 = vpop.xlane.xlu0 %2740  ;;  %v2818_v10 = vmul.f32 %v2795_v6, %v7194_v53  ;;  %v2817_v27 = vmul.f32 %v2795_v6, %v8841_v22 }
 0x3b5   :  { %v2767_v21 = vadd.f32 1e-24, %v2741_v14 }
 0x3b6   :  { %v2744_v26 = vpop.xlane.xlu1 %2743  ;;  %v2820_v20 = vmul.f32 %v2796_v25, %v8840_v29  ;;  %v2819_v24 = vmul.f32 %v2796_v25, %v8842_v28 }
 0x3b7   :  { %6094 = vrsqrt.f32 %v2767_v21  ;;  %v2768_v38 = vadd.f32 1e-24, %v2744_v26 }
 0x3b8   :  { %v2860_v34 = vpack.c.bf16 %v2820_v20, %v2818_v10  ;;  %v2859_v41 = vpack.c.bf16 %v2819_v24, %v2817_v27 }
 0x3b9   :  { %v6091_v48 = vpop.eup %6090  ;;  %6096 = vrsqrt.f32 %v2768_v38 }
 0x3ba   :  { %v2797_v54 = vmul.f32 10.0, %v6091_v48  ;;  %3134 = vmatprep.mubr.bf16.mxu1 %v2860_v34  ;;  %4180 = vmatprep.mubr.bf16.mxu0 %v2860_v34 }
 0x3bb   :  { %v6093_v30 = vpop.eup %6092  ;;  %3135 = vmatmul.mubr.bf16.gmra.mrb[140].mxu1 %v2859_v41  ;;  %4181 = vmatmul.mubr.bf16.gmra.mrb[76].mxu0 %v2859_v41 }
 0x3bc   :  { %v2798_v39 = vmul.f32 10.0, %v6093_v30  ;;  %v2747_v53 = vpop.xlane.xlu0 %2746  ;;  %v2822_v63 = vmul.f32 %v2797_v54, %v8843_v45  ;;  %v2821_v4 = vmul.f32 %v2797_v54, %v8844_v62 }
 0x3bd   :  { %v2769_v32 = vadd.f32 1e-24, %v2747_v53 }
 0x3be   :  { %v2750_v61 = vpop.xlane.xlu1 %2749  ;;  %v2824_v17 = vmul.f32 %v2798_v39, %v7218_v0  ;;  %v2823_v59 = vmul.f32 %v2798_v39, %v8845_v42 }
 0x3bf   :  { %6098 = vrsqrt.f32 %v2769_v32  ;;  %v2770_v50 = vadd.f32 1e-24, %v2750_v61 }
 0x3c0   :  { %v2862_v36 = vpack.c.bf16 %v2824_v17, %v2822_v63  ;;  %v2861_v46 = vpack.c.bf16 %v2823_v59, %v2821_v4 }
 0x3c1   :  { %v6095_v2 = vpop.eup %6094  ;;  %6100 = vrsqrt.f32 %v2770_v50 }
 0x3c2   :  { %v2799_v1 = vmul.f32 10.0, %v6095_v2  ;;  %3142 = vmatprep.mubr.bf16.mxu1 %v2862_v36  ;;  %4188 = vmatprep.mubr.bf16.mxu0 %v2862_v36 }
 0x3c3   :  { %v6097_v23 = vpop.eup %6096  ;;  %3143 = vmatmul.mubr.bf16.gmra.mrb[144].mxu1 %v2861_v46  ;;  %4189 = vmatmul.mubr.bf16.gmra.mrb[80].mxu0 %v2861_v46 }
 0x3c4   :  { %v2800_v15 = vmul.f32 10.0, %v6097_v23  ;;  %v2753_v19 = vpop.xlane.xlu0 %2752  ;;  %v2826_v56 = vmul.f32 %v2799_v1, %v7230_v7  ;;  %v2825_v11 = vmul.f32 %v2799_v1, %v7226_v58 }
 0x3c5   :  { %v2771_v40 = vadd.f32 1e-24, %v2753_v19 }
 0x3c6   :  { %v2756_v0 = vpop.xlane.xlu1 %2755  ;;  %v2828_v51 = vmul.f32 %v2800_v15, %v7238_v52  ;;  %v2827_v16 = vmul.f32 %v2800_v15, %v8846_v57 }
 0x3c7   :  { %6102 = vrsqrt.f32 %v2771_v40  ;;  %v2772_v3 = vadd.f32 1e-24, %v2756_v0 }
 0x3c8   :  { %v2864_v55 = vpack.c.bf16 %v2828_v51, %v2826_v56  ;;  %v2863_v60 = vpack.c.bf16 %v2827_v16, %v2825_v11 }
 0x3c9   :  { %v6099_v9 = vpop.eup %6098  ;;  %6104 = vrsqrt.f32 %v2772_v3 }
 0x3ca   :  { %v2801_v47 = vmul.f32 10.0, %v6099_v9  ;;  %3150 = vmatprep.mubr.bf16.mxu1 %v2864_v55  ;;  %4196 = vmatprep.mubr.bf16.mxu0 %v2864_v55 }
 0x3cb   :  { %v6101_v13 = vpop.eup %6100  ;;  %3151 = vmatmul.mubr.bf16.gmra.mrb[148].mxu1 %v2863_v60  ;;  %4197 = vmatmul.mubr.bf16.gmra.mrb[84].mxu0 %v2863_v60 }
 0x3cc   :  { %v2802_v49 = vmul.f32 10.0, %v6101_v13  ;;  %v2830_v7 = vmul.f32 %v2801_v47, %v7250_v33  ;;  %v2829_v58 = vmul.f32 %v2801_v47, %v7246_v37 }
 0x3ce   :  { %v2832_v52 = vmul.f32 %v2802_v49, %v7258_v8  ;;  %v2831_v12 = vmul.f32 %v2802_v49, %v8847_v44 }
 0x3d0   :  { %v2866_v6 = vpack.c.bf16 %v2832_v52, %v2830_v7  ;;  %v2865_v18 = vpack.c.bf16 %v2831_v12, %v2829_v58 }
 0x3d1   :  { %v6103_v25 = vpop.eup %6102 }
 0x3d2   :  { %v2803_v14 = vmul.f32 10.0, %v6103_v25  ;;  %3158 = vmatprep.mubr.bf16.mxu1 %v2866_v6  ;;  %4204 = vmatprep.mubr.bf16.mxu0 %v2866_v6 }
 0x3d3   :  { %v6105_v21 = vpop.eup %6104  ;;  %3159 = vmatmul.mubr.bf16.gmra.mrb[152].mxu1 %v2865_v18  ;;  %4205 = vmatmul.mubr.bf16.gmra.mrb[88].mxu0 %v2865_v18 }
 0x3d4   :  { %v2804_v26 = vmul.f32 10.0, %v6105_v21  ;;  %v2834_v10 = vmul.f32 %v2803_v14, %v7270_v5  ;;  %v2833_v8 = vmul.f32 %v2803_v14, %v7266_v43 }
 0x3d6   :  { %v2836_v33 = vmul.f32 %v2804_v26, %v7278_v35  ;;  %v2835_v37 = vmul.f32 %v2804_v26, %v7274_v31 }
 0x3d8   :  { %v2868_v29 = vpack.c.bf16 %v2836_v33, %v2834_v10  ;;  %v2867_v20 = vpack.c.bf16 %v2835_v37, %v2833_v8 }
 0x3da   :  { %3166 = vmatprep.mubr.bf16.mxu1 %v2868_v29  ;;  %4212 = vmatprep.mubr.bf16.mxu0 %v2868_v29 }
 0x3db   :  { %3167 = vmatmul.mubr.bf16.gmra.mrb[156].mxu1 %v2867_v20  ;;  %4213 = vmatmul.mubr.bf16.gmra.mrb[92].mxu0 %v2867_v20 }
 0x3f7   :  { %v5334_v22 = vpop.f32.mrb[96].mxu1  ;;  %v5446_v27 = vpop.f32.mrb[32].mxu0 }
 0x3f8   :  { %v5335_v28 = vpop.f32.mrb[97].mxu1  ;;  %v5447_v24 = vpop.f32.mrb[33].mxu0 }
 0x3f9   :  { %v7334_v38 = vadd.f32 %v5335_v28, %v5334_v22  ;;  %v7336_v34 = vadd.f32 %v5447_v24, %v5446_v27  ;;  %v5337_v5 = vpop.f32.mrb[98].mxu1  ;;  %v5449_v35 = vpop.f32.mrb[34].mxu0 }
 0x3fa   :  { %v5338_v41 = vpop.f32.mrb[99].mxu1  ;;  %v5450_v43 = vpop.f32.mrb[35].mxu0 }
 0x3fb   :  { %8848 = vst [vmem:[#allocation29_spill] sm:$0xff] %v7336_v34  ;;  %v7338_v48 = vadd.f32 %v5338_v41, %v5337_v5  ;;  %v7340_v31 = vadd.f32 %v5450_v43, %v5449_v35  ;;  %4269 = vmax.xlane.f32.xlu0 %v7336_v34  ;;  %3223 = vmax.xlane.f32.xlu1 %v7334_v38 }
 0x3fd   :  { %8849 = vst [vmem:[#allocation27_spill] sm:$0xff] %v7340_v31 }
 0x3ff   :  { %v5340_v54 = vpop.f32.mrb[100].mxu1  ;;  %v5452_v30 = vpop.f32.mrb[36].mxu0  ;;  %3225 = vmax.xlane.f32.xlu0 %v7338_v48  ;;  %4271 = vmax.xlane.f32.xlu1 %v7340_v31 }
 0x400   :  { %v5341_v39 = vpop.f32.mrb[101].mxu1  ;;  %v5453_v53 = vpop.f32.mrb[37].mxu0 }
 0x401   :  { %v7346_v32 = vadd.f32 %v5341_v39, %v5340_v54  ;;  %v7348_v61 = vadd.f32 %v5453_v53, %v5452_v30  ;;  %v5343_v45 = vpop.f32.mrb[102].mxu1  ;;  %v5455_v63 = vpop.f32.mrb[38].mxu0 }
 0x402   :  { %v5344_v17 = vpop.f32.mrb[103].mxu1  ;;  %v5456_v62 = vpop.f32.mrb[39].mxu0 }
 0x403   :  { %8850 = vst [vmem:[#allocation28_spill] sm:$0xff] %v7346_v32  ;;  %8851 = vst [vmem:[#allocation31_spill] sm:$0xff] %v7348_v61  ;;  %v7350_v4 = vadd.f32 %v5344_v17, %v5343_v45  ;;  %v7352_v42 = vadd.f32 %v5456_v62, %v5455_v63  ;;  %3227 = vmax.xlane.f32.xlu1 %v7346_v32 }
 0x405   :  { %8852 = vst [vmem:[#allocation30_spill] sm:$0xff] %v7350_v4  ;;  %8853 = vst [vmem:[#allocation32_spill] sm:$0xff] %v7352_v42 }
 0x407   :  { %v5346_v59 = vpop.f32.mrb[104].mxu1  ;;  %v5458_v50 = vpop.f32.mrb[40].mxu0  ;;  %4273 = vmax.xlane.f32.xlu1 %v7348_v61 }
 0x408   :  { %v5347_v36 = vpop.f32.mrb[105].mxu1  ;;  %v5459_v46 = vpop.f32.mrb[41].mxu0 }
 0x409   :  { %v7356_v2 = vadd.f32 %v5347_v36, %v5346_v59  ;;  %v7358_v1 = vadd.f32 %v5459_v46, %v5458_v50  ;;  %v5349_v23 = vpop.f32.mrb[106].mxu1  ;;  %v5461_v15 = vpop.f32.mrb[42].mxu0 }
 0x40a   :  { %v5350_v19 = vpop.f32.mrb[107].mxu1  ;;  %v5462_v40 = vpop.f32.mrb[43].mxu0 }
 0x40b   :  { %8854 = vst [vmem:[#allocation33_spill] sm:$0xff] %v7356_v2  ;;  %8855 = vst [vmem:[#allocation34_spill] sm:$0xff] %v7358_v1  ;;  %v7360_v0 = vadd.f32 %v5350_v19, %v5349_v23  ;;  %v7362_v56 = vadd.f32 %v5462_v40, %v5461_v15  ;;  %3229 = vmax.xlane.f32.xlu1 %v7350_v4 }
 0x40d   :  { %8856 = vst [vmem:[#allocation35_spill] sm:$0xff] %v7360_v0 }
 0x40f   :  { %v5352_v51 = vpop.f32.mrb[108].mxu1  ;;  %v5464_v11 = vpop.f32.mrb[44].mxu0  ;;  %4275 = vmax.xlane.f32.xlu1 %v7352_v42 }
 0x410   :  { %v5353_v57 = vpop.f32.mrb[109].mxu1  ;;  %v5465_v16 = vpop.f32.mrb[45].mxu0 }
 0x411   :  { %v7366_v3 = vadd.f32 %v5353_v57, %v5352_v51  ;;  %v7368_v55 = vadd.f32 %v5465_v16, %v5464_v11  ;;  %v5355_v60 = vpop.f32.mrb[110].mxu1  ;;  %v5467_v9 = vpop.f32.mrb[46].mxu0 }
 0x412   :  { %v5356_v47 = vpop.f32.mrb[111].mxu1  ;;  %v5468_v13 = vpop.f32.mrb[47].mxu0 }
 0x413   :  { %v7370_v49 = vadd.f32 %v5356_v47, %v5355_v60  ;;  %v7372_v7 = vadd.f32 %v5468_v13, %v5467_v9  ;;  %3231 = vmax.xlane.f32.xlu1 %v7356_v2 }
 0x417   :  { %v5358_v52 = vpop.f32.mrb[112].mxu1  ;;  %v5470_v58 = vpop.f32.mrb[48].mxu0  ;;  %4277 = vmax.xlane.f32.xlu1 %v7358_v1 }
 0x418   :  { %v5359_v44 = vpop.f32.mrb[113].mxu1  ;;  %v5471_v12 = vpop.f32.mrb[49].mxu0 }
 0x419   :  { %v7376_v6 = vadd.f32 %v5359_v44, %v5358_v52  ;;  %v7378_v18 = vadd.f32 %v5471_v12, %v5470_v58  ;;  %v5361_v25 = vpop.f32.mrb[114].mxu1  ;;  %v5473_v14 = vpop.f32.mrb[50].mxu0 }
 0x41a   :  { %v5362_v21 = vpop.f32.mrb[115].mxu1  ;;  %v5474_v26 = vpop.f32.mrb[51].mxu0 }
 0x41b   :  { %v7380_v10 = vadd.f32 %v5362_v21, %v5361_v25  ;;  %v7382_v33 = vadd.f32 %v5474_v26, %v5473_v14  ;;  %3233 = vmax.xlane.f32.xlu1 %v7360_v0 }
 0x41f   :  { %v5364_v8 = vpop.f32.mrb[116].mxu1  ;;  %v5476_v37 = vpop.f32.mrb[52].mxu0  ;;  %4279 = vmax.xlane.f32.xlu1 %v7362_v56 }
 0x420   :  { %v5365_v29 = vpop.f32.mrb[117].mxu1  ;;  %v5477_v20 = vpop.f32.mrb[53].mxu0 }
 0x421   :  { %v7386_v22 = vadd.f32 %v5365_v29, %v5364_v8  ;;  %v7388_v27 = vadd.f32 %v5477_v20, %v5476_v37  ;;  %v5367_v28 = vpop.f32.mrb[118].mxu1  ;;  %v5479_v24 = vpop.f32.mrb[54].mxu0 }
 0x422   :  { %v5368_v5 = vpop.f32.mrb[119].mxu1  ;;  %v5480_v35 = vpop.f32.mrb[55].mxu0 }
 0x423   :  { %v7390_v41 = vadd.f32 %v5368_v5, %v5367_v28  ;;  %v7392_v43 = vadd.f32 %v5480_v35, %v5479_v24  ;;  %3235 = vmax.xlane.f32.xlu1 %v7366_v3 }
 0x425   :  { %8857 = vst [vmem:[#allocation36_spill] sm:$0xff] %v7390_v41 }
 0x427   :  { %v5370_v54 = vpop.f32.mrb[120].mxu1  ;;  %v5482_v30 = vpop.f32.mrb[56].mxu0  ;;  %4281 = vmax.xlane.f32.xlu1 %v7368_v55 }
 0x428   :  { %v5371_v39 = vpop.f32.mrb[121].mxu1  ;;  %v5483_v53 = vpop.f32.mrb[57].mxu0 }
 0x429   :  { %v7396_v45 = vadd.f32 %v5371_v39, %v5370_v54  ;;  %v7398_v63 = vadd.f32 %v5483_v53, %v5482_v30  ;;  %v5373_v17 = vpop.f32.mrb[122].mxu1  ;;  %v5485_v62 = vpop.f32.mrb[58].mxu0 }
 0x42a   :  { %v5374_v59 = vpop.f32.mrb[123].mxu1  ;;  %v5486_v50 = vpop.f32.mrb[59].mxu0 }
 0x42b   :  { %8858 = vst [vmem:[#allocation37_spill] sm:$0xff] %v7396_v45  ;;  %v7400_v36 = vadd.f32 %v5374_v59, %v5373_v17  ;;  %v7402_v46 = vadd.f32 %v5486_v50, %v5485_v62  ;;  %3237 = vmax.xlane.f32.xlu1 %v7370_v49 }
 0x42d   :  { %8859 = vst [vmem:[#allocation38_spill] sm:$0xff] %v7400_v36 }
 0x42f   :  { %4283 = vmax.xlane.f32.xlu1 %v7372_v7  ;;  %v5376_v23 = vpop.f32.mrb[124].mxu1  ;;  %v5488_v15 = vpop.f32.mrb[60].mxu0 }
 0x430   :  { %v5377_v19 = vpop.f32.mrb[125].mxu1  ;;  %v5489_v40 = vpop.f32.mrb[61].mxu0 }
 0x431   :  { %v7406_v51 = vadd.f32 %v5377_v19, %v5376_v23  ;;  %v7408_v11 = vadd.f32 %v5489_v40, %v5488_v15  ;;  %v5379_v57 = vpop.f32.mrb[126].mxu1  ;;  %v5491_v16 = vpop.f32.mrb[62].mxu0 }
 0x432   :  { %v5380_v60 = vpop.f32.mrb[127].mxu1  ;;  %v5492_v9 = vpop.f32.mrb[63].mxu0 }
 0x433   :  { %8860 = vst [vmem:[#allocation39_spill] sm:$0xff] %v7406_v51  ;;  %v7410_v47 = vadd.f32 %v5380_v60, %v5379_v57  ;;  %v7412_v13 = vadd.f32 %v5492_v9, %v5491_v16  ;;  %3239 = vmax.xlane.f32.xlu1 %v7376_v6 }
 0x435   :  { %8861 = vst [vmem:[#allocation40_spill] sm:$0xff] %v7410_v47  ;;  %3253 = vmax.xlane.f32.xlu0 %v7410_v47 }
 0x437   :  { %4285 = vmax.xlane.f32.xlu1 %v7378_v18 }
 0x43b   :  { %3241 = vmax.xlane.f32.xlu1 %v7380_v10 }
 0x43f   :  { %4287 = vmax.xlane.f32.xlu1 %v7382_v33 }
 0x443   :  { %3243 = vmax.xlane.f32.xlu1 %v7386_v22 }
 0x447   :  { %4289 = vmax.xlane.f32.xlu1 %v7388_v27 }
 0x44b   :  { %3245 = vmax.xlane.f32.xlu1 %v7390_v41 }
 0x44f   :  { %4291 = vmax.xlane.f32.xlu1 %v7392_v43 }
 0x453   :  { %3247 = vmax.xlane.f32.xlu1 %v7396_v45 }
 0x457   :  { %4293 = vmax.xlane.f32.xlu1 %v7398_v63 }
 0x45b   :  { %3249 = vmax.xlane.f32.xlu1 %v7400_v36 }
 0x45f   :  { %4295 = vmax.xlane.f32.xlu1 %v7402_v46 }
 0x463   :  { %3251 = vmax.xlane.f32.xlu1 %v7406_v51 }
 0x467   :  { %4297 = vmax.xlane.f32.xlu1 %v7408_v11 }
 0x46b   :  { %4299 = vmax.xlane.f32.xlu1 %v7412_v13 }
 0x476   :  { %v5382_v52 = vpop.f32.mrb[128].mxu1  ;;  %v5494_v58 = vpop.f32.mrb[64].mxu0 }
 0x477   :  { %v5383_v44 = vpop.f32.mrb[129].mxu1  ;;  %v5495_v12 = vpop.f32.mrb[65].mxu0 }
 0x478   :  { %v7430_v25 = vadd.f32 %v5383_v44, %v5382_v52  ;;  %v7432_v14 = vadd.f32 %v5495_v12, %v5494_v58  ;;  %v5385_v21 = vpop.f32.mrb[130].mxu1  ;;  %v5497_v26 = vpop.f32.mrb[66].mxu0 }
 0x479   :  { %v5386_v8 = vpop.f32.mrb[131].mxu1  ;;  %v5498_v37 = vpop.f32.mrb[67].mxu0 }
 0x47a   :  { %v7434_v29 = vadd.f32 %v5386_v8, %v5385_v21  ;;  %v7436_v20 = vadd.f32 %v5498_v37, %v5497_v26  ;;  %3175 = vmax.xlane.f32.xlu0 %v7430_v25 }
 0x47c   :  { %3177 = vmax.xlane.f32.xlu1 %v7434_v29 }
 0x47e   :  { %4221 = vmax.xlane.f32.xlu0 %v7432_v14  ;;  %v5388_v28 = vpop.f32.mrb[132].mxu1  ;;  %v5500_v24 = vpop.f32.mrb[68].mxu0 }
 0x47f   :  { %v5389_v5 = vpop.f32.mrb[133].mxu1  ;;  %v5501_v35 = vpop.f32.mrb[69].mxu0 }
 0x480   :  { %v7441_v54 = vadd.f32 %v5389_v5, %v5388_v28  ;;  %v7443_v30 = vadd.f32 %v5501_v35, %v5500_v24  ;;  %4223 = vmax.xlane.f32.xlu1 %v7436_v20  ;;  %v5391_v39 = vpop.f32.mrb[134].mxu1  ;;  %v5503_v53 = vpop.f32.mrb[70].mxu0 }
 0x481   :  { %v5392_v17 = vpop.f32.mrb[135].mxu1  ;;  %v5504_v62 = vpop.f32.mrb[71].mxu0 }
 0x482   :  { %v7446_v59 = vadd.f32 %v5392_v17, %v5391_v39  ;;  %v7448_v50 = vadd.f32 %v5504_v62, %v5503_v53  ;;  %3179 = vmax.xlane.f32.xlu0 %v7441_v54 }
 0x484   :  { %4225 = vmax.xlane.f32.xlu1 %v7443_v30 }
 0x486   :  { %3181 = vmax.xlane.f32.xlu0 %v7446_v59  ;;  %v5394_v23 = vpop.f32.mrb[136].mxu1  ;;  %v5506_v15 = vpop.f32.mrb[72].mxu0 }
 0x487   :  { %v5395_v19 = vpop.f32.mrb[137].mxu1  ;;  %v5507_v40 = vpop.f32.mrb[73].mxu0 }
 0x488   :  { %v7453_v57 = vadd.f32 %v5395_v19, %v5394_v23  ;;  %v7455_v16 = vadd.f32 %v5507_v40, %v5506_v15  ;;  %v5397_v60 = vpop.f32.mrb[138].mxu1  ;;  %v5509_v9 = vpop.f32.mrb[74].mxu0 }
 0x489   :  { %v5398_v52 = vpop.f32.mrb[139].mxu1  ;;  %v5510_v44 = vpop.f32.mrb[75].mxu0 }
 0x48a   :  { %8862 = vst [vmem:[#allocation41_spill] sm:$0xff] %v7453_v57  ;;  %v7457_v58 = vadd.f32 %v5398_v52, %v5397_v60  ;;  %v3224_v12 = vpop.xlane.xlu1 %3223  ;;  %4227 = vmax.xlane.f32.xlu0 %v7448_v50  ;;  %v7460_v21 = vadd.f32 %v5510_v44, %v5509_v9 }
 0x48b   :  { %v7462_v26 = vmax.f32 %v3224_v12, -1e+30 }
 0x48c   :  { %8863 = vst [vmem:[#allocation42_spill] sm:$0xff] %v7457_v58  ;;  %8864 = vst [vmem:[#allocation43_spill] sm:$0xff] %v7460_v21 }
 0x48d   :  { %8865 = vst [vmem:[#allocation44_spill] sm:$0xff] %v7462_v26  ;;  %v3319_v8 = vsub.f32 %v7334_v38, %v7462_v26 }
 0x48e   :  { %v4272_v37 = vpop.xlane.xlu1 %4271  ;;  %3183 = vmax.xlane.f32.xlu0 %v7453_v57  ;;  %v5400_v5 = vpop.f32.mrb[140].mxu1 }
 0x48f   :  { %v3335_v28 = vmul.f32 1.442695, %v3319_v8  ;;  %v7467_v24 = vmax.f32 %v4272_v37, -1e+30  ;;  %v5512_v35 = vpop.f32.mrb[76].mxu0  ;;  %v5401_v39 = vpop.f32.mrb[141].mxu1 }
 0x490   :  { %v5513_v53 = vpop.f32.mrb[77].mxu0  ;;  %v7471_v62 = vadd.f32 %v5401_v39, %v5400_v5  ;;  %v5403_v15 = vpop.f32.mrb[142].mxu1 }
 0x491   :  { %8866 = vst [vmem:[#allocation45_spill] sm:$0xff] %v7467_v24  ;;  %6106 = vpow2.f32 %v3335_v28  ;;  %v4366_v17 = vsub.f32 %v7340_v31, %v7467_v24  ;;  %v7473_v23 = vadd.f32 %v5513_v53, %v5512_v35  ;;  %v5515_v19 = vpop.f32.mrb[78].mxu0  ;;  %v5404_v40 = vpop.f32.mrb[143].mxu1 }
 0x492   :  { %8867 = vst [vmem:[#allocation46_spill] sm:$0xff] %v7471_v62  ;;  %v5516_v60 = vpop.f32.mrb[79].mxu0  ;;  %4229 = vmax.xlane.f32.xlu0 %v7455_v16  ;;  %v7476_v52 = vadd.f32 %v5404_v40, %v5403_v15  ;;  %v3228_v44 = vpop.xlane.xlu1 %3227 }
 0x493   :  { %8868 = vst [vmem:[#allocation47_spill] sm:$0xff] %v7473_v23  ;;  %v4383_v9 = vmul.f32 1.442695, %v4366_v17  ;;  %v7478_v12 = vadd.f32 %v5516_v60, %v5515_v19  ;;  %v7480_v8 = vmax.f32 %v3228_v44, -1e+30  ;;  %v4270_v37 = vpop.xlane.xlu0 %4269 }
 0x494   :  { %8869 = vst [vmem:[#allocation48_spill] sm:$0xff] %v7476_v52 }
 0x495   :  { %8870 = vst [vmem:[#allocation49_spill] sm:$0xff] %v7478_v12  ;;  %8871 = vst [vmem:[#allocation50_spill] sm:$0xff] %v7480_v8  ;;  %6108 = vpow2.f32 %v4383_v9  ;;  %v3321_v28 = vsub.f32 %v7346_v32, %v7480_v8  ;;  %v7494_v8 = vld [vmem:[%s8661_s10] ss:$0 sm:$0xff] }
 0x496   :  { %3185 = vmax.xlane.f32.xlu0 %v7457_v58  ;;  %v5406_v5 = vpop.f32.mrb[144].mxu1  ;;  %v5518_v35 = vpop.f32.mrb[80].mxu0 }
 0x497   :  { %v4274_v39 = vpop.xlane.xlu1 %4273  ;;  %v5407_v53 = vpop.f32.mrb[145].mxu1  ;;  %v3339_v24 = vmul.f32 1.442695, %v3321_v28 }
 0x498   :  { %v7485_v17 = vmax.f32 %v4274_v39, -1e+30  ;;  %v7487_v15 = vadd.f32 %v5407_v53, %v5406_v5  ;;  %v5519_v19 = vpop.f32.mrb[81].mxu0  ;;  %v5409_v40 = vpop.f32.mrb[146].mxu1  ;;  %v7501_v53 = vmax.f32 %v4270_v37, -1e+30 }
 0x499   :  { %v7489_v60 = vadd.f32 %v5519_v19, %v5518_v35  ;;  %v5521_v44 = vpop.f32.mrb[82].mxu0  ;;  %v5410_v9 = vpop.f32.mrb[147].mxu1  ;;  %6110 = vpow2.f32 %v3339_v24 }
 0x49a   :  { %8872 = vst [vmem:[#allocation51_spill] sm:$0xff] %v7485_v17  ;;  %8873 = vst [vmem:[#allocation52_spill] sm:$0xff] %v7487_v15  ;;  %v4367_v26 = vsub.f32 %v7348_v61, %v7485_v17  ;;  %v7498_v28 = vadd.f32 %v5410_v9, %v5409_v40  ;;  %v5522_v39 = vpop.f32.mrb[83].mxu0  ;;  %4231 = vmax.xlane.f32.xlu0 %v7460_v21  ;;  %v4365_v37 = vsub.f32 %v7336_v34, %v7501_v53 }
 0x49b   :  { %v6107_v5 = vpop.eup %6106  ;;  %8874 = vst [vmem:[#allocation53_spill] sm:$0xff] %v7501_v53  ;;  %v7503_v35 = vadd.f32 %v5522_v39, %v5521_v44  ;;  %v3230_v19 = vpop.xlane.xlu1 %3229 }
 0x49c   :  { %v4385_v32 = vmul.f32 1.442695, %v4367_v26  ;;  %v7505_v58 = vmax.f32 %v3230_v19, -1e+30  ;;  %v3390_v57 = vmul.f32 %v6107_v5, %v7494_v8  ;;  %v7516_v26 = vld [vmem:[%s8662_s11] ss:$0 sm:$0xff] }
 0x49e   :  { %8875 = vst [vmem:[#allocation54_spill] sm:$0xff] %v7505_v58  ;;  %6112 = vpow2.f32 %v4385_v32  ;;  %v3322_v24 = vsub.f32 %v7350_v4, %v7505_v58  ;;  %3582 = vadd.xlane.f32.xlu1 %v3390_v57  ;;  %3187 = vmax.xlane.f32.xlu0 %v7471_v62  ;;  %v5412_v40 = vpop.f32.mrb[148].mxu1  ;;  %v5524_v9 = vpop.f32.mrb[84].mxu0 }
 0x49f   :  { %v6109_v17 = vpop.eup %6108  ;;  %v4276_v44 = vpop.xlane.xlu1 %4275 }
 0x4a0   :  { %v5413_v39 = vpop.f32.mrb[149].mxu1  ;;  %v3341_v32 = vmul.f32 1.442695, %v3322_v24  ;;  %v7518_v5 = vmax.f32 %v4276_v44, -1e+30  ;;  %v5525_v57 = vpop.f32.mrb[85].mxu0  ;;  %v4437_v62 = vmul.f32 %v6109_v17, %v7516_v26 }
 0x4a1   :  { %v7520_v19 = vadd.f32 %v5413_v39, %v5412_v40  ;;  %v5415_v58 = vpop.f32.mrb[150].mxu1  ;;  %v7523_v4 = vadd.f32 %v5525_v57, %v5524_v9  ;;  %v5527_v61 = vpop.f32.mrb[86].mxu0  ;;  %v4381_v24 = vmul.f32 1.442695, %v4365_v37 }
 0x4a2   :  { %8876 = vst [vmem:[#allocation55_spill] sm:$0xff] %v7518_v5  ;;  %v5416_v53 = vpop.f32.mrb[151].mxu1  ;;  %6114 = vpow2.f32 %v3341_v32  ;;  %v4368_v21 = vsub.f32 %v7352_v42, %v7518_v5  ;;  %v5528_v34 = vpop.f32.mrb[87].mxu0  ;;  %4630 = vadd.xlane.f32.xlu1 %v4437_v62  ;;  %4233 = vmax.xlane.f32.xlu0 %v7473_v23 }
 0x4a3   :  { %v7527_v31 = vadd.f32 %v5416_v53, %v5415_v58  ;;  %v7530_v40 = vadd.f32 %v5528_v34, %v5527_v61  ;;  %v3232_v44 = vpop.xlane.xlu1 %3231  ;;  %v6111_v39 = vpop.eup %6110 }
 0x4a4   :  { %v3226_v17 = vpop.xlane.xlu0 %3225  ;;  %v4387_v9 = vmul.f32 1.442695, %v4368_v21  ;;  %v7532_v57 = vmax.f32 %v3232_v44, -1e+30  ;;  %v3392_v32 = vmul.f32 %v6111_v39, %v7494_v8 }
 0x4a5   :  { %v7538_v37 = vmax.f32 %v3226_v17, -1e+30 }
 0x4a6   :  { %8877 = vst [vmem:[#allocation56_spill] sm:$0xff] %v7532_v57  ;;  %6116 = vpow2.f32 %v4387_v9  ;;  %v3323_v58 = vsub.f32 %v7356_v2, %v7532_v57  ;;  %3189 = vmax.xlane.f32.xlu0 %v7476_v52  ;;  %v5418_v62 = vpop.f32.mrb[152].mxu1  ;;  %v5530_v53 = vpop.f32.mrb[88].mxu0  ;;  %3586 = vadd.xlane.f32.xlu1 %v3392_v32 }
 0x4a7   :  { %6118 = vpow2.f32 %v4381_v24  ;;  %8878 = vst [vmem:[#allocation57_spill] sm:$0xff] %v7538_v37  ;;  %v4278_v34 = vpop.xlane.xlu1 %4277  ;;  %v5419_v61 = vpop.f32.mrb[153].mxu1 }
 0x4a8   :  { %v6113_v5 = vpop.eup %6112  ;;  %v3343_v21 = vmul.f32 1.442695, %v3323_v58  ;;  %v7540_v44 = vmax.f32 %v4278_v34, -1e+30  ;;  %v7542_v23 = vadd.f32 %v5419_v61, %v5418_v62  ;;  %v5531_v39 = vpop.f32.mrb[89].mxu0  ;;  %v3320_v58 = vsub.f32 %v7338_v48, %v7538_v37 }
 0x4a9   :  { %v5421_v9 = vpop.f32.mrb[154].mxu1  ;;  %v7544_v42 = vadd.f32 %v5531_v39, %v5530_v53  ;;  %v5533_v57 = vpop.f32.mrb[90].mxu0  ;;  %v4438_v52 = vmul.f32 %v6113_v5, %v7516_v26 }
 0x4aa   :  { %8879 = vst [vmem:[#allocation58_spill] sm:$0xff] %v7540_v44  ;;  %v5422_v2 = vpop.f32.mrb[155].mxu1  ;;  %6120 = vpow2.f32 %v3343_v21  ;;  %v4369_v24 = vsub.f32 %v7358_v1, %v7540_v44  ;;  %v5534_v32 = vpop.f32.mrb[91].mxu0  ;;  %4235 = vmax.xlane.f32.xlu0 %v7478_v12  ;;  %v3337_v44 = vmul.f32 1.442695, %v3320_v58 }
 0x4ab   :  { %v7549_v17 = vadd.f32 %v5422_v2, %v5421_v9  ;;  %v7554_v62 = vadd.f32 %v5534_v32, %v5533_v57  ;;  %4632 = vadd.xlane.f32.xlu1 %v4438_v52  ;;  %v3234_v53 = vpop.xlane.xlu1 %3233 }
 0x4ac   :  { %v6115_v34 = vpop.eup %6114  ;;  %v4389_v61 = vmul.f32 1.442695, %v4369_v24  ;;  %v7556_v39 = vmax.f32 %v3234_v53, -1e+30 }
 0x4ad   :  { %v3393_v5 = vmul.f32 %v6115_v34, %v7494_v8 }
 0x4ae   :  { %8880 = vst [vmem:[#allocation59_spill] sm:$0xff] %v7556_v39  ;;  %6122 = vpow2.f32 %v4389_v61  ;;  %v3324_v2 = vsub.f32 %v7360_v0, %v7556_v39  ;;  %3191 = vmax.xlane.f32.xlu0 %v7487_v15  ;;  %v5424_v21 = vpop.f32.mrb[156].mxu1  ;;  %v5536_v9 = vpop.f32.mrb[92].mxu0 }
 0x4af   :  { %3588 = vadd.xlane.f32.xlu1 %v3393_v5  ;;  %v4280_v57 = vpop.xlane.xlu1 %4279  ;;  %v5425_v32 = vpop.f32.mrb[157].mxu1 }
 0x4b0   :  { %v6117_v52 = vpop.eup %6116  ;;  %v3345_v37 = vmul.f32 1.442695, %v3324_v2  ;;  %v7562_v12 = vmax.f32 %v4280_v57, -1e+30  ;;  %v7564_v24 = vadd.f32 %v5425_v32, %v5424_v21  ;;  %v5537_v53 = vpop.f32.mrb[93].mxu0 }
 0x4b1   :  { %v5427_v34 = vpop.f32.mrb[158].mxu1  ;;  %v6119_v61 = vpop.eup %6118  ;;  %v7566_v1 = vadd.f32 %v5537_v53, %v5536_v9  ;;  %v4439_v15 = vmul.f32 %v6117_v52, %v7516_v26 }
 0x4b2   :  { %8881 = vst [vmem:[#allocation60_spill] sm:$0xff] %v7562_v12  ;;  %8882 = vst [vmem:[#allocation61_spill] sm:$0xff] %v7564_v24  ;;  %v5539_v39 = vpop.f32.mrb[94].mxu0  ;;  %v5428_v0 = vpop.f32.mrb[159].mxu1  ;;  %6124 = vpow2.f32 %v3345_v37  ;;  %v4370_v58 = vsub.f32 %v7362_v56, %v7562_v12  ;;  %4237 = vmax.xlane.f32.xlu0 %v7489_v60  ;;  %v4436_v52 = vmul.f32 %v6119_v61, %v7516_v26 }
 0x4b3   :  { %v7571_v5 = vadd.f32 %v5428_v0, %v5427_v34  ;;  %v5540_v2 = vpop.f32.mrb[95].mxu0  ;;  %6126 = vpow2.f32 %v3337_v44  ;;  %4634 = vadd.xlane.f32.xlu1 %v4439_v15  ;;  %v3236_v57 = vpop.xlane.xlu1 %3235 }
 0x4b4   :  { %v7574_v21 = vadd.f32 %v5540_v2, %v5539_v39  ;;  %v6121_v9 = vpop.eup %6120  ;;  %v4391_v32 = vmul.f32 1.442695, %v4370_v58  ;;  %v7576_v53 = vmax.f32 %v3236_v57, -1e+30 }
 0x4b5   :  { %8883 = vst [vmem:[#allocation62_spill] sm:$0xff] %v7571_v5  ;;  %v3394_v37 = vmul.f32 %v6121_v9, %v7494_v8 }
 0x4b6   :  { %8884 = vst [vmem:[#allocation63_spill] sm:$0xff] %v7576_v53  ;;  %6128 = vpow2.f32 %v4391_v32  ;;  %v3325_v0 = vsub.f32 %v7366_v3, %v7576_v53  ;;  %4628 = vadd.xlane.f32.xlu0 %v4436_v52 }
 0x4b7   :  { %3590 = vadd.xlane.f32.xlu1 %v3394_v37  ;;  %v4282_v34 = vpop.xlane.xlu1 %4281 }
 0x4b8   :  { %v6123_v44 = vpop.eup %6122  ;;  %v3347_v39 = vmul.f32 1.442695, %v3325_v0  ;;  %v7582_v2 = vmax.f32 %v4282_v34, -1e+30 }
 0x4b9   :  { %v4440_v15 = vmul.f32 %v6123_v44, %v7516_v26 }
 0x4ba   :  { %8885 = vst [vmem:[#allocation64_spill] sm:$0xff] %v7582_v2  ;;  %6130 = vpow2.f32 %v3347_v39  ;;  %v4371_v58 = vsub.f32 %v7368_v55, %v7582_v2  ;;  %3193 = vmax.xlane.f32.xlu0 %v7498_v28 }
 0x4bb   :  { %4636 = vadd.xlane.f32.xlu1 %v4440_v15  ;;  %v3238_v61 = vpop.xlane.xlu1 %3237 }
 0x4bc   :  { %v6125_v57 = vpop.eup %6124  ;;  %v4393_v9 = vmul.f32 1.442695, %v4371_v58  ;;  %v7588_v32 = vmax.f32 %v3238_v61, -1e+30 }
 0x4bd   :  { %v6127_v52 = vpop.eup %6126  ;;  %v3395_v37 = vmul.f32 %v6125_v57, %v7494_v8 }
 0x4be   :  { %8886 = vst [vmem:[#allocation65_spill] sm:$0xff] %v7588_v32  ;;  %6132 = vpow2.f32 %v4393_v9  ;;  %v3326_v0 = vsub.f32 %v7370_v49, %v7588_v32  ;;  %4239 = vmax.xlane.f32.xlu0 %v7503_v35  ;;  %v3391_v15 = vmul.f32 %v6127_v52, %v7494_v8 }
 0x4bf   :  { %3592 = vadd.xlane.f32.xlu1 %v3395_v37  ;;  %v4284_v34 = vpop.xlane.xlu1 %4283 }
 0x4c0   :  { %v6129_v44 = vpop.eup %6128  ;;  %v3349_v39 = vmul.f32 1.442695, %v3326_v0  ;;  %v7594_v2 = vmax.f32 %v4284_v34, -1e+30 }
 0x4c1   :  { %v4441_v58 = vmul.f32 %v6129_v44, %v7516_v26 }
 0x4c2   :  { %8887 = vst [vmem:[#allocation66_spill] sm:$0xff] %v7594_v2  ;;  %6134 = vpow2.f32 %v3349_v39  ;;  %v4372_v61 = vsub.f32 %v7372_v7, %v7594_v2  ;;  %3584 = vadd.xlane.f32.xlu0 %v3391_v15 }
 0x4c3   :  { %4638 = vadd.xlane.f32.xlu1 %v4441_v58  ;;  %v3240_v57 = vpop.xlane.xlu1 %3239 }
 0x4c4   :  { %v6131_v9 = vpop.eup %6130  ;;  %v4395_v32 = vmul.f32 1.442695, %v4372_v61  ;;  %v7600_v53 = vmax.f32 %v3240_v57, -1e+30 }
 0x4c5   :  { %v3396_v37 = vmul.f32 %v6131_v9, %v7494_v8 }
 0x4c6   :  { %8888 = vst [vmem:[#allocation67_spill] sm:$0xff] %v7600_v53  ;;  %6136 = vpow2.f32 %v4395_v32  ;;  %v3327_v0 = vsub.f32 %v7376_v6, %v7600_v53  ;;  %3195 = vmax.xlane.f32.xlu0 %v7520_v19 }
 0x4c7   :  { %3594 = vadd.xlane.f32.xlu1 %v3396_v37  ;;  %v4286_v52 = vpop.xlane.xlu1 %4285 }
 0x4c8   :  { %v6133_v34 = vpop.eup %6132  ;;  %v3351_v44 = vmul.f32 1.442695, %v3327_v0  ;;  %v7606_v39 = vmax.f32 %v4286_v52, -1e+30 }
 0x4c9   :  { %v4442_v15 = vmul.f32 %v6133_v34, %v7516_v26 }
 0x4ca   :  { %8889 = vst [vmem:[#allocation68_spill] sm:$0xff] %v7606_v39  ;;  %6138 = vpow2.f32 %v3351_v44  ;;  %v4373_v58 = vsub.f32 %v7378_v18, %v7606_v39  ;;  %4241 = vmax.xlane.f32.xlu0 %v7523_v4 }
 0x4cb   :  { %4640 = vadd.xlane.f32.xlu1 %v4442_v15  ;;  %v3242_v32 = vpop.xlane.xlu1 %3241 }
 0x4cc   :  { %v6135_v61 = vpop.eup %6134  ;;  %v4397_v57 = vmul.f32 1.442695, %v4373_v58  ;;  %v7612_v9 = vmax.f32 %v3242_v32, -1e+30 }
 0x4cd   :  { %v3397_v37 = vmul.f32 %v6135_v61, %v7494_v8 }
 0x4ce   :  { %8890 = vst [vmem:[#allocation69_spill] sm:$0xff] %v7612_v9  ;;  %6140 = vpow2.f32 %v4397_v57  ;;  %v3328_v0 = vsub.f32 %v7380_v10, %v7612_v9  ;;  %3197 = vmax.xlane.f32.xlu0 %v7527_v31 }
 0x4cf   :  { %3596 = vadd.xlane.f32.xlu1 %v3397_v37  ;;  %v4288_v52 = vpop.xlane.xlu1 %4287 }
 0x4d0   :  { %v6137_v34 = vpop.eup %6136  ;;  %v3353_v44 = vmul.f32 1.442695, %v3328_v0  ;;  %v7618_v39 = vmax.f32 %v4288_v52, -1e+30 }
 0x4d1   :  { %v4443_v15 = vmul.f32 %v6137_v34, %v7516_v26 }
 0x4d2   :  { %8891 = vst [vmem:[#allocation70_spill] sm:$0xff] %v7618_v39  ;;  %6142 = vpow2.f32 %v3353_v44  ;;  %v4374_v58 = vsub.f32 %v7382_v33, %v7618_v39  ;;  %4243 = vmax.xlane.f32.xlu0 %v7530_v40  ;;  %v3254_v44 = vpop.xlane.xlu0 %3253 }
 0x4d3   :  { %4642 = vadd.xlane.f32.xlu1 %v4443_v15  ;;  %v3244_v32 = vpop.xlane.xlu1 %3243 }
 0x4d4   :  { %v6139_v61 = vpop.eup %6138  ;;  %v4399_v57 = vmul.f32 1.442695, %v4374_v58  ;;  %v7624_v9 = vmax.f32 %v3244_v32, -1e+30  ;;  %v7636_v32 = vmax.f32 %v3254_v44, -1e+30 }
 0x4d5   :  { %v3398_v37 = vmul.f32 %v6139_v61, %v7494_v8 }
 0x4d6   :  { %8892 = vst [vmem:[#allocation71_spill] sm:$0xff] %v7624_v9  ;;  %6144 = vpow2.f32 %v4399_v57  ;;  %v3329_v0 = vsub.f32 %v7386_v22, %v7624_v9  ;;  %3199 = vmax.xlane.f32.xlu0 %v7542_v23  ;;  %8894 = vst [vmem:[#allocation73_spill] sm:$0xff] %v7636_v32 }
 0x4d7   :  { %3598 = vadd.xlane.f32.xlu1 %v3398_v37  ;;  %v4290_v52 = vpop.xlane.xlu1 %4289 }
 0x4d8   :  { %v6141_v34 = vpop.eup %6140  ;;  %v3355_v39 = vmul.f32 1.442695, %v3329_v0  ;;  %v7630_v53 = vmax.f32 %v4290_v52, -1e+30 }
 0x4d9   :  { %v4444_v15 = vmul.f32 %v6141_v34, %v7516_v26 }
 0x4da   :  { %8893 = vst [vmem:[#allocation72_spill] sm:$0xff] %v7630_v53  ;;  %6146 = vpow2.f32 %v3355_v39  ;;  %v4375_v58 = vsub.f32 %v7388_v27, %v7630_v53  ;;  %4245 = vmax.xlane.f32.xlu0 %v7544_v42  ;;  %v3334_v39 = vsub.f32 %v7410_v47, %v7636_v32 }
 0x4db   :  { %4644 = vadd.xlane.f32.xlu1 %v4444_v15  ;;  %v3246_v61 = vpop.xlane.xlu1 %3245 }
 0x4dc   :  { %v6143_v57 = vpop.eup %6142  ;;  %v4401_v37 = vmul.f32 1.442695, %v4375_v58  ;;  %v7638_v9 = vmax.f32 %v3246_v61, -1e+30 }
 0x4dd   :  { %v3399_v0 = vmul.f32 %v6143_v57, %v7494_v8  ;;  %v3365_v57 = vmul.f32 1.442695, %v3334_v39 }
 0x4de   :  { %8895 = vst [vmem:[#allocation74_spill] sm:$0xff] %v7638_v9  ;;  %6148 = vpow2.f32 %v4401_v37  ;;  %v3330_v52 = vsub.f32 %v7390_v41, %v7638_v9  ;;  %3201 = vmax.xlane.f32.xlu0 %v7549_v17 }
 0x4df   :  { %3600 = vadd.xlane.f32.xlu1 %v3399_v0  ;;  %v4292_v34 = vpop.xlane.xlu1 %4291 }
 0x4e0   :  { %v6145_v44 = vpop.eup %6144  ;;  %v3357_v15 = vmul.f32 1.442695, %v3330_v52  ;;  %v7646_v53 = vmax.f32 %v4292_v34, -1e+30 }
 0x4e1   :  { %v4445_v58 = vmul.f32 %v6145_v44, %v7516_v26 }
 0x4e2   :  { %8896 = vst [vmem:[#allocation75_spill] sm:$0xff] %v7646_v53  ;;  %6150 = vpow2.f32 %v3357_v15  ;;  %v4376_v61 = vsub.f32 %v7392_v43, %v7646_v53  ;;  %4247 = vmax.xlane.f32.xlu0 %v7554_v62 }
 0x4e3   :  { %4646 = vadd.xlane.f32.xlu1 %v4445_v58  ;;  %v3248_v37 = vpop.xlane.xlu1 %3247 }
 0x4e4   :  { %v6147_v9 = vpop.eup %6146  ;;  %v4403_v41 = vmul.f32 1.442695, %v4376_v61  ;;  %v7652_v47 = vmax.f32 %v3248_v37, -1e+30 }
 0x4e5   :  { %v3400_v0 = vmul.f32 %v6147_v9, %v7494_v8 }
 0x4e6   :  { %8897 = vst [vmem:[#allocation76_spill] sm:$0xff] %v7652_v47  ;;  %6152 = vpow2.f32 %v4403_v41  ;;  %v3331_v52 = vsub.f32 %v7396_v45, %v7652_v47  ;;  %3203 = vmax.xlane.f32.xlu0 %v7564_v24 }
 0x4e7   :  { %6154 = vpow2.f32 %v3365_v57  ;;  %3602 = vadd.xlane.f32.xlu1 %v3400_v0  ;;  %v4294_v34 = vpop.xlane.xlu1 %4293 }
 0x4e8   :  { %v6149_v44 = vpop.eup %6148  ;;  %v3359_v15 = vmul.f32 1.442695, %v3331_v52  ;;  %v7658_v39 = vmax.f32 %v4294_v34, -1e+30 }
 0x4e9   :  { %v4446_v58 = vmul.f32 %v6149_v44, %v7516_v26 }
 0x4ea   :  { %8898 = vst [vmem:[#allocation77_spill] sm:$0xff] %v7658_v39  ;;  %6156 = vpow2.f32 %v3359_v15  ;;  %v4377_v61 = vsub.f32 %v7398_v63, %v7658_v39  ;;  %4249 = vmax.xlane.f32.xlu0 %v7566_v1 }
 0x4eb   :  { %4648 = vadd.xlane.f32.xlu1 %v4446_v58  ;;  %v3250_v41 = vpop.xlane.xlu1 %3249 }
 0x4ec   :  { %v6151_v9 = vpop.eup %6150  ;;  %v4405_v37 = vmul.f32 1.442695, %v4377_v61  ;;  %v7664_v47 = vmax.f32 %v3250_v41, -1e+30 }
 0x4ed   :  { %v3401_v57 = vmul.f32 %v6151_v9, %v7494_v8 }
 0x4ee   :  { %8899 = vst [vmem:[#allocation78_spill] sm:$0xff] %v7664_v47  ;;  %6158 = vpow2.f32 %v4405_v37  ;;  %v3332_v0 = vsub.f32 %v7400_v36, %v7664_v47  ;;  %3205 = vmax.xlane.f32.xlu0 %v7571_v5 }
 0x4ef   :  { %3604 = vadd.xlane.f32.xlu1 %v3401_v57  ;;  %v4296_v52 = vpop.xlane.xlu1 %4295 }
 0x4f0   :  { %v6153_v34 = vpop.eup %6152  ;;  %v3361_v44 = vmul.f32 1.442695, %v3332_v0  ;;  %v7670_v15 = vmax.f32 %v4296_v52, -1e+30 }
 0x4f1   :  { %v6155_v58 = vpop.eup %6154  ;;  %v4447_v39 = vmul.f32 %v6153_v34, %v7516_v26 }
 0x4f2   :  { %8900 = vst [vmem:[#allocation79_spill] sm:$0xff] %v7670_v15  ;;  %6160 = vpow2.f32 %v3361_v44  ;;  %v4378_v61 = vsub.f32 %v7402_v46, %v7670_v15  ;;  %4251 = vmax.xlane.f32.xlu0 %v7574_v21  ;;  %v3405_v57 = vmul.f32 %v6155_v58, %v7494_v8 }
 0x4f3   :  { %4650 = vadd.xlane.f32.xlu1 %v4447_v39  ;;  %v3252_v41 = vpop.xlane.xlu1 %3251 }
 0x4f4   :  { %v6157_v9 = vpop.eup %6156  ;;  %v4407_v37 = vmul.f32 1.442695, %v4378_v61  ;;  %v7676_v47 = vmax.f32 %v3252_v41, -1e+30 }
 0x4f5   :  { %v3402_v0 = vmul.f32 %v6157_v9, %v7494_v8 }
 0x4f6   :  { %8901 = vst [vmem:[#allocation80_spill] sm:$0xff] %v7676_v47  ;;  %6162 = vpow2.f32 %v4407_v37  ;;  %v3333_v52 = vsub.f32 %v7406_v51, %v7676_v47  ;;  %3612 = vadd.xlane.f32.xlu0 %v3405_v57 }
 0x4f7   :  { %3606 = vadd.xlane.f32.xlu1 %v3402_v0  ;;  %v4298_v34 = vpop.xlane.xlu1 %4297 }
 0x4f8   :  { %v6159_v44 = vpop.eup %6158  ;;  %v3363_v15 = vmul.f32 1.442695, %v3333_v52  ;;  %v7682_v53 = vmax.f32 %v4298_v34, -1e+30 }
 0x4f9   :  { %v4448_v39 = vmul.f32 %v6159_v44, %v7516_v26 }
 0x4fa   :  { %8902 = vst [vmem:[#allocation81_spill] sm:$0xff] %v7682_v53  ;;  %6164 = vpow2.f32 %v3363_v15  ;;  %v4379_v61 = vsub.f32 %v7408_v11, %v7682_v53 }
 0x4fb   :  { %4652 = vadd.xlane.f32.xlu1 %v4448_v39  ;;  %v4300_v58 = vpop.xlane.xlu1 %4299 }
 0x4fc   :  { %v6161_v41 = vpop.eup %6160  ;;  %v4409_v9 = vmul.f32 1.442695, %v4379_v61  ;;  %v7687_v37 = vmax.f32 %v4300_v58, -1e+30 }
 0x4fd   :  { %v3403_v57 = vmul.f32 %v6161_v41, %v7494_v8 }
 0x4fe   :  { %8903 = vst [vmem:[#allocation82_spill] sm:$0xff] %v7687_v37  ;;  %6166 = vpow2.f32 %v4409_v9  ;;  %v4380_v0 = vsub.f32 %v7412_v13, %v7687_v37 }
 0x4ff   :  { %3608 = vadd.xlane.f32.xlu1 %v3403_v57 }
 0x500   :  { %v6163_v52 = vpop.eup %6162  ;;  %v4411_v34 = vmul.f32 1.442695, %v4380_v0 }
 0x501   :  { %v4449_v15 = vmul.f32 %v6163_v52, %v7516_v26 }
 0x502   :  { %6168 = vpow2.f32 %v4411_v34 }
 0x503   :  { %4654 = vadd.xlane.f32.xlu1 %v4449_v15 }
 0x504   :  { %v6165_v44 = vpop.eup %6164 }
 0x505   :  { %v3404_v39 = vmul.f32 %v6165_v44, %v7494_v8 }
 0x507   :  { %3610 = vadd.xlane.f32.xlu1 %v3404_v39  ;;  %v3176_v61 = vpop.xlane.xlu0 %3175 }
 0x508   :  { %v6167_v58 = vpop.eup %6166  ;;  %v7694_v53 = vmax.f32 %v3176_v61, -1e+30 }
 0x509   :  { %v4450_v41 = vmul.f32 %v6167_v58, %v7516_v26  ;;  %v3178_v9 = vpop.xlane.xlu1 %3177 }
 0x50a   :  { %v3271_v57 = vsub.f32 %v7430_v25, %v7694_v53  ;;  %v7699_v37 = vmax.f32 %v3178_v9, -1e+30 }
 0x50b   :  { %4656 = vadd.xlane.f32.xlu1 %v4450_v41  ;;  %v4222_v0 = vpop.xlane.xlu0 %4221 }
 0x50c   :  { %8904 = vst [vmem:[#allocation83_spill] sm:$0xff] %v7699_v37  ;;  %v6169_v52 = vpop.eup %6168  ;;  %v3287_v34 = vmul.f32 1.442695, %v3271_v57  ;;  %v3272_v15 = vsub.f32 %v7434_v29, %v7699_v37  ;;  %v7703_v44 = vmax.f32 %v4222_v0, -1e+30 }
 0x50d   :  { %v4451_v39 = vmul.f32 %v6169_v52, %v7516_v26  ;;  %v4224_v61 = vpop.xlane.xlu1 %4223 }
 0x50e   :  { %8905 = vst [vmem:[#allocation84_spill] sm:$0xff] %v7703_v44  ;;  %6170 = vpow2.f32 %v3287_v34  ;;  %v3289_v58 = vmul.f32 1.442695, %v3272_v15  ;;  %v4317_v47 = vsub.f32 %v7432_v14, %v7703_v44  ;;  %v7708_v51 = vmax.f32 %v4224_v61, -1e+30 }
 0x50f   :  { %4658 = vadd.xlane.f32.xlu1 %v4451_v39  ;;  %v3180_v41 = vpop.xlane.xlu0 %3179 }
 0x510   :  { %8906 = vst [vmem:[#allocation85_spill] sm:$0xff] %v7708_v51  ;;  %6172 = vpow2.f32 %v3289_v58  ;;  %v4333_v9 = vmul.f32 1.442695, %v4317_v47  ;;  %v4318_v57 = vsub.f32 %v7436_v20, %v7708_v51  ;;  %v7712_v36 = vmax.f32 %v3180_v41, -1e+30 }
 0x511   :  { %v4226_v0 = vpop.xlane.xlu1 %4225 }
 0x512   :  { %8907 = vst [vmem:[#allocation86_spill] sm:$0xff] %v7712_v36  ;;  %6174 = vpow2.f32 %v4333_v9  ;;  %v4335_v52 = vmul.f32 1.442695, %v4318_v57  ;;  %v7714_v45 = vmax.f32 %v4226_v0, -1e+30  ;;  %v3273_v15 = vsub.f32 %v7441_v54, %v7712_v36 }
 0x513   :  { %v3182_v34 = vpop.xlane.xlu0 %3181 }
 0x514   :  { %8908 = vst [vmem:[#allocation87_spill] sm:$0xff] %v7714_v45  ;;  %6176 = vpow2.f32 %v4335_v52  ;;  %v7718_v61 = vmax.f32 %v3182_v34, -1e+30  ;;  %v4319_v47 = vsub.f32 %v7443_v30, %v7714_v45  ;;  %v3291_v5 = vmul.f32 1.442695, %v3273_v15 }
 0x516   :  { %8909 = vst [vmem:[#allocation88_spill] sm:$0xff] %v7718_v61  ;;  %v3274_v41 = vsub.f32 %v7446_v59, %v7718_v61  ;;  %v4337_v52 = vmul.f32 1.442695, %v4319_v47  ;;  %6178 = vpow2.f32 %v3291_v5  ;;  %v3631_v5 = vsub.f32 %v7434_v29, %v7338_v48 }
 0x517   :  { %v4228_v39 = vpop.xlane.xlu0 %4227 }
 0x518   :  { %v6171_v58 = vpop.eup %6170  ;;  %v7724_v9 = vmax.f32 %v4228_v39, -1e+30  ;;  %v3293_v51 = vmul.f32 1.442695, %v3274_v41  ;;  %6180 = vpow2.f32 %v4337_v52 }
 0x519   :  { %v3374_v57 = vmul.f32 %v6171_v58, %v7494_v8  ;;  %v3630_v58 = vsub.f32 %v7430_v25, %v7334_v38 }
 0x51a   :  { %8910 = vst [vmem:[#allocation89_spill] sm:$0xff] %v7724_v9  ;;  %v6173_v0 = vpop.eup %6172  ;;  %v4320_v36 = vsub.f32 %v7448_v50, %v7724_v9  ;;  %6182 = vpow2.f32 %v3293_v51 }
 0x51b   :  { %v3184_v34 = vpop.xlane.xlu0 %3183  ;;  %3518 = vadd.xlane.f32.xlu0 %v3374_v57  ;;  %v3375_v24 = vmul.f32 %v6173_v0, %v7494_v8  ;;  %v3646_v41 = vmul.f32 %v3630_v58, %v3374_v57 }
 0x51c   :  { %v6175_v45 = vpop.eup %6174  ;;  %v4339_v39 = vmul.f32 1.442695, %v4320_v36  ;;  %v8912_v36 = vld [vmem:[#allocation29_spill] sm:$0xff]  ;;  %v7742_v52 = vmax.f32 %v3184_v34, -1e+30 }
 0x51d   :  { %3520 = vadd.xlane.f32.xlu1 %v3375_v24  ;;  %v4420_v15 = vmul.f32 %v6175_v45, %v7516_v26  ;;  %v4676_v0 = vsub.f32 %v7432_v14, %v8912_v36  ;;  %v3647_v25 = vmul.f32 %v3631_v5, %v3375_v24  ;;  %v8917_v5 = vld [vmem:[#allocation43_spill] sm:$0xff] }
 0x51e   :  { %v6177_v61 = vpop.eup %6176  ;;  %6184 = vpow2.f32 %v4339_v39  ;;  %8913 = vst [vmem:[#allocation29_spill] sm:$0xff] %v7742_v52 }
 0x51f   :  { %v4230_v47 = vpop.xlane.xlu0 %4229  ;;  %4564 = vadd.xlane.f32.xlu0 %v4420_v15  ;;  %v4421_v9 = vmul.f32 %v6177_v61, %v7516_v26  ;;  %v8914_v61 = vld [vmem:[#allocation27_spill] sm:$0xff]  ;;  %v4692_v48 = vmul.f32 %v4676_v0, %v4420_v15 }
 0x520   :  { %v7734_v44 = vmax.f32 %v4230_v47, -1e+30  ;;  %v4677_v47 = vsub.f32 %v7436_v20, %v8914_v61  ;;  %v6179_v29 = vpop.eup %6178  ;;  %v8920_v61 = vld [vmem:[#allocation31_spill] sm:$0xff] }
 0x521   :  { %4566 = vadd.xlane.f32.xlu1 %v4421_v9  ;;  %v3376_v24 = vmul.f32 %v6179_v29, %v7494_v8 }
 0x522   :  { %8911 = vst [vmem:[#allocation90_spill] sm:$0xff] %v7734_v44  ;;  %v4321_v45 = vsub.f32 %v7455_v16, %v7734_v44  ;;  %v4693_v39 = vmul.f32 %v4677_v47, %v4421_v9  ;;  %v6181_v58 = vpop.eup %6180  ;;  %v8915_v44 = vld [vmem:[#allocation41_spill] sm:$0xff]  ;;  %v4678_v47 = vsub.f32 %v7443_v30, %v8920_v61  ;;  %v8926_v61 = vld [vmem:[#allocation28_spill] sm:$0xff] }
 0x523   :  { %v3186_v38 = vpop.xlane.xlu0 %3185  ;;  %3662 = vadd.xlane.f32.xlu0 %v3646_v41  ;;  %v3275_v14 = vsub.f32 %v8915_v44, %v7742_v52  ;;  %v8924_v52 = vld [vmem:[#allocation32_spill] sm:$0xff] }
 0x524   :  { %v4341_v51 = vmul.f32 1.442695, %v4321_v45  ;;  %v6183_v34 = vpop.eup %6182  ;;  %v4422_v45 = vmul.f32 %v6181_v58, %v7516_v26  ;;  %v4679_v30 = vsub.f32 %v7448_v50, %v8924_v52  ;;  %v8928_v52 = vld [vmem:[#allocation30_spill] sm:$0xff] }
 0x525   :  { %3664 = vadd.xlane.f32.xlu1 %v3647_v25  ;;  %v3295_v0 = vmul.f32 1.442695, %v3275_v14  ;;  %v7756_v25 = vmax.f32 %v3186_v38, -1e+30  ;;  %v8922_v38 = vld [vmem:[#allocation42_spill] sm:$0xff] }
 0x526   :  { %6186 = vpow2.f32 %v4341_v51 }
 0x527   :  { %v4232_v57 = vpop.xlane.xlu0 %4231  ;;  %4708 = vadd.xlane.f32.xlu0 %v4692_v48  ;;  %8919 = vst [vmem:[#allocation43_spill] sm:$0xff] %v7756_v25  ;;  %v3377_v48 = vmul.f32 %v6183_v34, %v7494_v8  ;;  %v3276_v14 = vsub.f32 %v8922_v38, %v7756_v25  ;;  %v8925_v34 = vld [vmem:[#allocation47_spill] sm:$0xff] }
 0x528   :  { %v7748_v36 = vmax.f32 %v4232_v57, -1e+30  ;;  %v6185_v9 = vpop.eup %6184 }
 0x529   :  { %4710 = vadd.xlane.f32.xlu1 %v4693_v39  ;;  %v4694_v39 = vmul.f32 %v4678_v47, %v4422_v45  ;;  %v3297_v47 = vmul.f32 1.442695, %v3276_v14  ;;  %v4681_v14 = vsub.f32 %v8917_v5, %v7362_v56 }
 0x52a   :  { %8916 = vst [vmem:[#allocation27_spill] sm:$0xff] %v7748_v36  ;;  %v4322_v20 = vsub.f32 %v8917_v5, %v7748_v36  ;;  %v4423_v36 = vmul.f32 %v6185_v9, %v7516_v26 }
 0x52b   :  { %v7753_v41 = vpop.xlane.xlu1 %3582  ;;  %v3188_v15 = vpop.xlane.xlu0 %3187  ;;  %3522 = vadd.xlane.f32.xlu0 %v3376_v24 }
 0x52c   :  { %8918 = vst [vmem:[#allocation41_spill] sm:$0xff] %v7753_v41  ;;  %v4343_v51 = vmul.f32 1.442695, %v4322_v20  ;;  %v4695_v9 = vmul.f32 %v4679_v30, %v4423_v36 }
 0x52d   :  { %4568 = vadd.xlane.f32.xlu1 %v4422_v45 }
 0x52e   :  { %6188 = vpow2.f32 %v4343_v51 }
 0x52f   :  { %v7761_v29 = vpop.xlane.xlu1 %4630  ;;  %v4234_v57 = vpop.xlane.xlu0 %4233  ;;  %3524 = vadd.xlane.f32.xlu0 %v3377_v48  ;;  %6190 = vpow2.f32 %v3295_v0 }
 0x530   :  { %8921 = vst [vmem:[#allocation31_spill] sm:$0xff] %v7761_v29  ;;  %v6187_v58 = vpop.eup %6186  ;;  %v7766_v20 = vmax.f32 %v4234_v57, -1e+30  ;;  %v3632_v29 = vsub.f32 %v7441_v54, %v8926_v61  ;;  %v8927_v57 = vld [vmem:[#allocation34_spill] sm:$0xff] }
 0x531   :  { %4712 = vadd.xlane.f32.xlu1 %v4694_v39  ;;  %v4424_v0 = vmul.f32 %v6187_v58, %v7516_v26  ;;  %v4680_v37 = vsub.f32 %v7455_v16, %v8927_v57  ;;  %v3633_v39 = vsub.f32 %v7446_v59, %v8928_v52 }
 0x532   :  { %8923 = vst [vmem:[#allocation42_spill] sm:$0xff] %v7766_v20  ;;  %v4323_v51 = vsub.f32 %v8925_v34, %v7766_v20  ;;  %v3648_v50 = vmul.f32 %v3632_v29, %v3376_v24  ;;  %v8930_v29 = vld [vmem:[#allocation49_spill] sm:$0xff] }
 0x533   :  { %v3190_v45 = vpop.xlane.xlu0 %3189  ;;  %4570 = vadd.xlane.f32.xlu0 %v4423_v36  ;;  %v7775_v25 = vpop.xlane.xlu1 %3586  ;;  %v4696_v54 = vmul.f32 %v4680_v37, %v4424_v0  ;;  %v3649_v16 = vmul.f32 %v3633_v39, %v3377_v48  ;;  %v8931_v48 = vld [vmem:[#allocation46_spill] sm:$0xff] }
 0x534   :  { %v4345_v41 = vmul.f32 1.442695, %v4323_v51  ;;  %v7790_v51 = vmax.f32 %v3188_v15, -1e+30  ;;  %v4682_v15 = vsub.f32 %v8925_v34, %v7368_v55 }
 0x535   :  { %4714 = vadd.xlane.f32.xlu1 %v4695_v9 }
 0x536   :  { %6192 = vpow2.f32 %v4345_v41  ;;  %v3277_v57 = vsub.f32 %v8931_v48, %v7790_v51 }
 0x537   :  { %v4236_v20 = vpop.xlane.xlu0 %4235  ;;  %3666 = vadd.xlane.f32.xlu0 %v3648_v50  ;;  %6194 = vpow2.f32 %v3297_v47 }
 0x538   :  { %v6189_v61 = vpop.eup %6188  ;;  %v7781_v36 = vpop.xlane.xlu1 %4632  ;;  %v7783_v58 = vmax.f32 %v4236_v20, -1e+30 }
 0x539   :  { %4716 = vadd.xlane.f32.xlu1 %v4696_v54  ;;  %v4425_v24 = vmul.f32 %v6189_v61, %v7516_v26  ;;  %v6191_v41 = vpop.eup %6190 }
 0x53a   :  { %8929 = vst [vmem:[#allocation32_spill] sm:$0xff] %v7783_v58  ;;  %v4324_v59 = vsub.f32 %v8930_v29, %v7783_v58  ;;  %v3378_v20 = vmul.f32 %v6191_v41, %v7494_v8  ;;  %v3299_v41 = vmul.f32 1.442695, %v3277_v57  ;;  %v8937_v57 = vld [vmem:[#allocation33_spill] sm:$0xff] }
 0x53b   :  { %v3192_v30 = vpop.xlane.xlu0 %3191  ;;  %3668 = vadd.xlane.f32.xlu0 %v3649_v16  ;;  %v4697_v37 = vmul.f32 %v4681_v14, %v4425_v24 }
 0x53c   :  { %v4347_v9 = vmul.f32 1.442695, %v4324_v59  ;;  %v7792_v47 = vpop.xlane.xlu1 %3588  ;;  %v7808_v59 = vmax.f32 %v3190_v45, -1e+30  ;;  %v4683_v45 = vsub.f32 %v8930_v29, %v7372_v7 }
 0x53d   :  { %4718 = vadd.xlane.f32.xlu1 %v4697_v37 }
 0x53e   :  { %6196 = vpow2.f32 %v4347_v9  ;;  %8933 = vst [vmem:[#allocation28_spill] sm:$0xff] %v7808_v59 }
 0x53f   :  { %v4238_v56 = vpop.xlane.xlu0 %4237  ;;  %3526 = vadd.xlane.f32.xlu0 %v3378_v20 }
 0x540   :  { %v6193_v5 = vpop.eup %6192  ;;  %v7797_v50 = vpop.xlane.xlu1 %4634  ;;  %v7799_v52 = vmax.f32 %v4238_v56, -1e+30 }
 0x541   :  { %v4426_v39 = vmul.f32 %v6193_v5, %v7516_v26  ;;  %v6195_v54 = vpop.eup %6194  ;;  %v8935_v5 = vld [vmem:[#allocation48_spill] sm:$0xff] }
 0x542   :  { %8932 = vst [vmem:[#allocation47_spill] sm:$0xff] %v7799_v52  ;;  %v4325_v61 = vsub.f32 %v7489_v60, %v7799_v52  ;;  %v3379_v56 = vmul.f32 %v6195_v54, %v7494_v8  ;;  %v3278_v52 = vsub.f32 %v8935_v5, %v7808_v59 }
 0x543   :  { %v7806_v14 = vpop.xlane.xlu0 %4628  ;;  %4572 = vadd.xlane.f32.xlu0 %v4424_v0  ;;  %v4698_v16 = vmul.f32 %v4682_v15, %v4426_v39  ;;  %v3634_v15 = vsub.f32 %v8915_v44, %v8937_v57 }
 0x544   :  { %v4349_v37 = vmul.f32 1.442695, %v4325_v61  ;;  %v7810_v9 = vpop.xlane.xlu1 %3590 }
 0x545   :  { %8934 = vst [vmem:[#allocation34_spill] sm:$0xff] %v7810_v9  ;;  %4720 = vadd.xlane.f32.xlu1 %v4698_v16  ;;  %v3301_v16 = vmul.f32 1.442695, %v3278_v52  ;;  %v3650_v59 = vmul.f32 %v3634_v15, %v3378_v20  ;;  %v8940_v9 = vld [vmem:[#allocation35_spill] sm:$0xff]  ;;  %v4684_v52 = vsub.f32 %v7489_v60, %v7378_v18  ;;  %v8944_v18 = vld [vmem:[#allocation52_spill] sm:$0xff] }
 0x546   :  { %6198 = vpow2.f32 %v4349_v37  ;;  %v3635_v7 = vsub.f32 %v8922_v38, %v8940_v9  ;;  %v7840_v9 = vmax.f32 %v3192_v30, -1e+30 }
 0x547   :  { %v3194_v55 = vpop.xlane.xlu0 %3193  ;;  %3528 = vadd.xlane.f32.xlu0 %v3379_v56  ;;  %6200 = vpow2.f32 %v3299_v41 }
 0x548   :  { %v6197_v34 = vpop.eup %6196  ;;  %v7815_v58 = vpop.xlane.xlu1 %4636  ;;  %6202 = vpow2.f32 %v3301_v16  ;;  %8942 = vst [vmem:[#allocation33_spill] sm:$0xff] %v7840_v9  ;;  %v3279_v60 = vsub.f32 %v8944_v18, %v7840_v9 }
 0x549   :  { %8936 = vst [vmem:[#allocation30_spill] sm:$0xff] %v7815_v58  ;;  %v4427_v0 = vmul.f32 %v6197_v34, %v7516_v26 }
 0x54b   :  { %v4240_v61 = vpop.xlane.xlu0 %4239  ;;  %4574 = vadd.xlane.f32.xlu0 %v4425_v24  ;;  %v4699_v54 = vmul.f32 %v4683_v45, %v4427_v0  ;;  %v3651_v45 = vmul.f32 %v3635_v7, %v3379_v56 }
 0x54c   :  { %v7822_v37 = vpop.xlane.xlu1 %3592  ;;  %v7824_v41 = vmax.f32 %v4240_v61, -1e+30 }
 0x54d   :  { %8938 = vst [vmem:[#allocation49_spill] sm:$0xff] %v7822_v37  ;;  %4722 = vadd.xlane.f32.xlu1 %v4699_v54  ;;  %v9028_v37 = vld [vmem:[#allocation39_spill] sm:$0xff] }
 0x54e   :  { %8939 = vst [vmem:[#allocation46_spill] sm:$0xff] %v7824_v41  ;;  %v4326_v58 = vsub.f32 %v7503_v35, %v7824_v41 }
 0x54f   :  { %v7830_v29 = vpop.xlane.xlu0 %3584  ;;  %3670 = vadd.xlane.f32.xlu0 %v3650_v59 }
 0x550   :  { %v6199_v44 = vpop.eup %6198  ;;  %v4351_v24 = vmul.f32 1.442695, %v4326_v58  ;;  %v7832_v34 = vpop.xlane.xlu1 %4638 }
 0x551   :  { %8941 = vst [vmem:[#allocation48_spill] sm:$0xff] %v7832_v34  ;;  %v7837_v20 = vmul.f32 %v6199_v44, %v7516_v26  ;;  %v6201_v57 = vpop.eup %6200 }
 0x552   :  { %6204 = vpow2.f32 %v4351_v24  ;;  %v3380_v58 = vmul.f32 %v6201_v57, %v7494_v8  ;;  %v6203_v16 = vpop.eup %6202  ;;  %v3303_v24 = vmul.f32 1.442695, %v3279_v60  ;;  %v4685_v57 = vsub.f32 %v7503_v35, %v7382_v33 }
 0x553   :  { %v3196_v15 = vpop.xlane.xlu0 %3195  ;;  %3672 = vadd.xlane.f32.xlu0 %v3651_v45  ;;  %v4700_v38 = vmul.f32 %v4684_v52, %v7837_v20  ;;  %v7855_v52 = vmax.f32 %v3194_v55, -1e+30 }
 0x554   :  { %v7842_v59 = vpop.xlane.xlu1 %3594 }
 0x555   :  { %8943 = vst [vmem:[#allocation35_spill] sm:$0xff] %v7842_v59  ;;  %4724 = vadd.xlane.f32.xlu1 %v4700_v38  ;;  %8947 = vst [vmem:[#allocation92_spill] sm:$0xff] %v7855_v52  ;;  %v7864_v38 = vld [vmem:[%s8661_s10] ss:$0 sm:$0xff]  ;;  %v3280_v60 = vsub.f32 %v7498_v28, %v7855_v52 }
 0x557   :  { %v4242_v61 = vpop.xlane.xlu0 %4241  ;;  %3530 = vadd.xlane.f32.xlu0 %v3380_v58 }
 0x558   :  { %v7847_v56 = vpop.xlane.xlu1 %4640  ;;  %v7849_v54 = vmax.f32 %v4242_v61, -1e+30  ;;  %v3381_v61 = vmul.f32 %v7864_v38, %v6203_v16 }
 0x559   :  { %8945 = vst [vmem:[#allocation52_spill] sm:$0xff] %v7847_v56 }
 0x55a   :  { %8946 = vst [vmem:[#allocation91_spill] sm:$0xff] %v7849_v54  ;;  %v4327_v7 = vsub.f32 %v7523_v4, %v7849_v54 }
 0x55b   :  { %v7853_v30 = vpop.xlane.xlu0 %3197  ;;  %4576 = vadd.xlane.f32.xlu0 %v4426_v39 }
 0x55c   :  { %v6205_v44 = vpop.eup %6204  ;;  %v4353_v8 = vmul.f32 1.442695, %v4327_v7  ;;  %v7857_v45 = vpop.xlane.xlu1 %3596 }
 0x55d   :  { %8948 = vst [vmem:[#allocation93_spill] sm:$0xff] %v7857_v45  ;;  %v7868_v54 = vmul.f32 %v6205_v44, %v7516_v26  ;;  %v3636_v26 = vsub.f32 %v8931_v48, %v7366_v3  ;;  %v3305_v44 = vmul.f32 1.442695, %v3280_v60  ;;  %v4686_v3 = vsub.f32 %v7523_v4, %v7388_v27  ;;  %v8969_v45 = vld [vmem:[#allocation54_spill] sm:$0xff] }
 0x55e   :  { %6206 = vpow2.f32 %v4353_v8 }
 0x55f   :  { %v4244_v39 = vpop.xlane.xlu0 %4243  ;;  %3532 = vadd.xlane.f32.xlu0 %v3381_v61  ;;  %v4701_v55 = vmul.f32 %v4685_v57, %v7868_v54  ;;  %6208 = vpow2.f32 %v3303_v24  ;;  %v3652_v57 = vmul.f32 %v3636_v26, %v3380_v58 }
 0x560   :  { %v7873_v33 = vpop.xlane.xlu1 %4642  ;;  %v7875_v35 = vmax.f32 %v4244_v39, -1e+30  ;;  %v3637_v39 = vsub.f32 %v8935_v5, %v7370_v49 }
 0x561   :  { %8949 = vst [vmem:[#allocation94_spill] sm:$0xff] %v7873_v33  ;;  %4726 = vadd.xlane.f32.xlu1 %v4701_v55 }
 0x562   :  { %8950 = vst [vmem:[#allocation95_spill] sm:$0xff] %v7875_v35  ;;  %v4328_v16 = vsub.f32 %v7530_v40, %v7875_v35  ;;  %v3653_v48 = vmul.f32 %v3637_v39, %v3381_v61 }
 0x563   :  { %v7881_v7 = vpop.xlane.xlu0 %3199  ;;  %4578 = vadd.xlane.f32.xlu0 %v4427_v0  ;;  %v7896_v0 = vld [vmem:[%s8662_s11] ss:$0 sm:$0xff] }
 0x564   :  { %v4355_v8 = vmul.f32 1.442695, %v4328_v16  ;;  %v7883_v24 = vpop.xlane.xlu1 %3598  ;;  %v7906_v16 = vmax.f32 %v3196_v15, -1e+30  ;;  %v4687_v15 = vsub.f32 %v7530_v40, %v7392_v43  ;;  %v8960_v43 = vld [vmem:[#allocation44_spill] sm:$0xff] }
 0x565   :  { %8951 = vst [vmem:[#allocation96_spill] sm:$0xff] %v7883_v24  ;;  %v3454_v40 = vsub.f32 -1e+30, %v8960_v43 }
 0x566   :  { %6210 = vpow2.f32 %v4355_v8  ;;  %8954 = vst [vmem:[#allocation99_spill] sm:$0xff] %v7906_v16  ;;  %v3281_v8 = vsub.f32 %v7520_v19, %v7906_v16  ;;  %v8967_v16 = vld [vmem:[#allocation50_spill] sm:$0xff] }
 0x567   :  { %v4246_v41 = vpop.xlane.xlu0 %4245  ;;  %3674 = vadd.xlane.f32.xlu0 %v3652_v57  ;;  %6212 = vpow2.f32 %v3305_v44  ;;  %v3456_v33 = vsub.f32 -1e+30, %v8967_v16 }
 0x568   :  { %v6207_v55 = vpop.eup %6206  ;;  %v7887_v35 = vpop.xlane.xlu1 %4644  ;;  %v7889_v52 = vmax.f32 %v4246_v41, -1e+30 }
 0x569   :  { %8952 = vst [vmem:[#allocation97_spill] sm:$0xff] %v7887_v35  ;;  %v7899_v58 = vmul.f32 %v7896_v0, %v6207_v55  ;;  %v6209_v49 = vpop.eup %6208 }
 0x56a   :  { %8953 = vst [vmem:[#allocation98_spill] sm:$0xff] %v7889_v52  ;;  %v4329_v5 = vsub.f32 %v7544_v42, %v7889_v52  ;;  %v3382_v61 = vmul.f32 %v7864_v38, %v6209_v49 }
 0x56b   :  { %v7903_v60 = vpop.xlane.xlu0 %3201  ;;  %3676 = vadd.xlane.f32.xlu0 %v3653_v48  ;;  %v4702_v41 = vmul.f32 %v4686_v3, %v7899_v58 }
 0x56c   :  { %v4357_v4 = vmul.f32 1.442695, %v4329_v5  ;;  %v7908_v27 = vpop.xlane.xlu1 %3600 }
 0x56d   :  { %8955 = vst [vmem:[#allocation100_spill] sm:$0xff] %v7908_v27  ;;  %4728 = vadd.xlane.f32.xlu1 %v4702_v41  ;;  %v3307_v41 = vmul.f32 1.442695, %v3281_v8 }
 0x56e   :  { %6214 = vpow2.f32 %v4357_v4  ;;  %v7929_v4 = vmax.f32 %v7853_v30, -1e+30 }
 0x56f   :  { %v4248_v26 = vpop.xlane.xlu0 %4247  ;;  %3534 = vadd.xlane.f32.xlu0 %v3382_v61 }
 0x570   :  { %v6211_v44 = vpop.eup %6210  ;;  %v7913_v57 = vpop.xlane.xlu1 %4646  ;;  %v7915_v39 = vmax.f32 %v4248_v26, -1e+30  ;;  %8958 = vst [vmem:[#allocation103_spill] sm:$0xff] %v7929_v4  ;;  %v3282_v8 = vsub.f32 %v7527_v31, %v7929_v4  ;;  %v3638_v4 = vsub.f32 %v8944_v18, %v7376_v6  ;;  %v3639_v6 = vsub.f32 %v7498_v28, %v7380_v10  ;;  %v8968_v18 = vld [vmem:[#allocation51_spill] sm:$0xff] }
 0x571   :  { %8956 = vst [vmem:[#allocation101_spill] sm:$0xff] %v7913_v57  ;;  %v7920_v55 = vmul.f32 %v7896_v0, %v6211_v44  ;;  %v6213_v3 = vpop.eup %6212 }
 0x572   :  { %8957 = vst [vmem:[#allocation102_spill] sm:$0xff] %v7915_v39  ;;  %v4330_v48 = vsub.f32 %v7554_v62, %v7915_v39  ;;  %v3383_v44 = vmul.f32 %v7864_v38, %v6213_v3  ;;  %v8961_v39 = vld [vmem:[#allocation53_spill] sm:$0xff] }
 0x573   :  { %4580 = vadd.xlane.f32.xlu0 %v7837_v20  ;;  %v7925_v49 = vpop.xlane.xlu0 %3203  ;;  %v4703_v5 = vmul.f32 %v4687_v15, %v7920_v55  ;;  %v4500_v57 = vsub.f32 -1e+30, %v8961_v39 }
 0x574   :  { %v4359_v26 = vmul.f32 1.442695, %v4330_v48  ;;  %v7931_v52 = vpop.xlane.xlu1 %3602  ;;  %v4688_v48 = vsub.f32 %v7544_v42, %v7398_v63  ;;  %v8965_v42 = vld [vmem:[#allocation57_spill] sm:$0xff] }
 0x575   :  { %8959 = vst [vmem:[#allocation104_spill] sm:$0xff] %v7931_v52  ;;  %4730 = vadd.xlane.f32.xlu1 %v4703_v5  ;;  %v3470_v5 = vmul.f32 1.442695, %v3454_v40  ;;  %v3455_v63 = vsub.f32 -1e+30, %v8965_v42 }
 0x576   :  { %6216 = vpow2.f32 %v4359_v26  ;;  %v8964_v26 = vld [vmem:[#allocation45_spill] sm:$0xff]  ;;  %v3309_v40 = vmul.f32 1.442695, %v3282_v8 }
 0x577   :  { %3536 = vadd.xlane.f32.xlu0 %v3383_v44  ;;  %v4250_v20 = vpop.xlane.xlu0 %4249  ;;  %6218 = vpow2.f32 %v3307_v41  ;;  %v4501_v52 = vsub.f32 -1e+30, %v8964_v26  ;;  %v4516_v41 = vmul.f32 1.442695, %v4500_v57  ;;  %v3654_v57 = vmul.f32 %v3638_v4, %v3382_v61 }
 0x578   :  { %v6215_v27 = vpop.eup %6214  ;;  %v7938_v30 = vpop.xlane.xlu1 %4648  ;;  %v7940_v15 = vmax.f32 %v4250_v20, -1e+30  ;;  %6220 = vpow2.f32 %v3470_v5  ;;  %v3472_v56 = vmul.f32 1.442695, %v3455_v63  ;;  %v3474_v61 = vmul.f32 1.442695, %v3456_v33 }
 0x579   :  { %8962 = vst [vmem:[#allocation44_spill] sm:$0xff] %v7938_v30  ;;  %v7945_v3 = vmul.f32 %v7896_v0, %v6215_v27  ;;  %v3655_v4 = vmul.f32 %v3639_v6, %v3383_v44  ;;  %v7980_v33 = vmax.f32 %v7881_v7, -1e+30  ;;  %v8977_v6 = vld [vmem:[#allocation59_spill] sm:$0xff] }
 0x57a   :  { %8963 = vst [vmem:[#allocation53_spill] sm:$0xff] %v7940_v15  ;;  %v4331_v35 = vsub.f32 %v7566_v1, %v7940_v15  ;;  %v4518_v15 = vmul.f32 1.442695, %v4501_v52  ;;  %v4689_v52 = vsub.f32 %v7554_v62, %v7402_v46  ;;  %v8974_v46 = vld [vmem:[#allocation58_spill] sm:$0xff]  ;;  %v8978_v7 = vld [vmem:[#allocation63_spill] sm:$0xff] }
 0x57b   :  { %4582 = vadd.xlane.f32.xlu0 %v7868_v54  ;;  %v7953_v20 = vpop.xlane.xlu0 %3205  ;;  %v4704_v30 = vmul.f32 %v4688_v48, %v7945_v3  ;;  %v4502_v54 = vsub.f32 -1e+30, %v8968_v18  ;;  %v3457_v48 = vsub.f32 -1e+30, %v8969_v45  ;;  %v4504_v62 = vsub.f32 -1e+30, %v8974_v46 }
 0x57c   :  { %v4361_v27 = vmul.f32 1.442695, %v4331_v35  ;;  %v7957_v24 = vpop.xlane.xlu1 %3604  ;;  %8975 = vst [vmem:[#allocation106_spill] sm:$0xff] %v7980_v33 }
 0x57d   :  { %8966 = vst [vmem:[#allocation45_spill] sm:$0xff] %v7957_v24  ;;  %4732 = vadd.xlane.f32.xlu1 %v4704_v30  ;;  %v8972_v30 = vld [vmem:[#allocation55_spill] sm:$0xff] }
 0x57e   :  { %6222 = vpow2.f32 %v4361_v27  ;;  %v3476_v27 = vmul.f32 1.442695, %v3457_v48 }
 0x57f   :  { %6224 = vpow2.f32 %v4516_v41  ;;  %3678 = vadd.xlane.f32.xlu0 %v3654_v57  ;;  %v4252_v8 = vpop.xlane.xlu0 %4251  ;;  %v4503_v41 = vsub.f32 -1e+30, %v8972_v30  ;;  %v8973_v57 = vld [vmem:[#allocation56_spill] sm:$0xff] }
 0x580   :  { %v6217_v35 = vpop.eup %6216  ;;  %6226 = vpow2.f32 %v3309_v40  ;;  %v7964_v5 = vpop.xlane.xlu1 %4650  ;;  %v7966_v24 = vmax.f32 %v4252_v8, -1e+30  ;;  %v4520_v40 = vmul.f32 1.442695, %v4502_v54  ;;  %v3458_v8 = vsub.f32 -1e+30, %v8973_v57 }
 0x581   :  { %8970 = vst [vmem:[#allocation57_spill] sm:$0xff] %v7964_v5  ;;  %v7971_v10 = vmul.f32 %v7896_v0, %v6217_v35  ;;  %v6219_v28 = vpop.eup %6218  ;;  %6228 = vpow2.f32 %v4518_v15  ;;  %v3459_v35 = vsub.f32 -1e+30, %v8977_v6  ;;  %v4522_v48 = vmul.f32 1.442695, %v4503_v41  ;;  %v8998_v57 = vld [vmem:[#allocation74_spill] sm:$0xff] }
 0x582   :  { %8971 = vst [vmem:[#allocation105_spill] sm:$0xff] %v7966_v24  ;;  %v4332_v63 = vsub.f32 %v7574_v21, %v7966_v24  ;;  %6230 = vpow2.f32 %v3472_v56  ;;  %v7986_v54 = vmul.f32 %v7864_v38, %v6219_v28  ;;  %v3478_v56 = vmul.f32 1.442695, %v3458_v8 }
 0x583   :  { %3680 = vadd.xlane.f32.xlu0 %v3655_v4  ;;  %v4705_v5 = vmul.f32 %v4689_v52, %v7971_v10  ;;  %6232 = vpow2.f32 %v3474_v61  ;;  %v4505_v4 = vsub.f32 -1e+30, %v7562_v12  ;;  %v7989_v52 = vpop.eup %6220  ;;  %v3460_v24 = vsub.f32 -1e+30, %v8978_v7 }
 0x584   :  { %v4363_v44 = vmul.f32 1.442695, %v4332_v63  ;;  %v7982_v15 = vpop.xlane.xlu1 %3606  ;;  %v4524_v61 = vmul.f32 1.442695, %v4504_v62  ;;  %v8981_v62 = vld [vmem:[#allocation65_spill] sm:$0xff] }
 0x585   :  { %8976 = vst [vmem:[#allocation107_spill] sm:$0xff] %v7982_v15  ;;  %4734 = vadd.xlane.f32.xlu1 %v4705_v5  ;;  %v3283_v5 = vsub.f32 %v7542_v23, %v7980_v33  ;;  %v3480_v15 = vmul.f32 1.442695, %v3459_v35  ;;  %v3461_v6 = vsub.f32 -1e+30, %v8981_v62 }
 0x586   :  { %6234 = vpow2.f32 %v4363_v44  ;;  %v4690_v44 = vsub.f32 %v7566_v1, %v7408_v11  ;;  %v3482_v33 = vmul.f32 1.442695, %v3460_v24  ;;  %v8982_v11 = vld [vmem:[#allocation67_spill] sm:$0xff]  ;;  %v3465_v9 = vsub.f32 -1e+30, %v8998_v57 }
 0x587   :  { %6236 = vpow2.f32 %v4520_v40  ;;  %3538 = vadd.xlane.f32.xlu0 %v7986_v54  ;;  %v8980_v40 = vld [vmem:[#allocation64_spill] sm:$0xff]  ;;  %v3462_v35 = vsub.f32 -1e+30, %v8982_v11 }
 0x588   :  { %v6223_v63 = vpop.eup %6222  ;;  %6238 = vpow2.f32 %v3476_v27  ;;  %v7995_v28 = vpop.xlane.xlu1 %4652  ;;  %v4506_v8 = vsub.f32 -1e+30, %v8980_v40  ;;  %v4526_v27 = vmul.f32 1.442695, %v4505_v4  ;;  %v8013_v40 = vmax.f32 %v7903_v60, -1e+30 }
 0x589   :  { %8979 = vst [vmem:[#allocation108_spill] sm:$0xff] %v7995_v28  ;;  %v7997_v41 = vpop.eup %6224  ;;  %v8003_v7 = vmul.f32 %v7896_v0, %v6223_v63  ;;  %6240 = vpow2.f32 %v4522_v48  ;;  %v4507_v28 = vsub.f32 -1e+30, %v7594_v2  ;;  %v3311_v63 = vmul.f32 1.442695, %v3283_v5  ;;  %v8986_v5 = vld [vmem:[#allocation69_spill] sm:$0xff] }
 0x58a   :  { %v6227_v12 = vpop.eup %6226  ;;  %6242 = vpow2.f32 %v3478_v56  ;;  %8983 = vst [vmem:[#allocation109_spill] sm:$0xff] %v8013_v40  ;;  %v4528_v48 = vmul.f32 1.442695, %v4506_v8  ;;  %v3469_v4 = vsub.f32 -1e+30, %v7636_v32  ;;  %v8987_v32 = vld [vmem:[#allocation70_spill] sm:$0xff] }
 0x58b   :  { %4584 = vadd.xlane.f32.xlu0 %v7899_v58  ;;  %v4706_v46 = vmul.f32 %v4690_v44, %v8003_v7  ;;  %v8009_v1 = vpop.eup %6228  ;;  %6244 = vpow2.f32 %v4524_v61  ;;  %v3385_v24 = vmul.f32 %v7864_v38, %v6227_v12  ;;  %v3484_v58 = vmul.f32 1.442695, %v3461_v6  ;;  %v8984_v44 = vld [vmem:[#allocation68_spill] sm:$0xff] }
 0x58c   :  { %6246 = vpow2.f32 %v3480_v15  ;;  %v8017_v56 = vpop.eup %6230  ;;  %v4508_v2 = vsub.f32 -1e+30, %v8984_v44  ;;  %v8020_v61 = vpop.xlane.xlu1 %3608  ;;  %v4530_v60 = vmul.f32 1.442695, %v4507_v28  ;;  %v3463_v15 = vsub.f32 -1e+30, %v8986_v5 }
 0x58d   :  { %4736 = vadd.xlane.f32.xlu1 %v4706_v46  ;;  %6248 = vpow2.f32 %v4526_v27  ;;  %8985 = vst [vmem:[#allocation110_spill] sm:$0xff] %v8020_v61  ;;  %v8022_v11 = vpop.eup %6232  ;;  %v4691_v46 = vsub.f32 %v7574_v21, %v7412_v13  ;;  %v3486_v12 = vmul.f32 1.442695, %v3462_v35  ;;  %v3284_v6 = vsub.f32 %v7549_v17, %v8013_v40 }
 0x58e   :  { %6250 = vpow2.f32 %v3482_v33  ;;  %v4509_v61 = vsub.f32 -1e+30, %v8987_v32  ;;  %v3500_v44 = vmul.f32 1.442695, %v3469_v4  ;;  %v3640_v5 = vsub.f32 %v7520_v19, %v7386_v22  ;;  %v8991_v19 = vld [vmem:[#allocation83_spill] sm:$0xff] }
 0x58f   :  { %3540 = vadd.xlane.f32.xlu0 %v3385_v24  ;;  %6252 = vpow2.f32 %v3311_v63  ;;  %v4532_v13 = vmul.f32 1.442695, %v4508_v2  ;;  %v3406_v21 = vsub.f32 -1e+30, %v7694_v53  ;;  %v3488_v35 = vmul.f32 1.442695, %v3463_v15 }
 0x590   :  { %v6235_v8 = vpop.eup %6234  ;;  %6254 = vpow2.f32 %v4528_v48  ;;  %v8988_v63 = vld [vmem:[#allocation71_spill] sm:$0xff]  ;;  %v8048_v22 = vpop.xlane.xlu1 %4654  ;;  %v3407_v2 = vsub.f32 -1e+30, %v8991_v19  ;;  %v8992_v15 = vld [vmem:[#allocation72_spill] sm:$0xff] }
 0x591   :  { %v8029_v27 = vpop.eup %6236  ;;  %v8033_v33 = vmul.f32 %v7896_v0, %v6235_v8  ;;  %6256 = vpow2.f32 %v3484_v58  ;;  %v3464_v40 = vsub.f32 -1e+30, %v8988_v63  ;;  %v3313_v0 = vmul.f32 1.442695, %v3284_v6  ;;  %8990 = vst [vmem:[#allocation112_spill] sm:$0xff] %v8048_v22  ;;  %v8993_v6 = vld [vmem:[#allocation84_spill] sm:$0xff] }
 0x592   :  { %v8035_v28 = vpop.eup %6238  ;;  %6258 = vpow2.f32 %v4530_v60  ;;  %v8046_v8 = vmax.f32 %v7925_v49, -1e+30  ;;  %v4534_v60 = vmul.f32 1.442695, %v4509_v61  ;;  %v4510_v63 = vsub.f32 -1e+30, %v8992_v15 }
 0x593   :  { %4586 = vadd.xlane.f32.xlu0 %v7920_v55  ;;  %v4707_v48 = vmul.f32 %v4691_v46, %v8033_v33  ;;  %v8043_v4 = vpop.eup %6240  ;;  %6260 = vpow2.f32 %v3486_v12  ;;  %v3656_v55 = vmul.f32 %v3640_v5, %v7986_v54  ;;  %v3422_v12 = vmul.f32 1.442695, %v3406_v21  ;;  %v8994_v22 = vld [vmem:[#allocation36_spill] sm:$0xff]  ;;  %v8995_v61 = vld [vmem:[#allocation85_spill] sm:$0xff] }
 0x594   :  { %8989 = vst [vmem:[#allocation111_spill] sm:$0xff] %v8046_v8  ;;  %v8051_v58 = vpop.eup %6242  ;;  %6262 = vpow2.f32 %v3500_v44  ;;  %v4452_v49 = vsub.f32 -1e+30, %v8993_v6  ;;  %v3641_v62 = vsub.f32 %v7527_v31, %v8994_v22  ;;  %v3490_v59 = vmul.f32 1.442695, %v3464_v40  ;;  %v8996_v54 = vld [vmem:[#allocation61_spill] sm:$0xff] }
 0x595   :  { %4738 = vadd.xlane.f32.xlu1 %v4707_v48  ;;  %v8055_v46 = vpop.eup %6244  ;;  %6264 = vpow2.f32 %v4532_v13  ;;  %v4453_v15 = vsub.f32 -1e+30, %v8995_v61  ;;  %v3285_v5 = vsub.f32 %v8996_v54, %v8046_v8  ;;  %v3424_v13 = vmul.f32 1.442695, %v3407_v2  ;;  %v9000_v22 = vld [vmem:[#allocation86_spill] sm:$0xff]  ;;  %v9002_v2 = vld [vmem:[#allocation87_spill] sm:$0xff] }
 0x596   :  { %v8058_v32 = vpop.eup %6246  ;;  %6266 = vpow2.f32 %v3488_v35  ;;  %v4536_v48 = vmul.f32 1.442695, %v4510_v63  ;;  %v3657_v34 = vmul.f32 %v3641_v62, %v3385_v24  ;;  %v8070_v35 = vpop.xlane.xlu1 %3610  ;;  %v4468_v40 = vmul.f32 1.442695, %v4452_v49  ;;  %v9005_v62 = vld [vmem:[#allocation88_spill] sm:$0xff] }
 0x597   :  { %3682 = vadd.xlane.f32.xlu0 %v3656_v55  ;;  %v8063_v44 = vpop.eup %6248  ;;  %6268 = vpow2.f32 %v3313_v0  ;;  %8999 = vst [vmem:[#allocation84_spill] sm:$0xff] %v8070_v35  ;;  %v3408_v55 = vsub.f32 -1e+30, %v9000_v22  ;;  %v4470_v0 = vmul.f32 1.442695, %v4453_v15  ;;  %v4615_v45 = vmul.f32 0.0, %v8043_v4 }
 0x598   :  { %v8067_v21 = vpop.eup %6250  ;;  %6270 = vpow2.f32 %v4534_v60  ;;  %v4454_v8 = vsub.f32 -1e+30, %v9002_v2  ;;  %v3315_v63 = vmul.f32 1.442695, %v3285_v5  ;;  %v8079_v60 = vmax.f32 %v7953_v20, -1e+30 }
 0x599   :  { %8997 = vst [vmem:[#allocation83_spill] sm:$0xff] %v8067_v21  ;;  %v6253_v31 = vpop.eup %6252  ;;  %6272 = vpow2.f32 %v3422_v12  ;;  %v3409_v24 = vsub.f32 -1e+30, %v9005_v62  ;;  %v3492_v49 = vmul.f32 1.442695, %v3465_v9  ;;  %v9011_v9 = vld [vmem:[#allocation62_spill] sm:$0xff] }
 0x59a   :  { %v8073_v30 = vpop.eup %6254  ;;  %6274 = vpow2.f32 %v3490_v59  ;;  %9004 = vst [vmem:[#allocation61_spill] sm:$0xff] %v8079_v60  ;;  %v8085_v35 = vmul.f32 %v7864_v38, %v6253_v31  ;;  %v3426_v57 = vmul.f32 1.442695, %v3408_v55  ;;  %v4472_v20 = vmul.f32 1.442695, %v4454_v8 }
 0x59b   :  { %9001 = vst [vmem:[#allocation36_spill] sm:$0xff] %v8073_v30  ;;  %3684 = vadd.xlane.f32.xlu0 %v3657_v34  ;;  %v8076_v21 = vpop.eup %6256  ;;  %6276 = vpow2.f32 %v3424_v13  ;;  %v9007_v34 = vld [vmem:[#allocation89_spill] sm:$0xff]  ;;  %v3286_v31 = vsub.f32 %v9011_v9, %v8079_v60  ;;  %v4612_v30 = vmul.f32 0.0, %v7997_v41  ;;  %v8167_v16 = vmul.f32 0.0, %v8055_v46 }
 0x59c   :  { %9003 = vst [vmem:[#allocation85_spill] sm:$0xff] %v8076_v21  ;;  %v8082_v12 = vpop.eup %6258  ;;  %6278 = vpow2.f32 %v4536_v48  ;;  %v4455_v59 = vsub.f32 -1e+30, %v9007_v34  ;;  %v3566_v48 = vmul.f32 0.0, %v7989_v52  ;;  %v3428_v21 = vmul.f32 1.442695, %v3409_v24 }
 0x59d   :  { %9006 = vst [vmem:[#allocation86_spill] sm:$0xff] %v8082_v12  ;;  %v8088_v15 = vpop.eup %6260  ;;  %6280 = vpow2.f32 %v4468_v40  ;;  %v8098_v12 = vpop.xlane.xlu1 %4656  ;;  %v4613_v40 = vmul.f32 0.0, %v8009_v1  ;;  %v9016_v52 = vld [vmem:[#allocation31_spill] sm:$0xff]  ;;  %v3317_v60 = vmul.f32 1.442695, %v3286_v31  ;;  %v4614_v34 = vmul.f32 0.0, %v8029_v27 }
 0x59e   :  { %9008 = vst [vmem:[#allocation113_spill] sm:$0xff] %v8088_v15  ;;  %v8090_v5 = vpop.eup %6262  ;;  %6282 = vpow2.f32 %v4470_v0  ;;  %9012 = vst [vmem:[#allocation62_spill] sm:$0xff] %v8098_v12  ;;  %v4474_v55 = vmul.f32 1.442695, %v4455_v59  ;;  %v9014_v0 = vld [vmem:[#allocation41_spill] sm:$0xff]  ;;  %v3567_v12 = vmul.f32 0.0, %v8017_v56  ;;  %v8110_v1 = vpop.xlane.xlu0 %3612 }
 0x59f   :  { %9009 = vst [vmem:[#allocation114_spill] sm:$0xff] %v8090_v5  ;;  %3542 = vadd.xlane.f32.xlu0 %v8085_v35  ;;  %v8093_v13 = vpop.eup %6264  ;;  %6284 = vpow2.f32 %v3315_v63  ;;  %v3614_v8 = vadd.f32 %v9014_v0, %v3566_v48  ;;  %v4661_v63 = vadd.f32 %v9016_v52, %v4613_v40  ;;  %9017 = vst [vmem:[#allocation31_spill] sm:$0xff] %v8110_v1  ;;  %v8161_v27 = vmul.f32 0.0, %v8051_v58 }
 0x5a0   :  { %9010 = vst [vmem:[#allocation115_spill] sm:$0xff] %v8093_v13  ;;  %v8100_v15 = vpop.eup %6266  ;;  %6286 = vpow2.f32 %v3492_v49 }
 0x5a1   :  { %9013 = vst [vmem:[#allocation116_spill] sm:$0xff] %v8100_v15  ;;  %v6269_v5 = vpop.eup %6268  ;;  %6288 = vpow2.f32 %v3426_v57  ;;  %v4660_v57 = vadd.f32 %v7806_v14, %v4612_v30  ;;  %v8119_v41 = vpop.xlane.xlu1 %4658  ;;  %v9026_v15 = vld [vmem:[#allocation37_spill] sm:$0xff] }
 0x5a2   :  { %v8104_v13 = vpop.eup %6270  ;;  %6290 = vpow2.f32 %v4472_v20  ;;  %v8116_v59 = vmul.f32 %v7864_v38, %v6269_v5  ;;  %9019 = vst [vmem:[#allocation118_spill] sm:$0xff] %v8119_v41 }
 0x5a3   :  { %9015 = vst [vmem:[#allocation41_spill] sm:$0xff] %v8104_v13  ;;  %4588 = vadd.xlane.f32.xlu0 %v7945_v3  ;;  %v6273_v24 = vpop.eup %6272  ;;  %6292 = vpow2.f32 %v3428_v21  ;;  %v3615_v3 = vadd.f32 %v7830_v29, %v3567_v12 }
 0x5a4   :  { %v8112_v49 = vpop.eup %6274  ;;  %6294 = vpow2.f32 %v4474_v55  ;;  %v8124_v56 = vmul.f32 0.0, %v6273_v24 }
 0x5a5   :  { %9018 = vst [vmem:[#allocation117_spill] sm:$0xff] %v8112_v49  ;;  %v6277_v48 = vpop.eup %6276  ;;  %6296 = vlog2.f32 %v3614_v8 }
 0x5a6   :  { %v8121_v20 = vpop.eup %6278  ;;  %6298 = vlog2.f32 %v4661_v63  ;;  %v8127_v31 = vmul.f32 0.0, %v6277_v48 }
 0x5a7   :  { %9020 = vst [vmem:[#allocation119_spill] sm:$0xff] %v8121_v20  ;;  %3544 = vadd.xlane.f32.xlu0 %v8116_v59  ;;  %v6281_v21 = vpop.eup %6280  ;;  %6300 = vpow2.f32 %v3317_v60  ;;  %v9022_v60 = vld [vmem:[#allocation29_spill] sm:$0xff] }
 0x5a8   :  { %v3519_v14 = vpop.xlane.xlu0 %3518  ;;  %v6283_v30 = vpop.eup %6282  ;;  %6302 = vlog2.f32 %v4660_v57  ;;  %v8133_v0 = vmul.f32 0.0, %v6281_v21  ;;  %v3410_v8 = vsub.f32 -1e+30, %v9022_v60  ;;  %v9023_v57 = vld [vmem:[#allocation90_spill] sm:$0xff] }
 0x5a9   :  { %v3550_v5 = vadd.f32 %v3519_v14, %v8124_v56  ;;  %v6285_v40 = vpop.eup %6284  ;;  %6304 = vlog2.f32 %v3615_v3  ;;  %v8136_v24 = vmul.f32 0.0, %v6283_v30  ;;  %v4456_v48 = vsub.f32 -1e+30, %v9023_v57  ;;  %v9027_v57 = vld [vmem:[#allocation38_spill] sm:$0xff] }
 0x5aa   :  { %v3521_v29 = vpop.xlane.xlu1 %3520  ;;  %v8129_v12 = vpop.eup %6286  ;;  %v8141_v41 = vmul.f32 %v7864_v38, %v6285_v40  ;;  %v3568_v30 = vmul.f32 0.0, %v8022_v11  ;;  %v3430_v13 = vmul.f32 1.442695, %v3410_v8  ;;  %v3569_v11 = vmul.f32 0.0, %v8035_v28 }
 0x5ab   :  { %9021 = vst [vmem:[#allocation120_spill] sm:$0xff] %v8129_v12  ;;  %6306 = vrcp.f32 %v3550_v5  ;;  %v3551_v55 = vadd.f32 %v3521_v29, %v8127_v31  ;;  %4590 = vadd.xlane.f32.xlu0 %v7971_v10  ;;  %v6289_v52 = vpop.eup %6288  ;;  %v9024_v29 = vld [vmem:[#allocation43_spill] sm:$0xff]  ;;  %v4476_v60 = vmul.f32 1.442695, %v4456_v48  ;;  %v4662_v8 = vadd.f32 %v7781_v36, %v4614_v34 }
 0x5ac   :  { %6308 = vlog2.f32 %v3550_v5  ;;  %v4565_v63 = vpop.xlane.xlu0 %4564  ;;  %v6291_v3 = vpop.eup %6290  ;;  %v3411_v10 = vsub.f32 -1e+30, %v9024_v29  ;;  %v9025_v12 = vld [vmem:[#allocation27_spill] sm:$0xff]  ;;  %v3616_v18 = vadd.f32 %v7775_v25, %v3568_v30  ;;  %v8170_v25 = vmul.f32 0.0, %v8058_v32 }
 0x5ad   :  { %6310 = vrcp.f32 %v3551_v55  ;;  %v4596_v14 = vadd.f32 %v4565_v63, %v8133_v0  ;;  %v6293_v21 = vpop.eup %6292  ;;  %v4457_v20 = vsub.f32 -1e+30, %v9025_v12  ;;  %v8176_v34 = vmul.f32 0.0, %v6289_v52 }
 0x5ae   :  { %6312 = vlog2.f32 %v3551_v55  ;;  %v4567_v1 = vpop.xlane.xlu1 %4566  ;;  %v6295_v5 = vpop.eup %6294  ;;  %v8179_v46 = vmul.f32 0.0, %v6291_v3  ;;  %v8181_v32 = vmul.f32 0.0, %v6293_v21  ;;  %v4663_v21 = vadd.f32 %v7797_v50, %v4615_v45 }
 0x5af   :  { %6314 = vrcp.f32 %v4596_v14  ;;  %v4597_v49 = vadd.f32 %v4567_v1, %v8136_v24  ;;  %3546 = vadd.xlane.f32.xlu0 %v8141_v41  ;;  %v6297_v63 = vpop.eup %6296  ;;  %v3432_v1 = vmul.f32 1.442695, %v3411_v10  ;;  %v4478_v2 = vmul.f32 1.442695, %v4457_v20 }
 0x5b0   :  { %6316 = vlog2.f32 %v4596_v14  ;;  %v3663_v55 = vpop.xlane.xlu0 %3662  ;;  %v6299_v12 = vpop.eup %6298  ;;  %v9029_v14 = vld [vmem:[#allocation40_spill] sm:$0xff]  ;;  %v3807_v10 = vmul.f32 0.6931472, %v6297_v63 }
 0x5b1   :  { %6318 = vrcp.f32 %v4597_v49  ;;  %v6301_v62 = vpop.eup %6300  ;;  %v3645_v48 = vsub.f32 %v9011_v9, %v9029_v14  ;;  %v3694_v4 = vadd.f32 %v3663_v55, %v8124_v56  ;;  %v8185_v55 = vmul.f32 0.0, %v6295_v5 }
 0x5b2   :  { %6320 = vlog2.f32 %v4597_v49  ;;  %v3665_v40 = vpop.xlane.xlu1 %3664  ;;  %v6303_v29 = vpop.eup %6302  ;;  %v8173_v58 = vmul.f32 %v7864_v38, %v6301_v62  ;;  %v3838_v62 = vadd.f32 %v3807_v10, %v8960_v43 }
 0x5b3   :  { %4592 = vadd.xlane.f32.xlu0 %v8003_v7  ;;  %6322 = vpow2.f32 %v3430_v13  ;;  %v6305_v28 = vpop.eup %6304  ;;  %v3617_v13 = vadd.f32 %v7792_v47, %v3569_v11 }
 0x5b4   :  { %v4709_v49 = vpop.xlane.xlu0 %4708  ;;  %6324 = vpow2.f32 %v4476_v60 }
 0x5b5   :  { %v6307_v20 = vpop.eup %6306  ;;  %6326 = vpow2.f32 %v3432_v1  ;;  %v4740_v47 = vadd.f32 %v4709_v49, %v8133_v0 }
 0x5b6   :  { %v6309_v7 = vpop.eup %6308  ;;  %v3726_v30 = vmul.f32 %v6307_v20, %v3694_v4  ;;  %v4711_v36 = vpop.xlane.xlu1 %4710  ;;  %6328 = vpow2.f32 %v4478_v2  ;;  %v4855_v2 = vmul.f32 0.6931472, %v6299_v12  ;;  %v4853_v4 = vmul.f32 0.6931472, %v6303_v29 }
 0x5b7   :  { %v6311_v56 = vpop.eup %6310  ;;  %6330 = vlog2.f32 %v3616_v18  ;;  %v3743_v60 = vmul.f32 0.6931472, %v6309_v7  ;;  %3548 = vadd.xlane.f32.xlu0 %v8173_v58  ;;  %v9030_v12 = vsub.f32 %v7542_v23, %v9026_v15  ;;  %v3695_v7 = vadd.f32 %v3665_v40, %v8127_v31 }
 0x5b8   :  { %v6313_v38 = vpop.eup %6312  ;;  %6332 = vlog2.f32 %v4662_v8  ;;  %v3523_v63 = vpop.xlane.xlu0 %3522  ;;  %v4884_v23 = vadd.f32 %v4853_v4, %v8961_v39  ;;  %v3412_v39 = vsub.f32 -1e+30, %v7790_v51 }
 0x5b9   :  { %v6315_v52 = vpop.eup %6314  ;;  %v3745_v11 = vmul.f32 0.6931472, %v6313_v38  ;;  %v3774_v18 = vadd.f32 %v3743_v60, %v7694_v53  ;;  %v3552_v1 = vadd.f32 %v3523_v63, %v8176_v34  ;;  %6334 = vlog2.f32 %v3617_v13 }
 0x5ba   :  { %v6317_v3 = vpop.eup %6316  ;;  %v4772_v20 = vmul.f32 %v6315_v52, %v4740_v47  ;;  %v4569_v43 = vpop.xlane.xlu1 %4568  ;;  %v3658_v53 = vmul.f32 %v9030_v12, %v8085_v35  ;;  %v4741_v60 = vadd.f32 %v4711_v36, %v8136_v24  ;;  %v3809_v35 = vmul.f32 0.6931472, %v6305_v28 }
 0x5bb   :  { %v6319_v8 = vpop.eup %6318  ;;  %v4789_v10 = vmul.f32 0.6931472, %v6317_v3  ;;  %v3790_v0 = vsub.f32 %v3726_v30, %v3774_v18  ;;  %6336 = vrcp.f32 %v3552_v1  ;;  %4594 = vadd.xlane.f32.xlu0 %v8033_v33  ;;  %v3775_v49 = vadd.f32 %v3745_v11, %v8991_v19 }
 0x5bc   :  { %v6321_v5 = vpop.eup %6320  ;;  %6338 = vlog2.f32 %v3552_v1  ;;  %v4598_v50 = vadd.f32 %v4569_v43, %v8179_v46  ;;  %v3525_v45 = vpop.xlane.xlu0 %3524  ;;  %v3727_v15 = vmul.f32 %v6311_v56, %v3695_v7  ;;  %v4773_v63 = vmul.f32 %v6319_v8, %v4741_v60 }
 0x5bd   :  { %v6323_v29 = vpop.eup %6322  ;;  %v4791_v13 = vmul.f32 0.6931472, %v6321_v5  ;;  %v8198_v30 = vadd.f32 %v3838_v62, %v3790_v0  ;;  %v4820_v33 = vadd.f32 %v4789_v10, %v8993_v6  ;;  %v3553_v19 = vadd.f32 %v3525_v45, %v8181_v32 }
 0x5be   :  { %v6325_v38 = vpop.eup %6324  ;;  %6340 = vrcp.f32 %v4598_v50  ;;  %v4885_v6 = vadd.f32 %v4855_v2, %v8964_v26  ;;  %v3791_v24 = vsub.f32 %v3727_v15, %v3775_v49  ;;  %v8216_v1 = vmul.f32 0.0, %v8063_v44  ;;  %v2869_v2 = vld [vmem:[%s8654_s3] sm:$0xff]  ;;  %v2870_v44 = vld [vmem:[%s8654_s3 + $0x8] sm:$0xff] }
 0x5bf   :  { %v8204_v31 = vpop.eup %6326  ;;  %v4836_v40 = vsub.f32 %v4772_v20, %v4820_v33  ;;  %v4821_v47 = vadd.f32 %v4791_v13, %v8995_v61  ;;  %3686 = vadd.xlane.f32.xlu0 %v3658_v53  ;;  %6342 = vlog2.f32 %v4598_v50  ;;  %v9031_v61 = vsub.f32 %v7549_v17, %v9027_v57  ;;  %v9032_v57 = vld [vmem:[#allocation42_spill] sm:$0xff] }
 0x5c0   :  { %v8207_v62 = vpop.eup %6328  ;;  %v4571_v36 = vpop.xlane.xlu0 %4570  ;;  %6344 = vlog2.f32 %v4663_v21  ;;  %v3839_v26 = vadd.f32 %v3809_v35, %v8965_v42  ;;  %v8223_v20 = vmul.f32 0.0, %v6323_v29  ;;  %v4458_v43 = vsub.f32 -1e+30, %v9032_v57  ;;  %v9034_v50 = vld [vmem:[#allocation34_spill] sm:$0xff] }
 0x5c1   :  { %v6331_v28 = vpop.eup %6330  ;;  %v4900_v56 = vadd.f32 %v4884_v23, %v4836_v40  ;;  %v4837_v52 = vsub.f32 %v4773_v63, %v4821_v47  ;;  %v3659_v11 = vmul.f32 %v9031_v61, %v8116_v59  ;;  %6346 = vrcp.f32 %v3553_v19  ;;  %v4713_v29 = vpop.xlane.xlu1 %4712  ;;  %v9037_v61 = vld [vmem:[#allocation51_spill] sm:$0xff] }
 0x5c2   :  { %v6333_v18 = vpop.eup %6332  ;;  %v4599_v3 = vadd.f32 %v4571_v36, %v8185_v55  ;;  %6348 = vlog2.f32 %v3553_v19  ;;  %v3855_v59 = vadd.f32 %v3839_v26, %v3791_v24  ;;  %v3434_v8 = vmul.f32 1.442695, %v3412_v39  ;;  %v9036_v24 = vld [vmem:[#allocation50_spill] sm:$0xff]  ;;  %v9038_v26 = vld [vmem:[#allocation87_spill] sm:$0xff] }
 0x5c3   :  { %v4916_v21 = vmul.f32 %v4900_v56, %v2869_v2  ;;  %v4901_v4 = vadd.f32 %v4885_v6, %v4837_v52  ;;  %3688 = vadd.xlane.f32.xlu0 %v3659_v11  ;;  %v6335_v17 = vpop.eup %6334  ;;  %v9033_v53 = vsub.f32 %v8996_v54, %v9028_v37  ;;  %v3811_v7 = vmul.f32 0.6931472, %v6331_v28  ;;  %v9035_v37 = vld [vmem:[#allocation30_spill] sm:$0xff] }
 0x5c4   :  { %6350 = vrcp.f32 %v4599_v3  ;;  %v3667_v42 = vpop.xlane.xlu0 %3666  ;;  %v3618_v45 = vadd.f32 %v9034_v50, %v8161_v27  ;;  %v8236_v13 = vmul.f32 0.0, %v6325_v38  ;;  %v4857_v35 = vmul.f32 0.6931472, %v6333_v18  ;;  %v9041_v50 = vld [vmem:[#allocation88_spill] sm:$0xff] }
 0x5c5   :  { %v6337_v10 = vpop.eup %6336  ;;  %v4917_v0 = vmul.f32 %v4901_v4, %v2870_v44  ;;  %6352 = vlog2.f32 %v4599_v3  ;;  %v3696_v12 = vadd.f32 %v3667_v42, %v8176_v34  ;;  %v3660_v5 = vmul.f32 %v9033_v53, %v8141_v41  ;;  %v9040_v42 = vld [vmem:[#allocation49_spill] sm:$0xff] }
 0x5c6   :  { %v6339_v49 = vpop.eup %6338  ;;  %v4932_v33 = vsel %vm3886_vm1, %v4916_v21, 0.0  ;;  %v4664_v54 = vadd.f32 %v9035_v37, %v8167_v16  ;;  %v3871_v41 = vmul.f32 %v3855_v59, %v2870_v44  ;;  %v3661_v47 = vmul.f32 %v3645_v48, %v8173_v58  ;;  %v2871_v48 = vld [vmem:[%s8654_s3 + $0x10] sm:$0xff] }
 0x5c7   :  { %v4933_v60 = vsel %vm3886_vm1, %v4917_v0, 0.0  ;;  %v3747_v23 = vmul.f32 0.6931472, %v6339_v49  ;;  %v3728_v34 = vmul.f32 %v6337_v10, %v3696_v12  ;;  %3690 = vadd.xlane.f32.xlu0 %v3660_v5  ;;  %v8250_v63 = vmul.f32 1.442695, %v4458_v43 }
 0x5c8   :  { %v8242_v15 = vadd.f32 %v4933_v60, %v4932_v33  ;;  %v3669_v19 = vpop.xlane.xlu0 %3668  ;;  %v6341_v27 = vpop.eup %6340  ;;  %v3840_v36 = vadd.f32 %v3811_v7, %v9036_v24  ;;  %v3813_v16 = vmul.f32 0.6931472, %v6335_v17  ;;  %v4742_v39 = vadd.f32 %v4713_v29, %v8179_v46  ;;  %v9039_v17 = vld [vmem:[#allocation54_spill] sm:$0xff] }
 0x5c9   :  { %v3776_v40 = vadd.f32 %v3747_v23, %v9000_v22  ;;  %v3697_v38 = vadd.f32 %v3669_v19, %v8181_v32  ;;  %v6343_v6 = vpop.eup %6342  ;;  %6354 = vpow2.f32 %v3434_v8  ;;  %v3870_v22 = vmul.f32 %v8198_v30, %v2869_v2  ;;  %v4715_v46 = vpop.xlane.xlu1 %4714 }
 0x5ca   :  { %v6345_v28 = vpop.eup %6344  ;;  %6356 = vlog2.f32 %v3618_v45  ;;  %v4793_v56 = vmul.f32 0.6931472, %v6343_v6  ;;  %v4886_v9 = vadd.f32 %v4857_v35, %v9037_v61  ;;  %v3888_v14 = vsel %vm3886_vm1, %v3871_v41, 0.0 }
 0x5cb   :  { %v3792_v32 = vsub.f32 %v3728_v34, %v3776_v40  ;;  %3692 = vadd.xlane.f32.xlu0 %v3661_v47  ;;  %v6347_v52 = vpop.eup %6346  ;;  %6358 = vlog2.f32 %v4664_v54  ;;  %v4774_v58 = vmul.f32 %v6341_v27, %v4742_v39  ;;  %v3841_v44 = vadd.f32 %v3813_v16, %v9039_v17  ;;  %v9042_v34 = vld [vmem:[#allocation89_spill] sm:$0xff]  ;;  %v9043_v27 = vld [vmem:[#allocation28_spill] sm:$0xff]  ;;  %v9044_v47 = vld [vmem:[#allocation55_spill] sm:$0xff] }
 0x5cc   :  { %v3527_v11 = vpop.xlane.xlu0 %3526  ;;  %v6349_v18 = vpop.eup %6348  ;;  %v4822_v3 = vadd.f32 %v4793_v56, %v9038_v26  ;;  %v3729_v2 = vmul.f32 %v6347_v52, %v3697_v38  ;;  %v4859_v59 = vmul.f32 0.6931472, %v6345_v28  ;;  %v3619_v43 = vadd.f32 %v9040_v42, %v8170_v25  ;;  %v9045_v28 = vld [vmem:[#allocation48_spill] sm:$0xff] }
 0x5cd   :  { %v3856_v30 = vadd.f32 %v3840_v36, %v3792_v32  ;;  %v3554_v21 = vadd.f32 %v3527_v11, %v8223_v20  ;;  %v3749_v8 = vmul.f32 0.6931472, %v6349_v18  ;;  %v3887_v0 = vsel %vm3886_vm1, %v3870_v22, 0.0  ;;  %v9047_v18 = vld [vmem:[#allocation33_spill] sm:$0xff] }
 0x5ce   :  { %v6351_v4 = vpop.eup %6350  ;;  %v4838_v12 = vsub.f32 %v4774_v58, %v4822_v3  ;;  %v4743_v53 = vadd.f32 %v4715_v46, %v8185_v55  ;;  %v3889_v49 = vadd.f32 %v3888_v14, %v3887_v0  ;;  %v2872_v55 = vld [vmem:[%s8654_s3 + $0x18] sm:$0xff]  ;;  %v8275_v19 = vmul.f32 0.0, %v8204_v31  ;;  %v9046_v14 = vld [vmem:[#allocation32_spill] sm:$0xff]  ;;  %v4717_v0 = vpop.xlane.xlu1 %4716 }
 0x5cf   :  { %v6353_v10 = vpop.eup %6352  ;;  %v3872_v5 = vmul.f32 %v3856_v30, %v2871_v48  ;;  %v3777_v45 = vadd.f32 %v3749_v8, %v9041_v50  ;;  %6360 = vlog2.f32 %v3554_v21  ;;  %v3413_v40 = vsub.f32 -1e+30, %v9043_v27  ;;  %v9049_v8 = vld [vmem:[#allocation83_spill] sm:$0xff]  ;;  %v9051_v50 = vld [vmem:[#allocation85_spill] sm:$0xff] }
 0x5d0   :  { %v4795_v7 = vmul.f32 0.6931472, %v6353_v10  ;;  %v4573_v29 = vpop.xlane.xlu0 %4572  ;;  %v4902_v33 = vadd.f32 %v4886_v9, %v4838_v12  ;;  %v4775_v60 = vmul.f32 %v6351_v4, %v4743_v53  ;;  %6362 = vrcp.f32 %v3554_v21  ;;  %v9048_v4 = vld [vmem:[#allocation47_spill] sm:$0xff] }
 0x5d1   :  { %v3890_v23 = vsel %vm3886_vm1, %v3872_v5, 0.0  ;;  %v4600_v25 = vadd.f32 %v4573_v29, %v8236_v13  ;;  %v3793_v54 = vsub.f32 %v3729_v2, %v3777_v45  ;;  %v4887_v6 = vadd.f32 %v4859_v59, %v9044_v47 }
 0x5d2   :  { %v4823_v35 = vadd.f32 %v4795_v7, %v9042_v34  ;;  %v3891_v37 = vadd.f32 %v3890_v23, %v3889_v49  ;;  %v4918_v41 = vmul.f32 %v4902_v33, %v2871_v48  ;;  %v4665_v22 = vadd.f32 %v9045_v28, %v8216_v1  ;;  %v9050_v49 = vld [vmem:[#allocation36_spill] sm:$0xff] }
 0x5d3   :  { %6364 = vrcp.f32 %v4600_v25  ;;  %v8278_v38 = vpop.eup %6354  ;;  %v3857_v36 = vadd.f32 %v3841_v44, %v3793_v54  ;;  %v4459_v48 = vsub.f32 -1e+30, %v9046_v14  ;;  %v8288_v58 = vmul.f32 0.0, %v8207_v62  ;;  %v9053_v54 = vld [vmem:[#allocation29_spill] sm:$0xff] }
 0x5d4   :  { %v4839_v24 = vsub.f32 %v4775_v60, %v4823_v35  ;;  %6366 = vlog2.f32 %v4600_v25  ;;  %v3529_v16 = vpop.xlane.xlu0 %3528  ;;  %v6357_v39 = vpop.eup %6356  ;;  %v4935_v56 = vsel %vm3886_vm1, %v4918_v41, 0.0  ;;  %v3414_v26 = vsub.f32 -1e+30, %v9047_v18  ;;  %v9052_v60 = vld [vmem:[#allocation86_spill] sm:$0xff] }
 0x5d5   :  { %6368 = vlog2.f32 %v3619_v43  ;;  %v3555_v31 = vadd.f32 %v3529_v16, %v8275_v19  ;;  %v6359_v32 = vpop.eup %6358  ;;  %v4936_v52 = vadd.f32 %v4935_v56, %v8242_v15  ;;  %v3873_v9 = vmul.f32 %v3857_v36, %v2872_v55 }
 0x5d6   :  { %v4903_v61 = vadd.f32 %v4887_v6, %v4839_v24  ;;  %v3436_v30 = vmul.f32 1.442695, %v3413_v40  ;;  %v4482_v62 = vmul.f32 1.442695, %v4459_v48  ;;  %v4460_v17 = vsub.f32 -1e+30, %v9048_v4 }
 0x5d7   :  { %6370 = vrcp.f32 %v3555_v31  ;;  %v3892_v11 = vsel %vm3886_vm1, %v3873_v9, 0.0  ;;  %v3815_v43 = vmul.f32 0.6931472, %v6357_v39  ;;  %v3572_v10 = vmul.f32 0.0, %v9049_v8  ;;  %v9054_v40 = vld [vmem:[#allocation56_spill] sm:$0xff]  ;;  %v9055_v6 = vld [vmem:[#allocation35_spill] sm:$0xff] }
 0x5d8   :  { %v4919_v46 = vmul.f32 %v4903_v61, %v2872_v55  ;;  %6372 = vlog2.f32 %v3555_v31  ;;  %v4575_v1 = vpop.xlane.xlu0 %4574  ;;  %v8292_v3 = vadd.f32 %v3892_v11, %v3891_v37  ;;  %v3438_v53 = vmul.f32 1.442695, %v3414_v26  ;;  %v2873_v48 = vld [vmem:[%s8654_s3 + $0x20] sm:$0xff] }
 0x5d9   :  { %6374 = vlog2.f32 %v4665_v22  ;;  %v4601_v15 = vadd.f32 %v4575_v1, %v8288_v58  ;;  %v6361_v2 = vpop.eup %6360  ;;  %v4618_v7 = vmul.f32 0.0, %v9050_v49  ;;  %v4861_v33 = vmul.f32 0.6931472, %v6359_v32  ;;  %v9057_v22 = vld [vmem:[#allocation90_spill] sm:$0xff]  ;;  %v4719_v1 = vpop.xlane.xlu1 %4718  ;;  %v9062_v49 = vld [vmem:[#allocation59_spill] sm:$0xff] }
 0x5da   :  { %v4937_v21 = vsel %vm3886_vm1, %v4919_v46, 0.0  ;;  %6376 = vpow2.f32 %v8250_v63  ;;  %v3751_v59 = vmul.f32 0.6931472, %v6361_v2  ;;  %v6363_v42 = vpop.eup %6362  ;;  %v3573_v63 = vmul.f32 0.0, %v9051_v50 }
 0x5db   :  { %v8298_v44 = vadd.f32 %v4937_v21, %v4936_v52  ;;  %6378 = vrcp.f32 %v4601_v15  ;;  %v8305_v23 = vmul.f32 0.0, %v9052_v60  ;;  %v4484_v25 = vmul.f32 1.442695, %v4460_v17  ;;  %v9058_v52 = vld [vmem:[#allocation58_spill] sm:$0xff] }
 0x5dc   :  { %6380 = vlog2.f32 %v4601_v15  ;;  %v3671_v12 = vpop.xlane.xlu0 %3670  ;;  %v4744_v35 = vadd.f32 %v4717_v0, %v8236_v13  ;;  %v3778_v41 = vadd.f32 %v3751_v59, %v9053_v54  ;;  %v3842_v47 = vadd.f32 %v3815_v43, %v9054_v40  ;;  %v9060_v59 = vld [vmem:[#allocation76_spill] sm:$0xff] }
 0x5dd   :  { %v6365_v5 = vpop.eup %6364  ;;  %v3698_v45 = vadd.f32 %v3671_v12, %v8223_v20  ;;  %6382 = vpow2.f32 %v3436_v30  ;;  %v3620_v24 = vadd.f32 %v9055_v6, %v3572_v10  ;;  %v9056_v20 = vld [vmem:[#allocation75_spill] sm:$0xff]  ;;  %v4888_v61 = vadd.f32 %v4861_v33, %v9058_v52  ;;  %v9066_v52 = vld [vmem:[#allocation94_spill] sm:$0xff] }
 0x5de   :  { %v6367_v29 = vpop.eup %6366  ;;  %6384 = vpow2.f32 %v4482_v62  ;;  %v4511_v36 = vsub.f32 -1e+30, %v9056_v20  ;;  %v4776_v28 = vmul.f32 %v6365_v5, %v4744_v35  ;;  %v8319_v46 = vmul.f32 0.0, %v8278_v38  ;;  %v9061_v12 = vld [vmem:[#allocation43_spill] sm:$0xff] }
 0x5df   :  { %v6369_v34 = vpop.eup %6368  ;;  %v4797_v37 = vmul.f32 0.6931472, %v6367_v29  ;;  %v3730_v55 = vmul.f32 %v6363_v42, %v3698_v45  ;;  %6386 = vpow2.f32 %v3438_v53  ;;  %v3466_v42 = vsub.f32 -1e+30, %v9060_v59  ;;  %v9063_v29 = vld [vmem:[#allocation93_spill] sm:$0xff]  ;;  %v9064_v6 = vld [vmem:[#allocation27_spill] sm:$0xff] }
 0x5e0   :  { %v3673_v16 = vpop.xlane.xlu0 %3672  ;;  %v3817_v9 = vmul.f32 0.6931472, %v6369_v34  ;;  %6388 = vpow2.f32 %v4484_v25  ;;  %v4538_v17 = vmul.f32 1.442695, %v4511_v36  ;;  %v3621_v33 = vadd.f32 %v9063_v29, %v3573_v63  ;;  %v9071_v29 = vld [vmem:[#allocation99_spill] sm:$0xff] }
 0x5e1   :  { %v6371_v39 = vpop.eup %6370  ;;  %v4824_v56 = vadd.f32 %v4797_v37, %v9057_v22  ;;  %v3794_v31 = vsub.f32 %v3730_v55, %v3778_v41  ;;  %v3699_v32 = vadd.f32 %v3673_v16, %v8275_v19  ;;  %6390 = vlog2.f32 %v3620_v24  ;;  %v9059_v19 = vld [vmem:[#allocation52_spill] sm:$0xff] }
 0x5e2   :  { %v6373_v13 = vpop.eup %6372  ;;  %v4666_v62 = vadd.f32 %v9059_v19, %v4618_v7  ;;  %v3843_v50 = vadd.f32 %v3817_v9, %v9062_v49  ;;  %v4745_v60 = vadd.f32 %v4719_v1, %v8288_v58  ;;  %v9070_v49 = vld [vmem:[#allocation113_spill] sm:$0xff] }
 0x5e3   :  { %v6375_v11 = vpop.eup %6374  ;;  %v4840_v26 = vsub.f32 %v4776_v28, %v4824_v56  ;;  %v3753_v15 = vmul.f32 0.6931472, %v6373_v13  ;;  %v3858_v30 = vadd.f32 %v3842_v47, %v3794_v31  ;;  %v3731_v2 = vmul.f32 %v6371_v39, %v3699_v32  ;;  %v2874_v47 = vld [vmem:[%s8654_s3 + $0x28] sm:$0xff] }
 0x5e4   :  { %v6377_v21 = vpop.eup %6376  ;;  %v3531_v43 = vpop.xlane.xlu0 %3530  ;;  %v4863_v45 = vmul.f32 0.6931472, %v6375_v11  ;;  %6392 = vlog2.f32 %v4666_v62 }
 0x5e5   :  { %v6379_v8 = vpop.eup %6378  ;;  %v4904_v10 = vadd.f32 %v4888_v61, %v4840_v26  ;;  %v3874_v0 = vmul.f32 %v3858_v30, %v2873_v48  ;;  %v3779_v38 = vadd.f32 %v3753_v15, %v9061_v12  ;;  %v3556_v53 = vadd.f32 %v3531_v43, %v8319_v46  ;;  %v9069_v43 = vld [vmem:[#allocation46_spill] sm:$0xff] }
 0x5e6   :  { %v6381_v5 = vpop.eup %6380  ;;  %v8329_v41 = vmul.f32 0.0, %v6377_v21  ;;  %v4777_v55 = vmul.f32 %v6379_v8, %v4745_v60  ;;  %v4667_v61 = vadd.f32 %v9066_v52, %v8305_v23  ;;  %v3494_v30 = vmul.f32 1.442695, %v3466_v42 }
 0x5e7   :  { %v6383_v7 = vpop.eup %6382  ;;  %v4799_v25 = vmul.f32 0.6931472, %v6381_v5  ;;  %v3894_v34 = vsel %vm3886_vm1, %v3874_v0, 0.0  ;;  %v4920_v35 = vmul.f32 %v4904_v10, %v2873_v48  ;;  %v3795_v37 = vsub.f32 %v3731_v2, %v3779_v38  ;;  %v9067_v48 = vld [vmem:[#allocation92_spill] sm:$0xff]  ;;  %v9068_v2 = vld [vmem:[#allocation77_spill] sm:$0xff] }
 0x5e8   :  { %v6385_v54 = vpop.eup %6384  ;;  %v3895_v40 = vadd.f32 %v3894_v34, %v8292_v3  ;;  %v4577_v63 = vpop.xlane.xlu0 %4576  ;;  %6394 = vlog2.f32 %v3556_v53  ;;  %v8339_v22 = vmul.f32 0.0, %v6383_v7  ;;  %v9065_v3 = vld [vmem:[#allocation60_spill] sm:$0xff]  ;;  %v3415_v11 = vsub.f32 -1e+30, %v9067_v48  ;;  %v9072_v7 = vld [vmem:[#allocation115_spill] sm:$0xff] }
 0x5e9   :  { %v4825_v58 = vadd.f32 %v4799_v25, %v9064_v6  ;;  %v4939_v24 = vsel %vm3886_vm1, %v4920_v35, 0.0  ;;  %v3859_v36 = vadd.f32 %v3843_v50, %v3795_v37  ;;  %v6387_v16 = vpop.eup %6386  ;;  %6396 = vlog2.f32 %v3621_v33  ;;  %v9073_v34 = vld [vmem:[#allocation116_spill] sm:$0xff]  ;;  %v4721_v6 = vpop.xlane.xlu1 %4720 }
 0x5ea   :  { %v4940_v39 = vadd.f32 %v4939_v24, %v8298_v44  ;;  %v4602_v28 = vadd.f32 %v4577_v63, %v8329_v41  ;;  %v4889_v56 = vadd.f32 %v4863_v45, %v9065_v3  ;;  %6398 = vrcp.f32 %v3556_v53  ;;  %v6389_v13 = vpop.eup %6388 }
 0x5eb   :  { %v4841_v31 = vsub.f32 %v4777_v55, %v4825_v58  ;;  %v3875_v32 = vmul.f32 %v3859_v36, %v2874_v47  ;;  %v6391_v15 = vpop.eup %6390  ;;  %v4512_v21 = vsub.f32 -1e+30, %v9068_v2  ;;  %v8350_v62 = vmul.f32 0.0, %v6385_v54  ;;  %v9075_v36 = vld [vmem:[#allocation78_spill] sm:$0xff] }
 0x5ec   :  { %6400 = vrcp.f32 %v4602_v28  ;;  %v3533_v9 = vpop.xlane.xlu0 %3532  ;;  %v4461_v8 = vsub.f32 -1e+30, %v9069_v43  ;;  %v3440_v38 = vmul.f32 1.442695, %v3415_v11  ;;  %v3574_v50 = vmul.f32 0.0, %v9070_v49  ;;  %v9076_v11 = vld [vmem:[#allocation96_spill] sm:$0xff] }
 0x5ed   :  { %v4905_v1 = vadd.f32 %v4889_v56, %v4841_v31  ;;  %v3896_v44 = vsel %vm3886_vm1, %v3875_v32, 0.0  ;;  %6402 = vlog2.f32 %v4602_v28  ;;  %v3557_v26 = vadd.f32 %v3533_v9, %v8339_v22 }
 0x5ee   :  { %6404 = vpow2.f32 %v4538_v17  ;;  %v8348_v19 = vadd.f32 %v3896_v44, %v3895_v40  ;;  %v6393_v17 = vpop.eup %6392  ;;  %v4540_v42 = vmul.f32 1.442695, %v4512_v21  ;;  %v4486_v45 = vmul.f32 1.442695, %v4461_v8 }
 0x5ef   :  { %v4921_v23 = vmul.f32 %v4905_v1, %v2874_v47  ;;  %6406 = vrcp.f32 %v3557_v26  ;;  %v3416_v33 = vsub.f32 -1e+30, %v9071_v29  ;;  %v4620_v25 = vmul.f32 0.0, %v9072_v7  ;;  %v9074_v47 = vld [vmem:[#allocation41_spill] sm:$0xff] }
 0x5f0   :  { %6408 = vlog2.f32 %v3557_v26  ;;  %v4579_v10 = vpop.xlane.xlu0 %4578  ;;  %v3575_v35 = vmul.f32 0.0, %v9073_v34  ;;  %v3819_v40 = vmul.f32 0.6931472, %v6391_v15  ;;  %v8362_v63 = vmul.f32 0.0, %v9074_v47  ;;  %v9082_v47 = vld [vmem:[#allocation65_spill] sm:$0xff] }
 0x5f1   :  { %6410 = vlog2.f32 %v4667_v61  ;;  %v4941_v0 = vsel %vm3886_vm1, %v4921_v23, 0.0  ;;  %v4603_v12 = vadd.f32 %v4579_v10, %v8350_v62  ;;  %v8366_v28 = vmul.f32 0.0, %v6389_v13  ;;  %v9077_v13 = vld [vmem:[#allocation63_spill] sm:$0xff] }
 0x5f2   :  { %6412 = vpow2.f32 %v3494_v30  ;;  %v8355_v53 = vadd.f32 %v4941_v0, %v4940_v39  ;;  %v6395_v5 = vpop.eup %6394  ;;  %v3467_v39 = vsub.f32 -1e+30, %v9075_v36  ;;  %v8368_v3 = vmul.f32 0.0, %v6387_v16  ;;  %v9078_v16 = vld [vmem:[#allocation97_spill] sm:$0xff]  ;;  %v9079_v0 = vld [vmem:[#allocation100_spill] sm:$0xff] }
 0x5f3   :  { %6414 = vrcp.f32 %v4603_v12  ;;  %v6397_v60 = vpop.eup %6396  ;;  %v3755_v37 = vmul.f32 0.6931472, %v6395_v5  ;;  %v3442_v52 = vmul.f32 1.442695, %v3416_v33  ;;  %v4865_v9 = vmul.f32 0.6931472, %v6393_v17 }
 0x5f4   :  { %6416 = vlog2.f32 %v4603_v12  ;;  %v3675_v54 = vpop.xlane.xlu0 %3674  ;;  %v6399_v55 = vpop.eup %6398  ;;  %v4746_v1 = vadd.f32 %v4721_v6, %v8329_v41  ;;  %v3844_v30 = vadd.f32 %v3819_v40, %v9077_v13  ;;  %v4668_v21 = vadd.f32 %v9078_v16, %v4620_v25  ;;  %v2875_v41 = vld [vmem:[%s8654_s3 + $0x30] sm:$0xff]  ;;  %v9081_v25 = vld [vmem:[#allocation91_spill] sm:$0xff] }
 0x5f5   :  { %v3700_v58 = vadd.f32 %v3675_v54, %v8319_v46  ;;  %6418 = vpow2.f32 %v3440_v38  ;;  %v3780_v31 = vadd.f32 %v3755_v37, %v7790_v51  ;;  %v3622_v46 = vadd.f32 %v9076_v11, %v3574_v50  ;;  %v9080_v33 = vld [vmem:[#allocation64_spill] sm:$0xff] }
 0x5f6   :  { %v6401_v24 = vpop.eup %6400  ;;  %6420 = vpow2.f32 %v4540_v42  ;;  %v3821_v10 = vmul.f32 0.6931472, %v6397_v60  ;;  %v3623_v12 = vadd.f32 %v9079_v0, %v3575_v35  ;;  %v4723_v60 = vpop.xlane.xlu1 %4722  ;;  %v4462_v34 = vsub.f32 -1e+30, %v9081_v25 }
 0x5f7   :  { %v6403_v56 = vpop.eup %6402  ;;  %6422 = vpow2.f32 %v4486_v45  ;;  %v3732_v32 = vmul.f32 %v6399_v55, %v3700_v58  ;;  %v4778_v38 = vmul.f32 %v6401_v24, %v4746_v1  ;;  %v2876_v1 = vld [vmem:[%s8654_s3 + $0x38] sm:$0xff] }
 0x5f8   :  { %v8371_v61 = vpop.eup %6404  ;;  %v4801_v44 = vmul.f32 0.6931472, %v6403_v56  ;;  %v3677_v26 = vpop.xlane.xlu0 %3676  ;;  %6424 = vpow2.f32 %v3442_v52  ;;  %v3845_v6 = vadd.f32 %v3821_v10, %v9082_v47 }
 0x5f9   :  { %v6407_v15 = vpop.eup %6406  ;;  %v3796_v23 = vsub.f32 %v3732_v32, %v3780_v31  ;;  %v3701_v8 = vadd.f32 %v3677_v26, %v8339_v22  ;;  %v4890_v22 = vadd.f32 %v4865_v9, %v9080_v33  ;;  %6426 = vlog2.f32 %v3622_v46 }
 0x5fa   :  { %v6409_v51 = vpop.eup %6408  ;;  %v4826_v17 = vadd.f32 %v4801_v44, %v9032_v57  ;;  %6428 = vlog2.f32 %v4668_v21  ;;  %v4747_v31 = vadd.f32 %v4723_v60, %v8350_v62  ;;  %v4488_v44 = vmul.f32 1.442695, %v4462_v34  ;;  %v9083_v21 = vld [vmem:[#allocation66_spill] sm:$0xff] }
 0x5fb   :  { %v6411_v42 = vpop.eup %6410  ;;  %v3757_v5 = vmul.f32 0.6931472, %v6409_v51  ;;  %v3860_v49 = vadd.f32 %v3844_v30, %v3796_v23  ;;  %v3733_v50 = vmul.f32 %v6407_v15, %v3701_v8  ;;  %6430 = vlog2.f32 %v3623_v12 }
 0x5fc   :  { %v8383_v45 = vpop.eup %6412  ;;  %v4842_v7 = vsub.f32 %v4778_v38, %v4826_v17  ;;  %v3535_v35 = vpop.xlane.xlu0 %3534  ;;  %v4867_v58 = vmul.f32 0.6931472, %v6411_v42  ;;  %v9084_v38 = vld [vmem:[#allocation103_spill] sm:$0xff] }
 0x5fd   :  { %v6415_v57 = vpop.eup %6414  ;;  %v3876_v37 = vmul.f32 %v3860_v49, %v2875_v41  ;;  %v3781_v54 = vadd.f32 %v3757_v5, %v9043_v27  ;;  %v3558_v55 = vadd.f32 %v3535_v35, %v8368_v3  ;;  %v3417_v17 = vsub.f32 -1e+30, %v9084_v38 }
 0x5fe   :  { %v6417_v40 = vpop.eup %6416  ;;  %v4906_v24 = vadd.f32 %v4890_v22, %v4842_v7  ;;  %v4779_v13 = vmul.f32 %v6415_v57, %v4747_v31  ;;  %v4891_v23 = vadd.f32 %v4867_v58, %v9083_v21  ;;  %v9086_v22 = vld [vmem:[#allocation79_spill] sm:$0xff] }
 0x5ff   :  { %v6419_v56 = vpop.eup %6418  ;;  %v4803_v32 = vmul.f32 0.6931472, %v6417_v40  ;;  %v3898_v52 = vsel %vm3886_vm1, %v3876_v37, 0.0  ;;  %v3797_v9 = vsub.f32 %v3733_v50, %v3781_v54  ;;  %6432 = vlog2.f32 %v3558_v55  ;;  %v9087_v37 = vld [vmem:[#allocation80_spill] sm:$0xff] }
 0x600   :  { %v8392_v11 = vpop.eup %6420  ;;  %v3899_v46 = vadd.f32 %v3898_v52, %v8348_v19  ;;  %v4922_v27 = vmul.f32 %v4906_v24, %v2875_v41  ;;  %v4581_v26 = vpop.xlane.xlu0 %4580  ;;  %6434 = vrcp.f32 %v3558_v55  ;;  %v8402_v19 = vmul.f32 0.0, %v6419_v56  ;;  %v9085_v41 = vld [vmem:[#allocation101_spill] sm:$0xff]  ;;  %v9088_v56 = vld [vmem:[#allocation95_spill] sm:$0xff] }
 0x601   :  { %v6423_v15 = vpop.eup %6422  ;;  %v4827_v62 = vadd.f32 %v4803_v32, %v9046_v14  ;;  %v3861_v30 = vadd.f32 %v3845_v6, %v3797_v9  ;;  %v4604_v16 = vadd.f32 %v4581_v26, %v8366_v28  ;;  %v4669_v42 = vadd.f32 %v9085_v41, %v8362_v63 }
 0x602   :  { %v4943_v8 = vsel %vm3886_vm1, %v4922_v27, 0.0  ;;  %v8406_v14 = vpop.eup %6424  ;;  %v4513_v60 = vsub.f32 -1e+30, %v9086_v22  ;;  %v8417_v35 = vmul.f32 0.0, %v6423_v15  ;;  %v3468_v54 = vsub.f32 -1e+30, %v9087_v37 }
 0x603   :  { %v4843_v51 = vsub.f32 %v4779_v13, %v4827_v62  ;;  %v4944_v10 = vadd.f32 %v4943_v8, %v8355_v53  ;;  %v3877_v0 = vmul.f32 %v3861_v30, %v2876_v1  ;;  %6436 = vrcp.f32 %v4604_v16  ;;  %v6427_v33 = vpop.eup %6426  ;;  %v9090_v13 = vld [vmem:[#allocation119_spill] sm:$0xff]  ;;  %v9091_v30 = vld [vmem:[#allocation120_spill] sm:$0xff] }
 0x604   :  { %6438 = vlog2.f32 %v4604_v16  ;;  %v3537_v12 = vpop.xlane.xlu0 %3536  ;;  %v3496_v53 = vmul.f32 1.442695, %v3467_v39  ;;  %v6429_v34 = vpop.eup %6428  ;;  %v3444_v47 = vmul.f32 1.442695, %v3417_v17  ;;  %v4542_v58 = vmul.f32 1.442695, %v4513_v60 }
 0x605   :  { %v4907_v5 = vadd.f32 %v4891_v23, %v4843_v51  ;;  %v3900_v49 = vsel %vm3886_vm1, %v3877_v0, 0.0  ;;  %v3559_v50 = vadd.f32 %v3537_v12, %v8402_v19  ;;  %6440 = vpow2.f32 %v4488_v44  ;;  %v6431_v63 = vpop.eup %6430  ;;  %v4725_v44 = vpop.xlane.xlu1 %4724 }
 0x606   :  { %v8415_v7 = vadd.f32 %v3900_v49, %v3899_v46  ;;  %v4463_v31 = vsub.f32 -1e+30, %v9088_v56  ;;  %v3823_v9 = vmul.f32 0.6931472, %v6427_v33  ;;  %v9089_v46 = vld [vmem:[#allocation117_spill] sm:$0xff]  ;;  %v4622_v62 = vmul.f32 0.0, %v9090_v13 }
 0x607   :  { %v4923_v57 = vmul.f32 %v4907_v5, %v2876_v1  ;;  %6442 = vrcp.f32 %v3559_v50  ;;  %v3576_v27 = vmul.f32 0.0, %v9089_v46  ;;  %v3498_v1 = vmul.f32 1.442695, %v3468_v54  ;;  %v9092_v5 = vld [vmem:[#allocation67_spill] sm:$0xff] }
 0x608   :  { %6444 = vlog2.f32 %v3559_v50  ;;  %v4583_v55 = vpop.xlane.xlu0 %4582  ;;  %v3577_v16 = vmul.f32 0.0, %v9091_v30  ;;  %v4869_v8 = vmul.f32 0.6931472, %v6429_v34  ;;  %v8430_v51 = vmul.f32 0.0, %v8371_v61  ;;  %v9093_v50 = vld [vmem:[#allocation104_spill] sm:$0xff] }
 0x609   :  { %6446 = vlog2.f32 %v4669_v42  ;;  %v4945_v40 = vsel %vm3886_vm1, %v4923_v57, 0.0  ;;  %v4605_v39 = vadd.f32 %v4583_v55, %v8417_v35  ;;  %v6433_v6 = vpop.eup %6432  ;;  %v4748_v0 = vadd.f32 %v4725_v44, %v8366_v28 }
 0x60a   :  { %6448 = vpow2.f32 %v3496_v53  ;;  %v8422_v24 = vadd.f32 %v4945_v40, %v4944_v10  ;;  %v3759_v32 = vmul.f32 0.6931472, %v6433_v6  ;;  %v6435_v52 = vpop.eup %6434  ;;  %v4490_v10 = vmul.f32 1.442695, %v4463_v31  ;;  %v9095_v40 = vld [vmem:[#allocation68_spill] sm:$0xff]  ;;  %v4727_v31 = vpop.xlane.xlu1 %4726 }
 0x60b   :  { %6450 = vrcp.f32 %v4605_v39  ;;  %v3846_v49 = vadd.f32 %v3823_v9, %v9092_v5  ;;  %v3624_v33 = vadd.f32 %v9093_v50, %v3576_v27  ;;  %v8444_v6 = vmul.f32 0.0, %v8406_v14 }
 0x60c   :  { %6452 = vlog2.f32 %v4605_v39  ;;  %v3679_v26 = vpop.xlane.xlu0 %3678  ;;  %v3782_v17 = vadd.f32 %v3759_v32, %v9047_v18  ;;  %v4892_v18 = vadd.f32 %v4869_v8, %v9095_v40  ;;  %v3825_v39 = vmul.f32 0.6931472, %v6431_v63  ;;  %v9098_v8 = vld [vmem:[#allocation69_spill] sm:$0xff] }
 0x60d   :  { %v6437_v15 = vpop.eup %6436  ;;  %v3702_v21 = vadd.f32 %v3679_v26, %v8368_v3  ;;  %6454 = vpow2.f32 %v3444_v47  ;;  %v9094_v3 = vld [vmem:[#allocation81_spill] sm:$0xff]  ;;  %v2877_v47 = vld [vmem:[%s8654_s3 + $0x40] sm:$0xff] }
 0x60e   :  { %v6439_v23 = vpop.eup %6438  ;;  %6456 = vpow2.f32 %v4542_v58  ;;  %v4514_v53 = vsub.f32 -1e+30, %v9094_v3  ;;  %v4780_v61 = vmul.f32 %v6437_v15, %v4748_v0 }
 0x60f   :  { %v4805_v12 = vmul.f32 0.6931472, %v6439_v23  ;;  %v3734_v41 = vmul.f32 %v6435_v52, %v3702_v21  ;;  %v6441_v42 = vpop.eup %6440  ;;  %6458 = vpow2.f32 %v3498_v1  ;;  %v9097_v1 = vld [vmem:[#allocation98_spill] sm:$0xff] }
 0x610   :  { %v3681_v60 = vpop.xlane.xlu0 %3680  ;;  %6460 = vpow2.f32 %v4490_v10  ;;  %v8449_v63 = vmul.f32 0.0, %v6441_v42  ;;  %v4464_v44 = vsub.f32 -1e+30, %v9097_v1  ;;  %v3847_v10 = vadd.f32 %v3825_v39, %v9098_v8 }
 0x611   :  { %v6443_v34 = vpop.eup %6442  ;;  %v4828_v57 = vadd.f32 %v4805_v12, %v9048_v4  ;;  %v3798_v54 = vsub.f32 %v3734_v41, %v3782_v17  ;;  %v3703_v28 = vadd.f32 %v3681_v60, %v8402_v19  ;;  %6462 = vlog2.f32 %v3624_v33  ;;  %v9096_v19 = vld [vmem:[#allocation44_spill] sm:$0xff]  ;;  %v9099_v12 = vld [vmem:[#allocation45_spill] sm:$0xff] }
 0x612   :  { %v6445_v55 = vpop.eup %6444  ;;  %v4670_v27 = vadd.f32 %v9096_v19, %v4622_v62  ;;  %v3625_v17 = vadd.f32 %v9099_v12, %v3577_v16  ;;  %v4749_v62 = vadd.f32 %v4727_v31, %v8417_v35  ;;  %v4492_v60 = vmul.f32 1.442695, %v4464_v44  ;;  %v9104_v12 = vld [vmem:[#allocation102_spill] sm:$0xff] }
 0x613   :  { %v6447_v58 = vpop.eup %6446  ;;  %v4844_v32 = vsub.f32 %v4780_v61, %v4828_v57  ;;  %v3761_v52 = vmul.f32 0.6931472, %v6445_v55  ;;  %v3862_v4 = vadd.f32 %v3846_v49, %v3798_v54  ;;  %v3735_v9 = vmul.f32 %v6443_v34, %v3703_v28  ;;  %v2878_v61 = vld [vmem:[%s8654_s3 + $0x48] sm:$0xff] }
 0x614   :  { %v8446_v46 = vpop.eup %6448  ;;  %v3539_v26 = vpop.xlane.xlu0 %3538  ;;  %v4871_v0 = vmul.f32 0.6931472, %v6447_v58  ;;  %6464 = vlog2.f32 %v4670_v27 }
 0x615   :  { %v6451_v15 = vpop.eup %6450  ;;  %v4908_v13 = vadd.f32 %v4892_v18, %v4844_v32  ;;  %v3878_v14 = vmul.f32 %v3862_v4, %v2877_v47  ;;  %v3783_v30 = vadd.f32 %v3761_v52, %v9067_v48  ;;  %v3560_v21 = vadd.f32 %v3539_v26, %v8444_v6  ;;  %v9102_v52 = vld [vmem:[#allocation82_spill] sm:$0xff] }
 0x616   :  { %v6453_v23 = vpop.eup %6452  ;;  %v4781_v48 = vmul.f32 %v6451_v15, %v4749_v62  ;;  %v4515_v4 = vsub.f32 -1e+30, %v9102_v52  ;;  %v4544_v26 = vmul.f32 1.442695, %v4514_v53 }
 0x617   :  { %v6455_v41 = vpop.eup %6454  ;;  %v4807_v42 = vmul.f32 0.6931472, %v6453_v23  ;;  %v3902_v5 = vsel %vm3886_vm1, %v3878_v14, 0.0  ;;  %v4924_v49 = vmul.f32 %v4908_v13, %v2877_v47  ;;  %v3799_v50 = vsub.f32 %v3735_v9, %v3783_v30  ;;  %v9103_v13 = vld [vmem:[#allocation106_spill] sm:$0xff] }
 0x618   :  { %v8458_v33 = vpop.eup %6456  ;;  %v3903_v34 = vadd.f32 %v3902_v5, %v8415_v7  ;;  %v4585_v16 = vpop.xlane.xlu0 %4584  ;;  %6466 = vlog2.f32 %v3560_v21  ;;  %v8470_v18 = vmul.f32 0.0, %v6455_v41  ;;  %v9100_v7 = vld [vmem:[#allocation70_spill] sm:$0xff]  ;;  %v3418_v14 = vsub.f32 -1e+30, %v9103_v13 }
 0x619   :  { %v4829_v35 = vadd.f32 %v4807_v42, %v9069_v43  ;;  %v4947_v57 = vsel %vm3886_vm1, %v4924_v49, 0.0  ;;  %v3863_v54 = vadd.f32 %v3847_v10, %v3799_v50  ;;  %v8466_v28 = vpop.eup %6458  ;;  %6468 = vlog2.f32 %v3625_v17  ;;  %v9101_v43 = vld [vmem:[#allocation57_spill] sm:$0xff]  ;;  %v9106_v49 = vld [vmem:[#allocation111_spill] sm:$0xff] }
 0x61a   :  { %v4948_v55 = vadd.f32 %v4947_v57, %v8422_v24  ;;  %v4606_v40 = vadd.f32 %v4585_v16, %v8449_v63  ;;  %v4893_v39 = vadd.f32 %v4871_v0, %v9100_v7  ;;  %6470 = vrcp.f32 %v3560_v21  ;;  %v6461_v31 = vpop.eup %6460  ;;  %v9105_v42 = vld [vmem:[#allocation109_spill] sm:$0xff] }
 0x61b   :  { %v4845_v47 = vsub.f32 %v4781_v48, %v4829_v35  ;;  %v3879_v58 = vmul.f32 %v3863_v54, %v2878_v61  ;;  %v4671_v32 = vadd.f32 %v9101_v43, %v8430_v51  ;;  %v6463_v44 = vpop.eup %6462  ;;  %v8483_v51 = vmul.f32 0.0, %v6461_v31  ;;  %v9107_v35 = vld [vmem:[#allocation114_spill] sm:$0xff]  ;;  %v4729_v54 = vpop.xlane.xlu1 %4728 }
 0x61c   :  { %6472 = vrcp.f32 %v4606_v40  ;;  %v3541_v9 = vpop.xlane.xlu0 %3540  ;;  %v4546_v23 = vmul.f32 1.442695, %v4515_v4  ;;  %v4465_v17 = vsub.f32 -1e+30, %v9104_v12  ;;  %v3446_v62 = vmul.f32 1.442695, %v3418_v14 }
 0x61d   :  { %v4909_v19 = vadd.f32 %v4893_v39, %v4845_v47  ;;  %v3904_v24 = vsel %vm3886_vm1, %v3879_v58, 0.0  ;;  %6474 = vlog2.f32 %v4606_v40  ;;  %v3561_v27 = vadd.f32 %v3541_v9, %v8470_v18  ;;  %v9109_v14 = vld [vmem:[#allocation71_spill] sm:$0xff] }
 0x61e   :  { %6476 = vpow2.f32 %v4492_v60  ;;  %v8480_v15 = vadd.f32 %v3904_v24, %v3903_v34  ;;  %v6465_v0 = vpop.eup %6464  ;;  %v3419_v5 = vsub.f32 -1e+30, %v9105_v42  ;;  %v3420_v50 = vsub.f32 -1e+30, %v9106_v49 }
 0x61f   :  { %v4925_v30 = vmul.f32 %v4909_v19, %v2878_v61  ;;  %6478 = vrcp.f32 %v3561_v27  ;;  %v3827_v16 = vmul.f32 0.6931472, %v6463_v44  ;;  %v8493_v57 = vmul.f32 0.0, %v9107_v35 }
 0x620   :  { %6480 = vlog2.f32 %v3561_v27  ;;  %v4587_v21 = vpop.xlane.xlu0 %4586  ;;  %v8497_v7 = vmul.f32 0.0, %v8383_v45  ;;  %v4624_v39 = vmul.f32 0.0, %v8392_v11  ;;  %v4494_v47 = vmul.f32 1.442695, %v4465_v17  ;;  %v9110_v11 = vld [vmem:[#allocation61_spill] sm:$0xff] }
 0x621   :  { %6482 = vlog2.f32 %v4671_v32  ;;  %v4949_v8 = vsel %vm3886_vm1, %v4925_v30, 0.0  ;;  %v4607_v10 = vadd.f32 %v4587_v21, %v8483_v51  ;;  %v3448_v32 = vmul.f32 1.442695, %v3419_v5 }
 0x622   :  { %6484 = vpow2.f32 %v4544_v26  ;;  %v8487_v53 = vadd.f32 %v4949_v8, %v4948_v55  ;;  %v6467_v41 = vpop.eup %6466  ;;  %v3450_v4 = vmul.f32 1.442695, %v3420_v50  ;;  %v4873_v19 = vmul.f32 0.6931472, %v6465_v0 }
 0x623   :  { %6486 = vrcp.f32 %v4607_v10  ;;  %v6469_v48 = vpop.eup %6468  ;;  %v3763_v60 = vmul.f32 0.6931472, %v6467_v41  ;;  %v4750_v24 = vadd.f32 %v4729_v54, %v8449_v63  ;;  %v3848_v30 = vadd.f32 %v3827_v16, %v9109_v14  ;;  %v2879_v63 = vld [vmem:[%s8654_s3 + $0x50] sm:$0xff]  ;;  %v4731_v16 = vpop.xlane.xlu1 %4730 }
 0x624   :  { %6488 = vlog2.f32 %v4607_v10  ;;  %v3683_v34 = vpop.xlane.xlu0 %3682  ;;  %v6471_v61 = vpop.eup %6470  ;;  %v3421_v21 = vsub.f32 -1e+30, %v9110_v11  ;;  %v3829_v10 = vmul.f32 0.6931472, %v6469_v48 }
 0x625   :  { %6490 = vpow2.f32 %v4546_v23  ;;  %v3704_v55 = vadd.f32 %v3683_v34, %v8444_v6  ;;  %v3784_v31 = vadd.f32 %v3763_v60, %v9071_v29  ;;  %v9108_v6 = vld [vmem:[#allocation53_spill] sm:$0xff]  ;;  %v9111_v34 = vld [vmem:[#allocation72_spill] sm:$0xff] }
 0x626   :  { %v6473_v40 = vpop.eup %6472  ;;  %6492 = vpow2.f32 %v3446_v62  ;;  %v4466_v44 = vsub.f32 -1e+30, %v9108_v6 }
 0x627   :  { %v6475_v58 = vpop.eup %6474  ;;  %v3736_v43 = vmul.f32 %v6471_v61, %v3704_v55  ;;  %6494 = vpow2.f32 %v4494_v47  ;;  %v4782_v17 = vmul.f32 %v6473_v40, %v4750_v24  ;;  %v4894_v61 = vadd.f32 %v4873_v19, %v9111_v34 }
 0x628   :  { %v6477_v9 = vpop.eup %6476  ;;  %v4809_v27 = vmul.f32 0.6931472, %v6475_v58  ;;  %v3685_v26 = vpop.xlane.xlu0 %3684  ;;  %6496 = vpow2.f32 %v3448_v32  ;;  %v4496_v35 = vmul.f32 1.442695, %v4466_v44  ;;  %v9113_v32 = vld [vmem:[#allocation108_spill] sm:$0xff] }
 0x629   :  { %v6479_v45 = vpop.eup %6478  ;;  %v3800_v23 = vsub.f32 %v3736_v43, %v3784_v31  ;;  %v3705_v8 = vadd.f32 %v3685_v26, %v8470_v18  ;;  %v8511_v18 = vmul.f32 0.0, %v6477_v9  ;;  %6498 = vpow2.f32 %v3450_v4  ;;  %v9112_v31 = vld [vmem:[#allocation74_spill] sm:$0xff] }
 0x62a   :  { %v6481_v29 = vpop.eup %6480  ;;  %v4830_v0 = vadd.f32 %v4809_v27, %v9081_v25  ;;  %v3452_v25 = vmul.f32 1.442695, %v3421_v21  ;;  %v3849_v43 = vadd.f32 %v3829_v10, %v9112_v31  ;;  %v4672_v27 = vadd.f32 %v9113_v32, %v4624_v39  ;;  %v9114_v21 = vld [vmem:[#allocation105_spill] sm:$0xff] }
 0x62b   :  { %v6483_v62 = vpop.eup %6482  ;;  %v3765_v41 = vmul.f32 0.6931472, %v6481_v29  ;;  %v3864_v5 = vadd.f32 %v3848_v30, %v3800_v23  ;;  %v3737_v50 = vmul.f32 %v6479_v45, %v3705_v8  ;;  %v4751_v9 = vadd.f32 %v4731_v16, %v8483_v51  ;;  %v2880_v39 = vld [vmem:[%s8654_s3 + $0x58] sm:$0xff] }
 0x62c   :  { %v6485_v60 = vpop.eup %6484  ;;  %v4846_v48 = vsub.f32 %v4782_v17, %v4830_v0  ;;  %v3543_v54 = vpop.xlane.xlu0 %3542  ;;  %v4875_v24 = vmul.f32 0.6931472, %v6483_v62  ;;  %v4467_v23 = vsub.f32 -1e+30, %v9114_v21  ;;  %6500 = vpow2.f32 %v4496_v35  ;;  %v9115_v62 = vld [vmem:[#allocation107_spill] sm:$0xff] }
 0x62d   :  { %v6487_v55 = vpop.eup %6486  ;;  %v3880_v40 = vmul.f32 %v3864_v5, %v2879_v63  ;;  %v3785_v47 = vadd.f32 %v3765_v41, %v9084_v38  ;;  %v3626_v41 = vadd.f32 %v9115_v62, %v8497_v7  ;;  %6502 = vlog2.f32 %v4672_v27 }
 0x62e   :  { %v6489_v58 = vpop.eup %6488  ;;  %v4910_v26 = vadd.f32 %v4894_v61, %v4846_v48  ;;  %v4783_v29 = vmul.f32 %v6487_v55, %v4751_v9  ;;  %v4895_v0 = vadd.f32 %v4875_v24, %v9056_v20  ;;  %v9116_v61 = vld [vmem:[#allocation31_spill] sm:$0xff]  ;;  %v4625_v16 = vmul.f32 0.0, %v8458_v33 }
 0x62f   :  { %v8516_v19 = vpop.eup %6490  ;;  %v4811_v45 = vmul.f32 0.6931472, %v6489_v58  ;;  %v3906_v44 = vsel %vm3886_vm1, %v3880_v40, 0.0  ;;  %v3801_v14 = vsub.f32 %v3737_v50, %v3785_v47  ;;  %v4498_v35 = vmul.f32 1.442695, %v4467_v23  ;;  %v9117_v40 = vld [vmem:[#allocation112_spill] sm:$0xff] }
 0x630   :  { %v6493_v30 = vpop.eup %6492  ;;  %v3907_v38 = vadd.f32 %v3906_v44, %v8480_v15  ;;  %v4926_v4 = vmul.f32 %v4910_v26, %v2879_v63  ;;  %v4589_v8 = vpop.xlane.xlu0 %4588  ;;  %v4673_v47 = vadd.f32 %v9117_v40, %v4625_v16  ;;  %v3579_v33 = vmul.f32 0.0, %v8446_v46 }
 0x631   :  { %v4831_v10 = vadd.f32 %v4811_v45, %v9088_v56  ;;  %v3865_v51 = vadd.f32 %v3849_v43, %v3801_v14  ;;  %v4608_v17 = vadd.f32 %v4589_v8, %v8511_v18  ;;  %v6495_v34 = vpop.eup %6494  ;;  %v3629_v56 = vadd.f32 %v9116_v61, %v8493_v57  ;;  %v9118_v45 = vld [vmem:[#allocation110_spill] sm:$0xff]  ;;  %v4733_v46 = vpop.xlane.xlu1 %4732 }
 0x632   :  { %v4951_v15 = vsel %vm3886_vm1, %v4926_v4, 0.0  ;;  %v6497_v20 = vpop.eup %6496  ;;  %v8539_v31 = vmul.f32 0.0, %v6495_v34  ;;  %v8541_v57 = vmul.f32 0.0, %v6493_v30  ;;  %v4626_v24 = vmul.f32 0.0, %v6485_v60  ;;  %v9119_v30 = vld [vmem:[#allocation62_spill] sm:$0xff] }
 0x633   :  { %v4847_v63 = vsub.f32 %v4783_v29, %v4831_v10  ;;  %v4952_v5 = vadd.f32 %v4951_v15, %v8487_v53  ;;  %v3881_v50 = vmul.f32 %v3865_v51, %v2880_v39  ;;  %6504 = vrcp.f32 %v4608_v17  ;;  %v6499_v53 = vpop.eup %6498 }
 0x634   :  { %6506 = vlog2.f32 %v4608_v17  ;;  %v3545_v48 = vpop.xlane.xlu0 %3544  ;;  %v3627_v44 = vadd.f32 %v9118_v45, %v3579_v33  ;;  %v4674_v23 = vadd.f32 %v9119_v30, %v4626_v24  ;;  %v8551_v60 = vmul.f32 0.0, %v6497_v20 }
 0x635   :  { %v4911_v55 = vadd.f32 %v4895_v0, %v4847_v63  ;;  %v3908_v7 = vsel %vm3886_vm1, %v3881_v50, 0.0  ;;  %6508 = vpow2.f32 %v3452_v25  ;;  %v3562_v25 = vadd.f32 %v3543_v54, %v8541_v57 }
 0x636   :  { %v8537_v58 = vadd.f32 %v3908_v7, %v3907_v38  ;;  %6510 = vlog2.f32 %v3626_v41  ;;  %v6501_v9 = vpop.eup %6500  ;;  %v3563_v29 = vadd.f32 %v3545_v48, %v8551_v60  ;;  %v8556_v10 = vmul.f32 0.0, %v6499_v53  ;;  %v9120_v48 = vld [vmem:[#allocation84_spill] sm:$0xff]  ;;  %v4735_v7 = vpop.xlane.xlu1 %4734  ;;  %v8574_v53 = vld [vmem:[%s8654_s3 + $0x60] sm:$0xff] }
 0x637   :  { %v4927_v43 = vmul.f32 %v4911_v55, %v2880_v39  ;;  %6512 = vlog2.f32 %v3629_v56  ;;  %v6503_v38 = vpop.eup %6502  ;;  %v8553_v8 = vmul.f32 0.0, %v6501_v9  ;;  %v4752_v0 = vadd.f32 %v4733_v46, %v8511_v18 }
 0x638   :  { %v4591_v32 = vpop.xlane.xlu0 %4590  ;;  %6514 = vpow2.f32 %v4498_v35  ;;  %v4877_v17 = vmul.f32 0.6931472, %v6503_v38  ;;  %v3580_v41 = vmul.f32 0.0, %v8466_v28  ;;  %v4627_v15 = vmul.f32 0.0, %v8516_v19  ;;  %v9121_v35 = vld [vmem:[#allocation118_spill] sm:$0xff] }
 0x639   :  { %v4953_v27 = vsel %vm3886_vm1, %v4927_v43, 0.0  ;;  %v4609_v26 = vadd.f32 %v4591_v32, %v8539_v31  ;;  %6516 = vlog2.f32 %v4673_v47 }
 0x63a   :  { %v8548_v14 = vadd.f32 %v4953_v27, %v4952_v5  ;;  %v3628_v20 = vadd.f32 %v9120_v48, %v3580_v41  ;;  %v4896_v19 = vadd.f32 %v4877_v17, %v9068_v2  ;;  %v4675_v55 = vadd.f32 %v9121_v35, %v4627_v15 }
 0x63b   :  { %6518 = vrcp.f32 %v4609_v26  ;;  %v4753_v2 = vadd.f32 %v4735_v7, %v8539_v31 }
 0x63c   :  { %6520 = vlog2.f32 %v4609_v26  ;;  %v3547_v4 = vpop.xlane.xlu0 %3546 }
 0x63d   :  { %v6505_v39 = vpop.eup %6504  ;;  %6522 = vlog2.f32 %v3562_v25  ;;  %v3564_v61 = vadd.f32 %v3547_v4, %v8556_v10 }
 0x63e   :  { %v6507_v54 = vpop.eup %6506  ;;  %6524 = vlog2.f32 %v3627_v44  ;;  %v4784_v50 = vmul.f32 %v6505_v39, %v4752_v0 }
 0x63f   :  { %v6509_v51 = vpop.eup %6508  ;;  %6526 = vlog2.f32 %v4674_v23  ;;  %v4813_v62 = vmul.f32 0.6931472, %v6507_v54 }
 0x640   :  { %6528 = vrcp.f32 %v3562_v25  ;;  %v4593_v63 = vpop.xlane.xlu0 %4592  ;;  %v6511_v5 = vpop.eup %6510  ;;  %v8567_v18 = vmul.f32 0.0, %v6509_v51 }
 0x641   :  { %v4832_v34 = vadd.f32 %v4813_v62, %v9097_v1  ;;  %v4610_v56 = vadd.f32 %v4593_v63, %v8553_v8  ;;  %v8564_v16 = vpop.eup %6512  ;;  %6530 = vlog2.f32 %v3563_v29  ;;  %v3831_v54 = vmul.f32 0.6931472, %v6511_v5  ;;  %v4737_v62 = vpop.xlane.xlu1 %4736 }
 0x642   :  { %v6515_v28 = vpop.eup %6514 }
 0x643   :  { %v4848_v40 = vsub.f32 %v4784_v50, %v4832_v34  ;;  %6532 = vrcp.f32 %v4610_v56  ;;  %v6517_v1 = vpop.eup %6516  ;;  %v8578_v27 = vmul.f32 0.0, %v6515_v28 }
 0x644   :  { %6534 = vlog2.f32 %v4610_v56  ;;  %v3549_v47 = vpop.xlane.xlu0 %3548  ;;  %v4879_v26 = vmul.f32 0.6931472, %v6517_v1 }
 0x645   :  { %v6519_v43 = vpop.eup %6518  ;;  %v4912_v33 = vadd.f32 %v4896_v19, %v4848_v40  ;;  %6536 = vlog2.f32 %v3564_v61  ;;  %v3565_v24 = vadd.f32 %v3549_v47, %v8567_v18 }
 0x646   :  { %v6521_v32 = vpop.eup %6520  ;;  %6538 = vlog2.f32 %v3628_v20  ;;  %v4785_v30 = vmul.f32 %v6519_v43, %v4753_v2  ;;  %v4897_v0 = vadd.f32 %v4879_v26, %v9086_v22 }
 0x647   :  { %v6523_v25 = vpop.eup %6522  ;;  %6540 = vlog2.f32 %v4675_v55  ;;  %v4815_v9 = vmul.f32 0.6931472, %v6521_v32  ;;  %v4928_v45 = vmul.f32 %v4912_v33, %v8574_v53 }
 0x648   :  { %v6525_v44 = vpop.eup %6524  ;;  %6542 = vrcp.f32 %v3563_v29  ;;  %v4595_v23 = vpop.xlane.xlu0 %4594  ;;  %v3767_v51 = vmul.f32 0.6931472, %v6523_v25 }
 0x649   :  { %v6527_v38 = vpop.eup %6526  ;;  %v4833_v46 = vadd.f32 %v4815_v9, %v9104_v12  ;;  %6544 = vlog2.f32 %v3565_v24  ;;  %v4611_v4 = vadd.f32 %v4595_v23, %v8578_v27  ;;  %v4955_v31 = vsel %vm3886_vm1, %v4928_v45, 0.0  ;;  %v2882_v12 = vld [vmem:[%s8654_s3 + $0x68] sm:$0xff]  ;;  %v4739_v25 = vpop.xlane.xlu1 %4738 }
 0x64a   :  { %v6529_v39 = vpop.eup %6528  ;;  %6546 = vrcp.f32 %v3564_v61  ;;  %v4956_v17 = vadd.f32 %v4955_v31, %v8548_v14  ;;  %v3850_v61 = vadd.f32 %v3831_v54, %v9060_v59  ;;  %v4754_v14 = vadd.f32 %v4737_v62, %v8553_v8  ;;  %v2883_v54 = vld [vmem:[%s8654_s3 + $0x70] sm:$0xff] }
 0x64b   :  { %v4849_v29 = vsub.f32 %v4785_v30, %v4833_v46  ;;  %6548 = vrcp.f32 %v4611_v4  ;;  %v6531_v41 = vpop.eup %6530  ;;  %v3786_v22 = vadd.f32 %v3767_v51, %v9103_v13  ;;  %v3833_v55 = vmul.f32 0.6931472, %v6525_v44 }
 0x64c   :  { %6550 = vlog2.f32 %v4611_v4  ;;  %v3687_v15 = vpop.xlane.xlu0 %3686  ;;  %v3769_v48 = vmul.f32 0.6931472, %v6531_v41  ;;  %v4881_v7 = vmul.f32 0.6931472, %v6527_v38  ;;  %v3837_v30 = vmul.f32 0.6931472, %v8564_v16 }
 0x64d   :  { %v6533_v63 = vpop.eup %6532  ;;  %v4913_v50 = vadd.f32 %v4897_v0, %v4849_v29  ;;  %v3706_v5 = vadd.f32 %v3687_v15, %v8541_v57  ;;  %6552 = vrcp.f32 %v3565_v24  ;;  %v4755_v16 = vadd.f32 %v4739_v25, %v8578_v27 }
 0x64e   :  { %v6535_v34 = vpop.eup %6534  ;;  %v4786_v40 = vmul.f32 %v6533_v63, %v4754_v14  ;;  %v3787_v45 = vadd.f32 %v3769_v48, %v9105_v42 }
 0x64f   :  { %v6537_v56 = vpop.eup %6536  ;;  %v4817_v20 = vmul.f32 0.6931472, %v6535_v34  ;;  %v3738_v28 = vmul.f32 %v6529_v39, %v3706_v5  ;;  %v4929_v19 = vmul.f32 %v4913_v50, %v2882_v12 }
 0x650   :  { %v6539_v35 = vpop.eup %6538  ;;  %v3689_v1 = vpop.xlane.xlu0 %3688  ;;  %v3771_v33 = vmul.f32 0.6931472, %v6537_v56 }
 0x651   :  { %v6541_v47 = vpop.eup %6540  ;;  %v4834_v57 = vadd.f32 %v4817_v20, %v9108_v6  ;;  %v3802_v43 = vsub.f32 %v3738_v28, %v3786_v22  ;;  %v3707_v59 = vadd.f32 %v3689_v1, %v8551_v60  ;;  %v4957_v8 = vsel %vm3886_vm1, %v4929_v19, 0.0  ;;  %v9122_v19 = vld [vmem:[#allocation73_spill] sm:$0xff] }
 0x652   :  { %v6543_v13 = vpop.eup %6542  ;;  %v4958_v32 = vadd.f32 %v4957_v8, %v4956_v17  ;;  %v3851_v6 = vadd.f32 %v3833_v55, %v9075_v36  ;;  %v3835_v23 = vmul.f32 0.6931472, %v6539_v35  ;;  %v4898_v60 = vadd.f32 %v4881_v7, %v9094_v3 }
 0x653   :  { %v6545_v2 = vpop.eup %6544  ;;  %v4850_v26 = vsub.f32 %v4786_v40, %v4834_v57  ;;  %v3866_v9 = vadd.f32 %v3850_v61, %v3802_v43  ;;  %v3739_v44 = vmul.f32 %v6543_v13, %v3707_v59  ;;  %v4883_v4 = vmul.f32 0.6931472, %v6541_v47 }
 0x654   :  { %v6547_v24 = vpop.eup %6546  ;;  %v3691_v38 = vpop.xlane.xlu0 %3690  ;;  %v3773_v17 = vmul.f32 0.6931472, %v6545_v2  ;;  %v3788_v36 = vadd.f32 %v3771_v33, %v9106_v49  ;;  %v3853_v35 = vadd.f32 %v3837_v30, %v9122_v19 }
 0x655   :  { %v6549_v46 = vpop.eup %6548  ;;  %v3882_v31 = vmul.f32 %v3866_v9, %v8574_v53  ;;  %v3803_v39 = vsub.f32 %v3739_v44, %v3787_v45  ;;  %v3708_v42 = vadd.f32 %v3691_v38, %v8556_v10  ;;  %v4914_v0 = vadd.f32 %v4898_v60, %v4850_v26  ;;  %v2885_v38 = vld [vmem:[#allocation2] sm:$0x1] }
 0x656   :  { %v6551_v51 = vpop.eup %6550  ;;  %v3852_v53 = vadd.f32 %v3835_v23, %v9087_v37  ;;  %v4787_v15 = vmul.f32 %v6549_v46, %v4755_v16  ;;  %v4899_v14 = vadd.f32 %v4883_v4, %v9102_v52  ;;  %v3789_v22 = vadd.f32 %v3773_v17, %v9110_v11  ;;  %v3931_v46 = vld [vmem:[#allocation3] sm:$0x1] }
 0x657   :  { %v4819_v3 = vmul.f32 0.6931472, %v6551_v51  ;;  %v3910_v62 = vsel %vm3886_vm1, %v3882_v31, 0.0  ;;  %v3867_v29 = vadd.f32 %v3851_v6, %v3803_v39  ;;  %v3740_v41 = vmul.f32 %v6547_v24, %v3708_v42  ;;  %v6553_v49 = vpop.eup %6552 }
 0x658   :  { %v3693_v63 = vpop.xlane.xlu0 %3692  ;;  %v4930_v50 = vmul.f32 %v4914_v0, %v2883_v54  ;;  %v3911_v5 = vadd.f32 %v3910_v62, %v8537_v58 }
 0x659   :  { %v4835_v10 = vadd.f32 %v4819_v3, %v9114_v21  ;;  %v3883_v34 = vmul.f32 %v3867_v29, %v2882_v12  ;;  %v3804_v27 = vsub.f32 %v3740_v41, %v3788_v36  ;;  %v3709_v61 = vadd.f32 %v3693_v63, %v8567_v18  ;;  %v2884_v21 = vld [vmem:[%s8654_s3 + $0x78] sm:$0xff] }
 0x65a   :  { %v4959_v56 = vsel %vm3886_vm1, %v4930_v50, 0.0 }
 0x65b   :  { %v4851_v48 = vsub.f32 %v4787_v15, %v4835_v10  ;;  %v3868_v37 = vadd.f32 %v3852_v53, %v3804_v27  ;;  %v3741_v20 = vmul.f32 %v6553_v49, %v3709_v61  ;;  %v4960_v28 = vadd.f32 %v4959_v56, %v4958_v32 }
 0x65c   :  { %v3912_v58 = vsel %vm3886_vm1, %v3883_v34, 0.0 }
 0x65d   :  { %v3884_v18 = vmul.f32 %v3868_v37, %v2883_v54  ;;  %v3805_v12 = vsub.f32 %v3741_v20, %v3789_v22  ;;  %v4915_v55 = vadd.f32 %v4899_v14, %v4851_v48  ;;  %v3913_v52 = vadd.f32 %v3912_v58, %v3911_v5 }
 0x65f   :  { %v3869_v7 = vadd.f32 %v3853_v35, %v3805_v12  ;;  %v4931_v11 = vmul.f32 %v4915_v55, %v2884_v21  ;;  %v3914_v40 = vsel %vm3886_vm1, %v3884_v18, 0.0 }
 0x660   :  { %v3915_v1 = vadd.f32 %v3914_v40, %v3913_v52 }
 0x661   :  { %v4961_v47 = vsel %vm3886_vm1, %v4931_v11, 0.0  ;;  %v3885_v57 = vmul.f32 %v3869_v7, %v2884_v21 }
 0x662   :  { %v4962_v43 = vadd.f32 %v4961_v47, %v4960_v28 }
 0x663   :  { %v3916_v59 = vsel %vm3886_vm1, %v3885_v57, 0.0 }
 0x664   :  { %4963 = vadd.xlane.f32.xlu1 %v4962_v43  ;;  %v3917_v8 = vadd.f32 %v3916_v59, %v3915_v1 }
 0x666   :  { %3918 = vadd.xlane.f32.xlu0 %v3917_v8 }
 0x6f1   :  { %v4964_v13 = vpop.xlane.xlu1 %4963 }
 0x6f2   :  { %v4965_v33 = vrot.slane %v4964_v13, 4 }
 0x6f3   :  { %v3919_v32 = vpop.xlane.xlu0 %3918 }
 0x6f4   :  { %v4966_v2 = vadd.f32 %v4965_v33, %v4964_v13  ;;  %v3920_v25 = vrot.slane %v3919_v32, 4 }
 0x6f6   :  { %v4967_v26 = vrot.slane %v4966_v2, 2  ;;  %v3921_v9 = vadd.f32 %v3920_v25, %v3919_v32 }
 0x6f8   :  { %v4968_v45 = vadd.f32 %v4967_v26, %v4966_v2  ;;  %v3922_v44 = vrot.slane %v3921_v9, 2 }
 0x6fa   :  { %v3923_v24 = vadd.f32 %v3922_v44, %v3921_v9  ;;  %v4969_v30 = vrot.slane %v4968_v45, 1 }
 0x6fc   :  { %v3924_v6 = vrot.slane %v3923_v24, 1  ;;  %v4970_v60 = vadd.f32 %v4969_v30, %v4968_v45 }
 0x6fe   :  { %v3925_v23 = vadd.f32 %v3924_v6, %v3923_v24 }
 0x700   :  { %5606 = vpush %v3925_v23 }
 0x701   :  { %5608 = vpush %v4970_v60 }
 0x731   :  { %s5607_s3 = spop %5606 }
 0x732   :  { %v3927_v4 = vstv %s5607_s3  ;;  %s5609_s4 = spop %5608 }
 0x733   :  { %v3928_v31 = vadd.f32 %v3927_v4, %v2885_v38  ;;  %v4972_v39 = vstv %s5609_s4 }
 0x734   :  { %v4973_v54 = vadd.f32 %v4972_v39, %v3931_v46 }
 0x735   :  { %3930 = vst.msk [vmem:[#allocation2] sm:$0x1] %vm198_vm0, %v3928_v31 }
 0x736   :  { %4974 = vst.msk [vmem:[#allocation3] sm:$0x1] %vm198_vm0, %v4973_v54 }
 0x737 PF:  { %s6780_s8 = smov [#allocation18]   ;;  %s6781_s29 = smov [#allocation19]  }
 0x738   :  { %s4989_s25 = sshll.u32 %s6780_s8, 4  ;;  %s4999_s30 = sshll.u32 %s6781_s29, 4  ;;  %s4990_s25 = int_to_ptr.vmem [resolvable:$true] %s4989_s25  ;;  %s5000_s30 = int_to_ptr.vmem [resolvable:$true] %s4999_s30 }
 0x739   :  { %s6710_s7 = scalar_lea.vmem %s4990_s25, 16  ;;  %s6714_s18 = scalar_lea.vmem %s4990_s25, 32 }
 0x73a   :  { %p6711_p1 = scmp.ne.s32.totalorder %s4990_s25, %s6710_s7  ;;  %p6715_p2 = scmp.lt.s32.totalorder %s4990_s25, %s4990_s25 }
 0x73b   :  { %p6716_p3 = scmp.lt.s32.totalorder %s6714_s18, %s6710_s7 }
 0x73c   :  { %v4978_v42 = vld [vmem:[#allocation2] sm:$0x1] }
 0x73d   :  { %v4981_v51 = vld [vmem:[#allocation3] sm:$0x1]  ;;  %4980 = vst.msk [vmem:[#allocation18] sm:$0x1] %vm198_vm0, %v4978_v42  ;;  %p6717_p4 = por %p6716_p3, %p6715_p2 }
 0x73e   :  { %4982 = vst.msk [vmem:[#allocation19] sm:$0x1] %vm198_vm0, %v4981_v51 }
 0x73f   :  { %p6718_p5 = pnand %p6717_p4, %p6711_p1 }
 0x741   :  { %6721 = shalt.err (!%p6718_p5)
}
 0x742   :  { %s6722_s0 = scalar_lea.hbm %s8663_s12, 16 }
 0x743   :  { %p6723_p6 = scmp.ne.s32.totalorder %s8663_s12, %s6722_s0  ;;  %p6726_p7 = scmp.lt.u32.totalorder %s6722_s0, %s8663_s12 }
 0x745   :  { %p6728_p8 = pnand %p6726_p7, %p6723_p6 }
 0x747   :  { %6731 = shalt.err (!%p6728_p8)
}
 0x748   :  { %4992 = dma.vmem_to_hbm [thread:$0]  %s4990_s25, 16, %s8663_s12, [#allocation8]  }
 0x749   :  { %s6732_s1 = scalar_lea.vmem %s5000_s30, 16  ;;  %s6736_s20 = scalar_lea.vmem %s5000_s30, 32 }
 0x74a   :  { %p6733_p9 = scmp.ne.s32.totalorder %s5000_s30, %s6732_s1  ;;  %p6737_p10 = scmp.lt.s32.totalorder %s5000_s30, %s5000_s30 }
 0x74b   :  { %p6738_p11 = scmp.lt.s32.totalorder %s6736_s20, %s6732_s1 }
 0x74d   :  { %p6739_p12 = por %p6738_p11, %p6737_p10 }
 0x74f   :  { %p6740_p13 = pnand %p6739_p12, %p6733_p9 }
 0x751   :  { %6743 = shalt.err (!%p6740_p13)
}
 0x752   :  { %s6744_s15 = scalar_lea.hbm %s8664_s13, 16 }
 0x753   :  { %p6745_p0 = scmp.ne.s32.totalorder %s8664_s13, %s6744_s15  ;;  %p6748_p1 = scmp.lt.u32.totalorder %s6744_s15, %s8664_s13 }
 0x755   :  { %p6750_p2 = pnand %p6748_p1, %p6745_p0 }
 0x757   :  { %6753 = shalt.err (!%p6750_p2)
}
 0x758   :  { %5002 = dma.vmem_to_hbm [thread:$0]  %s5000_s30, 16, %s8664_s13, [#allocation20]  }
 0x759   :  { %6762 = dma.done.wait [#allocation8], 16  }
 0x75a   :  { %6763 = vsyncadd [#allocation8], 4294967280 }
 0x75b   :  { %6764 = dma.done.wait [#allocation20], 16  }
 0x75c   :  { %6765 = vsyncadd [#allocation20], 4294967280 }
 0x75d   :  { %5009 = vsyncpa [#allocation7], 1 }
 0x75e   :  { %5010 = vsyncpa [#allocation10], 1 }
 0x75f   :  { %5011 = vsyncpa [#allocation13], 1 }
 0x760   :  { %5012 = vsyncpa [#allocation16], 1 }
 0x761   :  { %5013 = vsyncpa [#allocation8], 1 }
 0x762   :  { %5014 = vsyncpa [#allocation20], 1 }

</bundles_post_ra>
